<compile_context>
chip_gen: v6e
topology: v6e:2x2x1
jax: 0.10.0
libtpu: 0.0.40
codegen_flags: <defaults>
</compile_context>

<pallas_src>
import math

import jax
import jax.numpy as jnp
from jax.experimental import pallas as pl
from jax.experimental.pallas import tpu as pltpu


# Architecture constants (fixed by the PyTorch module).
KERNALS = [5, 7, 9, 11, 11, 11]
DRUG_FILTERS = [50, 1, 1, 32, 64, 128, 200]
PROT_FILTERS = [50, 96, 128, 200]
FC_DIMS = [400, 200, 100, 1]
EMB_DIM = 50
C_PAD = 256        # 200-wide conv / FC1 channels zero-padded to 256 (lane-dense)
H2_PAD = 128       # FC2 width padded 100 -> 128
MXU_DEPTH = 256    # target contraction depth per grouped-tap matmul

# Row layout of the consolidated "smalls" (16, 256) f32 array.
(ROW_BD0, ROW_BD1, ROW_BD2, ROW_BD3, ROW_BD4, ROW_BD5,
 ROW_BP0, ROW_BP1, ROW_BP2, ROW_BFC1, ROW_BFC2, ROW_BFC3,
 ROW_WD0, ROW_WD1, ROW_WFC3) = range(15)
N_SMALL_ROWS = 16


# ----------------------------------------------------------------------------
# In-kernel helpers (operate on VMEM-resident values; leading dim = TB batch)
# ----------------------------------------------------------------------------
def _pad_seq(x, pad):
    """Zero-pad a (TB, L, C) value with `pad` rows along the L axis."""
    if pad == 0:
        return x
    z = jnp.zeros((x.shape[0], pad, x.shape[2]), x.dtype)
    return jnp.concatenate([z, x, z], axis=1)


def _conv_relu_vpu_cout1(x, w_1w, b_11, ksize):
    """Cout == 1 conv + ReLU on the VPU (lane multiply + lane reduction).

    x: (TB, L, Cin) f32;  w_1w: (1, K*Cin) f32 (k-major);  b_11: (1, 1) f32.
    Tiny absolute work (drug 50->1 and 1->1 layers) - kept as a short prologue.
    """
    TB, L, _ = x.shape
    xp = _pad_seq(x, ksize // 2)
    cols = jnp.concatenate([xp[:, k:k + L, :] for k in range(ksize)], axis=2)
    y = jnp.sum(cols * w_1w.reshape(1, 1, -1), axis=-1, keepdims=True)
    return jnp.maximum(y + b_11.reshape(1, 1, 1), 0.0)          # (TB, L, 1) f32


def _conv_relu_mxu(x, w_ref, b_row, ksize):
    """Conv1d('same') + bias + ReLU as grouped-tap bf16 MXU matmuls (f32 acc).

    x: (TB, L, Cin);  w_ref: (K*Cin, Cout) bf16 VMEM ref (k-major flattening);
    b_row: (1, Cout) f32.  Returns (TB, L, Cout) bf16.
    """
    TB, L, Cin = x.shape
    Cout = w_ref.shape[1]
    xb = x.astype(jnp.bfloat16)
    xp = _pad_seq(xb, ksize // 2)                                # (TB, L+2p, Cin) bf16
    g = max(1, MXU_DEPTH // Cin)                                 # taps per matmul group
    acc = None
    for k0 in range(0, ksize, g):
        k1 = min(k0 + g, ksize)
        slab = jnp.concatenate([xp[:, k:k + L, :] for k in range(k0, k1)], axis=2)
        part = jnp.dot(slab.reshape(TB * L, (k1 - k0) * Cin),
                       w_ref[k0 * Cin:k1 * Cin, :],
                       preferred_element_type=jnp.float32)       # (TB*L, Cout) f32
        acc = part if acc is None else acc + part
    y = jnp.maximum(acc + b_row, 0.0).astype(jnp.bfloat16)
    return y.reshape(TB, L, Cout)


# ----------------------------------------------------------------------------
# Fused kernel: drug CNN + protein CNN + max-pool + FC head for TB samples.
# All weights have constant index maps -> fetched once, VMEM-resident.
# ----------------------------------------------------------------------------
def _cpi_fused_kernel(
    drug_ref, prot_ref,
    wd2_ref, wd3_ref, wd4_ref, wd5_ref,
    wp0_ref, wp1_ref, wp2_ref,
    fw1_ref, fw2_ref, sm_ref,
    o_ref):

    def brow(row, width):                       # (1, width) f32 bias / vector row
        return sm_ref[row:row + 1, :width]

    # --- drug CNN (channels-last) --------------------------------------------
    x = drug_ref[...]                                                   # (TB, Ld, 50) f32
    x = _conv_relu_vpu_cout1(x, brow(ROW_WD0, KERNALS[0] * EMB_DIM),
                             brow(ROW_BD0, 1), KERNALS[0])              # (TB, Ld, 1)
    x = _conv_relu_vpu_cout1(x, brow(ROW_WD1, KERNALS[1]),
                             brow(ROW_BD1, 1), KERNALS[1])              # (TB, Ld, 1)
    x = _conv_relu_mxu(x, wd2_ref, brow(ROW_BD2, 32),    KERNALS[2])    # (TB, Ld, 32)
    x = _conv_relu_mxu(x, wd3_ref, brow(ROW_BD3, 64),    KERNALS[3])    # (TB, Ld, 64)
    x = _conv_relu_mxu(x, wd4_ref, brow(ROW_BD4, 128),   KERNALS[4])    # (TB, Ld, 128)
    x = _conv_relu_mxu(x, wd5_ref, brow(ROW_BD5, C_PAD), KERNALS[5])    # (TB, Ld, 256)
    drug_feat = jnp.max(x, axis=1)                                      # (TB, 256) bf16

    # --- protein CNN -----------------------------------------------------------
    p = prot_ref[...]                                                   # (TB, Lp, 50) f32
    p = _conv_relu_mxu(p, wp0_ref, brow(ROW_BP0, 96),    KERNALS[0])    # (TB, Lp, 96)
    p = _conv_relu_mxu(p, wp1_ref, brow(ROW_BP1, 128),   KERNALS[1])    # (TB, Lp, 128)
    p = _conv_relu_mxu(p, wp2_ref, brow(ROW_BP2, C_PAD), KERNALS[2])    # (TB, Lp, 256)
    prot_feat = jnp.max(p, axis=1)                                      # (TB, 256) bf16

    # --- FC head (Dropout == identity at inference) ----------------------------
    feat = jnp.concatenate([drug_feat, prot_feat], axis=1)              # (TB, 512) bf16
    h = jnp.dot(feat, fw1_ref[...], preferred_element_type=jnp.float32)
    h = jnp.maximum(h + brow(ROW_BFC1, C_PAD), 0.0).astype(jnp.bfloat16)   # (TB, 256)
    h = jnp.dot(h, fw2_ref[...], preferred_element_type=jnp.float32)
    h = jnp.maximum(h + brow(ROW_BFC2, H2_PAD), 0.0)                       # (TB, 128) f32
    z = jnp.sum(h * brow(ROW_WFC3, H2_PAD), axis=1, keepdims=True)         # (TB, 1)
    z = z + sm_ref[ROW_BFC3:ROW_BFC3 + 1, 0:1]
    # sigmoid: exp on EUP + approximate reciprocal on EUP (off the VALU).
    o_ref[...] = pl.reciprocal(1.0 + jnp.exp(-z), approx=True)


# ----------------------------------------------------------------------------
# Weight packing: im2col flattening (k-major), bf16 cast for MXU operands,
# zero padding of 200-wide channels to 256, and consolidation of all small
# biases / vectors into one (16, 256) f32 array.  One-time wrapper work.
# ----------------------------------------------------------------------------
def _pack_params(params):
    (dw0, db0), (dw1, db1), (dw2, db2), (dw3, db3), (dw4, db4), (dw5, db5) = params["drug_cnn"]
    (pw0, pb0), (pw1, pb1), (pw2, pb2) = params["target_cnn"]
    (w1, b1), (w2, b2), (w3, b3) = params["fc"]

    def flat(w):                       # (K, Cin, Cout) -> (K*Cin, Cout) bf16, k-major
        return w.reshape(-1, w.shape[2]).astype(jnp.bfloat16)

    def pad_cols(wf, width):           # zero-pad Cout to `width`
        return jnp.pad(wf, ((0, 0), (0, width - wf.shape[1])))

    wd2 = flat(dw2)                                # (9, 32)
    wd3 = flat(dw3)                                # (352, 64)
    wd4 = flat(dw4)                                # (704, 128)
    wd5 = pad_cols(flat(dw5), C_PAD)               # (1408, 256)  200 -> 256 out
    wp0 = flat(pw0)                                # (250, 96)
    wp1 = flat(pw1)                                # (672, 128)
    wp2 = pad_cols(flat(pw2), C_PAD)               # (1152, 256)  200 -> 256 out

    d_feat, p_feat = DRUG_FILTERS[-1], PROT_FILTERS[-1]      # 200, 200
    h1, h2 = FC_DIMS[1], FC_DIMS[2]                          # 200, 100
    fw1 = jnp.zeros((2 * C_PAD, C_PAD), jnp.float32)
    fw1 = fw1.at[:d_feat, :h1].set(w1[:d_feat])
    fw1 = fw1.at[C_PAD:C_PAD + p_feat, :h1].set(w1[d_feat:d_feat + p_feat])
    fw1 = fw1.astype(jnp.bfloat16)                           # (512, 256)
    fw2 = jnp.zeros((C_PAD, H2_PAD), jnp.float32).at[:h1, :h2].set(w2)
    fw2 = fw2.astype(jnp.bfloat16)                           # (256, 128)

    sm = jnp.zeros((N_SMALL_ROWS, C_PAD), jnp.float32)

    def setrow(s, row, vec):
        vec = vec.reshape(-1).astype(jnp.float32)
        return s.at[row, :vec.shape[0]].set(vec)

    sm = setrow(sm, ROW_BD0, db0); sm = setrow(sm, ROW_BD1, db1)
    sm = setrow(sm, ROW_BD2, db2); sm = setrow(sm, ROW_BD3, db3)
    sm = setrow(sm, ROW_BD4, db4); sm = setrow(sm, ROW_BD5, db5)
    sm = setrow(sm, ROW_BP0, pb0); sm = setrow(sm, ROW_BP1, pb1)
    sm = setrow(sm, ROW_BP2, pb2)
    sm = setrow(sm, ROW_BFC1, b1); sm = setrow(sm, ROW_BFC2, b2); sm = setrow(sm, ROW_BFC3, b3)
    sm = setrow(sm, ROW_WD0, dw0)                 # (250,)  50->1 conv weights, k-major
    sm = setrow(sm, ROW_WD1, dw1)                 # (7,)    1->1 conv weights
    sm = setrow(sm, ROW_WFC3, w3[:, 0])           # (100,)  final FC row vector

    return [wd2, wd3, wd4, wd5, wp0, wp1, wp2, fw1, fw2, sm]


def _vmem_limit_bytes(tb, ld, lp, packed):
    """Derived scoped-VMEM limit: weights (x2 buffers) + I/O blocks (x2) +
    per-path conv transients, clamped below v7x's 64 MiB physical VMEM."""
    weight_bytes = sum(math.prod(p.shape) * p.dtype.itemsize for p in packed)
    io_bytes = tb * (ld + lp) * EMB_DIM * 4 + tb * 4

    def path(length):      # padded bf16 act + <=256-lane bf16 slab + 2 f32 partials
        return tb * length * C_PAD * (2 + 2 + 2 * 4) + tb * 16 * C_PAD * 2

    est = 2 * weight_bytes + 2 * io_bytes + path(ld) + path(lp) + (8 << 20)
    return int(min(max(est, 16 << 20), 56 << 20))


# ----------------------------------------------------------------------------
# Forward pass (mirrors CPI.CPI_Net)
# ----------------------------------------------------------------------------
def cpi_forward(params, compound_smiles, protein_seq, *, block_batch=8):
    # Embedding lookups (data-dependent gather) stay in plain JAX; everything
    # downstream runs inside a single fused Pallas kernel.
    drug = params["embed_drug"][compound_smiles].astype(jnp.float32)   # (B, Ld, 50)
    prot = params["embed_protein"][protein_seq].astype(jnp.float32)    # (B, Lp, 50)
    B, Ld, E = drug.shape
    _, Lp, _ = prot.shape

    TB = min(block_batch, B)                      # samples per grid step
    B_pad = ((B + TB - 1) // TB) * TB
    if B_pad != B:
        drug = jnp.pad(drug, ((0, B_pad - B), (0, 0), (0, 0)))
        prot = jnp.pad(prot, ((0, B_pad - B), (0, 0), (0, 0)))

    packed = _pack_params(params)

    in_specs = [
        pl.BlockSpec((TB, Ld, E), lambda i: (i, 0, 0)),
        pl.BlockSpec((TB, Lp, E), lambda i: (i, 0, 0)),
    ]
    # Weights: full-array blocks with constant index maps -> fetched once,
    # VMEM-resident across the whole grid (bf16, ~2.2 MB total).
    in_specs += [pl.BlockSpec(p.shape, (lambda i, _n=p.ndim: (0,) * _n)) for p in packed]

    out = pl.pallas_call(
        _cpi_fused_kernel,
        out_shape=jax.ShapeDtypeStruct((B_pad, 1), jnp.float32),
        grid_spec=pltpu.PrefetchScalarGridSpec(
            num_scalar_prefetch=0,
            grid=(B_pad // TB,),
            in_specs=in_specs,
            out_specs=pl.BlockSpec((TB, 1), lambda i: (i, 0)),
        ),
        compiler_params=pltpu.CompilerParams(
            dimension_semantics=("parallel",),    # batch blocks split across TCs (v7x)
            vmem_limit_bytes=_vmem_limit_bytes(TB, Ld, Lp, packed),
        ),
    )(drug, prot, *packed)
    return out[:B]


# ----------------------------------------------------------------------------
# Parameter init (deterministic, PyTorch-default-like uniform(+-1/sqrt(fan_in)))
# Conv weights stored (K, Cin, Cout); linear weights stored (din, dout).
# ----------------------------------------------------------------------------
def _conv_param(key, cin, cout, ksz):
    kw, kb = jax.random.split(key)
    bound = 1.0 / math.sqrt(cin * ksz)
    w = jax.random.uniform(kw, (ksz, cin, cout), jnp.float32, -bound, bound)
    b = jax.random.uniform(kb, (cout,), jnp.float32, -bound, bound)
    return w, b


def _linear_param(key, din, dout):
    kw, kb = jax.random.split(key)
    bound = 1.0 / math.sqrt(din)
    w = jax.random.uniform(kw, (din, dout), jnp.float32, -bound, bound)
    b = jax.random.uniform(kb, (dout,), jnp.float32, -bound, bound)
    return w, b


def init_params(key, drug_size, protein_size):
    keys = jax.random.split(key, 16)
    return {
        "embed_drug": jax.random.normal(keys[0], (drug_size, EMB_DIM), jnp.float32),
        "embed_protein": jax.random.normal(keys[1], (protein_size, EMB_DIM), jnp.float32),
        "drug_cnn": [
            _conv_param(keys[2 + i], DRUG_FILTERS[i], DRUG_FILTERS[i + 1], KERNALS[i])
            for i in range(len(DRUG_FILTERS) - 1)
        ],
        "target_cnn": [
            _conv_param(keys[8 + i], PROT_FILTERS[i], PROT_FILTERS[i + 1], KERNALS[i])
            for i in range(len(PROT_FILTERS) - 1)
        ],
        "fc": [
            _linear_param(keys[11 + i], FC_DIMS[i], FC_DIMS[i + 1])
            for i in range(3)  # cpi_fc_layers = 3
        ],
    }


# ----------------------------------------------------------------------------
# Pure-JAX f32 reference (same math, unfused) for a numerical sanity check.
# ----------------------------------------------------------------------------
def _conv1d_same_relu_ref(x, w, b):
    K = w.shape[0]
    pad = K // 2
    L = x.shape[1]
    xp = jnp.pad(x, ((0, 0), (pad, pad), (0, 0)))
    acc = jnp.zeros((x.shape[0], L, w.shape[2]), jnp.float32)
    for k in range(K):
        acc = acc + jnp.einsum("blc,cd->bld", xp[:, k:k + L, :], w[k])
    return jnp.maximum(acc + b, 0.0)


def cpi_forward_ref(params, compound_smiles, protein_seq):
    drug = params["embed_drug"][compound_smiles]
    for (w, b) in params["drug_cnn"]:
        drug = _conv1d_same_relu_ref(drug, w, b)
    drug = jnp.max(drug, axis=1)
    prot = params["embed_protein"][protein_seq]
    for (w, b) in params["target_cnn"]:
        prot = _conv1d_same_relu_ref(prot, w, b)
    prot = jnp.max(prot, axis=1)
    feat = jnp.concatenate([drug, prot], axis=1)
    (w1, b1), (w2, b2), (w3, b3) = params["fc"]
    h = jnp.maximum(feat @ w1 + b1, 0.0)
    h = jnp.maximum(h @ w2 + b2, 0.0)
    return 1.0 / (1.0 + jnp.exp(-(h @ w3 + b3)))


if __name__ == "__main__":
    drug_vocab, prot_vocab = 64, 25
    B, Ld, Lp = 2, 16, 32

    key = jax.random.PRNGKey(0)
    kp, kd, kt = jax.random.split(key, 3)
    params = init_params(kp, drug_vocab, prot_vocab)

    compound_smiles = jax.random.randint(kd, (B, Ld), 0, drug_vocab, jnp.int32)
    protein_seq = jax.random.randint(kt, (B, Lp), 0, prot_vocab, jnp.int32)

    out = jax.jit(cpi_forward)(params, compound_smiles, protein_seq)
    out = jax.block_until_ready(out)
    assert out.shape == (B, 1)

    ref = cpi_forward_ref(params, compound_smiles, protein_seq)
    err = float(jnp.max(jnp.abs(out - ref)))
    # bf16 MXU operands with f32 accumulation (reference is pure f32): allow for
    # bf16 rounding noise; wiring/math bugs would show up as O(0.1)+ errors.
    assert err < 2e-2, f"kernel/reference mismatch: max abs err = {err}"
    print("KERNEL_OK")
</pallas_src>

<mosaic_0001>
module attributes {stable_mosaic.version = 11 : i64} {
  func.func @_cpi_fused_kernel(%arg0: i32, %arg1: memref<2x16x50xf32, #tpu.memory_space<vmem>>, %arg2: memref<2x32x50xf32, #tpu.memory_space<vmem>>, %arg3: memref<9x32xbf16, #tpu.memory_space<vmem>>, %arg4: memref<352x64xbf16, #tpu.memory_space<vmem>>, %arg5: memref<704x128xbf16, #tpu.memory_space<vmem>>, %arg6: memref<1408x256xbf16, #tpu.memory_space<vmem>>, %arg7: memref<250x96xbf16, #tpu.memory_space<vmem>>, %arg8: memref<672x128xbf16, #tpu.memory_space<vmem>>, %arg9: memref<1152x256xbf16, #tpu.memory_space<vmem>>, %arg10: memref<512x256xbf16, #tpu.memory_space<vmem>>, %arg11: memref<256x128xbf16, #tpu.memory_space<vmem>>, %arg12: memref<16x256xf32, #tpu.memory_space<vmem>>, %arg13: memref<2x1xf32, #tpu.memory_space<vmem>>) attributes {dimension_semantics = [#tpu.dimension_semantics<parallel>], iteration_bounds = array<i64: 1>, scalar_prefetch = 0 : i64, scratch_operands = 0 : i64, tpu.core_type = #tpu.core_type<tc>, window_params = [{transform_indices = @transform_0, window_bounds = array<i64: 2, 16, 50>}, {transform_indices = @transform_1, window_bounds = array<i64: 2, 32, 50>}, {pipeline_mode = #tpu.pipeline_mode<synchronous>, transform_indices = @transform_2, window_bounds = array<i64: 9, 32>}, {pipeline_mode = #tpu.pipeline_mode<synchronous>, transform_indices = @transform_3, window_bounds = array<i64: 352, 64>}, {pipeline_mode = #tpu.pipeline_mode<synchronous>, transform_indices = @transform_4, window_bounds = array<i64: 704, 128>}, {pipeline_mode = #tpu.pipeline_mode<synchronous>, transform_indices = @transform_5, window_bounds = array<i64: 1408, 256>}, {pipeline_mode = #tpu.pipeline_mode<synchronous>, transform_indices = @transform_6, window_bounds = array<i64: 250, 96>}, {pipeline_mode = #tpu.pipeline_mode<synchronous>, transform_indices = @transform_7, window_bounds = array<i64: 672, 128>}, {pipeline_mode = #tpu.pipeline_mode<synchronous>, transform_indices = @transform_8, window_bounds = array<i64: 1152, 256>}, {pipeline_mode = #tpu.pipeline_mode<synchronous>, transform_indices = @transform_9, window_bounds = array<i64: 512, 256>}, {pipeline_mode = #tpu.pipeline_mode<synchronous>, transform_indices = @transform_10, window_bounds = array<i64: 256, 128>}, {pipeline_mode = #tpu.pipeline_mode<synchronous>, transform_indices = @transform_11, window_bounds = array<i64: 16, 256>}, {transform_indices = @transform_12, window_bounds = array<i64: 2, 1>}]} {
    %c0 = arith.constant 0 : index
    %c0_0 = arith.constant 0 : index
    %c0_1 = arith.constant 0 : index
    %0 = vector.load %arg1[%c0, %c0_0, %c0_1] : memref<2x16x50xf32, #tpu.memory_space<vmem>>, vector<2x16x50xf32>
    %c12 = arith.constant 12 : index
    %c0_2 = arith.constant 0 : index
    %1 = vector.load %arg12[%c12, %c0_2] : memref<16x256xf32, #tpu.memory_space<vmem>>, vector<1x250xf32>
    %c0_3 = arith.constant 0 : index
    %c0_4 = arith.constant 0 : index
    %2 = vector.load %arg12[%c0_3, %c0_4] : memref<16x256xf32, #tpu.memory_space<vmem>>, vector<1x1xf32>
    %cst = arith.constant 0.000000e+00 : f32
    %3 = vector.broadcast %cst : f32 to vector<2x2x50xf32>
    %4 = tpu.concatenate %3, %0, %3 in 1 : vector<2x2x50xf32>, vector<2x16x50xf32>, vector<2x2x50xf32> -> vector<2x20x50xf32>
    %5 = vector.extract_strided_slice %4 {offsets = [0, 0, 0], sizes = [2, 16, 50], strides = [1, 1, 1]} : vector<2x20x50xf32> to vector<2x16x50xf32>
    %6 = vector.extract_strided_slice %4 {offsets = [0, 1, 0], sizes = [2, 16, 50], strides = [1, 1, 1]} : vector<2x20x50xf32> to vector<2x16x50xf32>
    %7 = vector.extract_strided_slice %4 {offsets = [0, 2, 0], sizes = [2, 16, 50], strides = [1, 1, 1]} : vector<2x20x50xf32> to vector<2x16x50xf32>
    %8 = vector.extract_strided_slice %4 {offsets = [0, 3, 0], sizes = [2, 16, 50], strides = [1, 1, 1]} : vector<2x20x50xf32> to vector<2x16x50xf32>
    %9 = vector.extract_strided_slice %4 {offsets = [0, 4, 0], sizes = [2, 16, 50], strides = [1, 1, 1]} : vector<2x20x50xf32> to vector<2x16x50xf32>
    %10 = tpu.concatenate %5, %6, %7, %8, %9 in 2 : vector<2x16x50xf32>, vector<2x16x50xf32>, vector<2x16x50xf32>, vector<2x16x50xf32>, vector<2x16x50xf32> -> vector<2x16x250xf32>
    %11 = vector.shape_cast %1 : vector<1x250xf32> to vector<1x1x250xf32>
    %12 = vector.broadcast %11 : vector<1x1x250xf32> to vector<2x16x250xf32>
    %13 = arith.mulf %10, %12 : vector<2x16x250xf32>
    %cst_5 = arith.constant dense<0.000000e+00> : vector<2x16xf32>
    %14 = vector.multi_reduction <add>, %13, %cst_5 [2] : vector<2x16x250xf32> to vector<2x16xf32>
    %15 = vector.shape_cast %14 : vector<2x16xf32> to vector<2x16x1xf32>
    %16 = vector.shape_cast %2 : vector<1x1xf32> to vector<1x1x1xf32>
    %17 = vector.broadcast %16 : vector<1x1x1xf32> to vector<2x16x1xf32>
    %18 = arith.addf %15, %17 : vector<2x16x1xf32>
    %cst_6 = arith.constant 0.000000e+00 : f32
    %19 = vector.broadcast %cst_6 : f32 to vector<2x16x1xf32>
    %20 = arith.maximumf %18, %19 : vector<2x16x1xf32>
    %c13 = arith.constant 13 : index
    %c0_7 = arith.constant 0 : index
    %21 = vector.load %arg12[%c13, %c0_7] : memref<16x256xf32, #tpu.memory_space<vmem>>, vector<1x7xf32>
    %c1 = arith.constant 1 : index
    %c0_8 = arith.constant 0 : index
    %22 = vector.load %arg12[%c1, %c0_8] : memref<16x256xf32, #tpu.memory_space<vmem>>, vector<1x1xf32>
    %cst_9 = arith.constant 0.000000e+00 : f32
    %23 = vector.broadcast %cst_9 : f32 to vector<2x3x1xf32>
    %24 = tpu.concatenate %23, %20, %23 in 1 : vector<2x3x1xf32>, vector<2x16x1xf32>, vector<2x3x1xf32> -> vector<2x22x1xf32>
    %25 = vector.extract_strided_slice %24 {offsets = [0, 0, 0], sizes = [2, 16, 1], strides = [1, 1, 1]} : vector<2x22x1xf32> to vector<2x16x1xf32>
    %26 = vector.extract_strided_slice %24 {offsets = [0, 1, 0], sizes = [2, 16, 1], strides = [1, 1, 1]} : vector<2x22x1xf32> to vector<2x16x1xf32>
    %27 = vector.extract_strided_slice %24 {offsets = [0, 2, 0], sizes = [2, 16, 1], strides = [1, 1, 1]} : vector<2x22x1xf32> to vector<2x16x1xf32>
    %28 = vector.extract_strided_slice %24 {offsets = [0, 3, 0], sizes = [2, 16, 1], strides = [1, 1, 1]} : vector<2x22x1xf32> to vector<2x16x1xf32>
    %29 = vector.extract_strided_slice %24 {offsets = [0, 4, 0], sizes = [2, 16, 1], strides = [1, 1, 1]} : vector<2x22x1xf32> to vector<2x16x1xf32>
    %30 = vector.extract_strided_slice %24 {offsets = [0, 5, 0], sizes = [2, 16, 1], strides = [1, 1, 1]} : vector<2x22x1xf32> to vector<2x16x1xf32>
    %31 = vector.extract_strided_slice %24 {offsets = [0, 6, 0], sizes = [2, 16, 1], strides = [1, 1, 1]} : vector<2x22x1xf32> to vector<2x16x1xf32>
    %32 = tpu.concatenate %25, %26, %27, %28, %29, %30, %31 in 2 : vector<2x16x1xf32>, vector<2x16x1xf32>, vector<2x16x1xf32>, vector<2x16x1xf32>, vector<2x16x1xf32>, vector<2x16x1xf32>, vector<2x16x1xf32> -> vector<2x16x7xf32>
    %33 = vector.shape_cast %21 : vector<1x7xf32> to vector<1x1x7xf32>
    %34 = vector.broadcast %33 : vector<1x1x7xf32> to vector<2x16x7xf32>
    %35 = arith.mulf %32, %34 : vector<2x16x7xf32>
    %cst_10 = arith.constant dense<0.000000e+00> : vector<2x16xf32>
    %36 = vector.multi_reduction <add>, %35, %cst_10 [2] : vector<2x16x7xf32> to vector<2x16xf32>
    %37 = vector.shape_cast %36 : vector<2x16xf32> to vector<2x16x1xf32>
    %38 = vector.shape_cast %22 : vector<1x1xf32> to vector<1x1x1xf32>
    %39 = vector.broadcast %38 : vector<1x1x1xf32> to vector<2x16x1xf32>
    %40 = arith.addf %37, %39 : vector<2x16x1xf32>
    %cst_11 = arith.constant 0.000000e+00 : f32
    %41 = vector.broadcast %cst_11 : f32 to vector<2x16x1xf32>
    %42 = arith.maximumf %40, %41 : vector<2x16x1xf32>
    %c2 = arith.constant 2 : index
    %c0_12 = arith.constant 0 : index
    %43 = vector.load %arg12[%c2, %c0_12] : memref<16x256xf32, #tpu.memory_space<vmem>>, vector<1x32xf32>
    %44 = arith.truncf %42 : vector<2x16x1xf32> to vector<2x16x1xbf16>
    %cst_13 = arith.constant 0.000000e+00 : bf16
    %45 = vector.broadcast %cst_13 : bf16 to vector<2x4x1xbf16>
    %46 = tpu.concatenate %45, %44, %45 in 1 : vector<2x4x1xbf16>, vector<2x16x1xbf16>, vector<2x4x1xbf16> -> vector<2x24x1xbf16>
    %47 = vector.extract_strided_slice %46 {offsets = [0, 0, 0], sizes = [2, 16, 1], strides = [1, 1, 1]} : vector<2x24x1xbf16> to vector<2x16x1xbf16>
    %48 = vector.extract_strided_slice %46 {offsets = [0, 1, 0], sizes = [2, 16, 1], strides = [1, 1, 1]} : vector<2x24x1xbf16> to vector<2x16x1xbf16>
    %49 = vector.extract_strided_slice %46 {offsets = [0, 2, 0], sizes = [2, 16, 1], strides = [1, 1, 1]} : vector<2x24x1xbf16> to vector<2x16x1xbf16>
    %50 = vector.extract_strided_slice %46 {offsets = [0, 3, 0], sizes = [2, 16, 1], strides = [1, 1, 1]} : vector<2x24x1xbf16> to vector<2x16x1xbf16>
    %51 = vector.extract_strided_slice %46 {offsets = [0, 4, 0], sizes = [2, 16, 1], strides = [1, 1, 1]} : vector<2x24x1xbf16> to vector<2x16x1xbf16>
    %52 = vector.extract_strided_slice %46 {offsets = [0, 5, 0], sizes = [2, 16, 1], strides = [1, 1, 1]} : vector<2x24x1xbf16> to vector<2x16x1xbf16>
    %53 = vector.extract_strided_slice %46 {offsets = [0, 6, 0], sizes = [2, 16, 1], strides = [1, 1, 1]} : vector<2x24x1xbf16> to vector<2x16x1xbf16>
    %54 = vector.extract_strided_slice %46 {offsets = [0, 7, 0], sizes = [2, 16, 1], strides = [1, 1, 1]} : vector<2x24x1xbf16> to vector<2x16x1xbf16>
    %55 = vector.extract_strided_slice %46 {offsets = [0, 8, 0], sizes = [2, 16, 1], strides = [1, 1, 1]} : vector<2x24x1xbf16> to vector<2x16x1xbf16>
    %56 = tpu.concatenate %47, %48, %49, %50, %51, %52, %53, %54, %55 in 2 : vector<2x16x1xbf16>, vector<2x16x1xbf16>, vector<2x16x1xbf16>, vector<2x16x1xbf16>, vector<2x16x1xbf16>, vector<2x16x1xbf16>, vector<2x16x1xbf16>, vector<2x16x1xbf16>, vector<2x16x1xbf16> -> vector<2x16x9xbf16>
    %57 = vector.shape_cast %56 : vector<2x16x9xbf16> to vector<32x9xbf16>
    %c0_14 = arith.constant 0 : index
    %c0_15 = arith.constant 0 : index
    %58 = vector.load %arg3[%c0_14, %c0_15] : memref<9x32xbf16, #tpu.memory_space<vmem>>, vector<9x32xbf16>
    %cst_16 = arith.constant dense<0.000000e+00> : vector<32x32xf32>
    %59 = tpu.matmul %57, %58, %cst_16 {dimension_numbers = #tpu.dot_dimension_numbers<[1], [0], [0], [1], [0, 0, 1, 1], [], []>} : vector<32x9xbf16>, vector<9x32xbf16>, vector<32x32xf32> -> vector<32x32xf32>
    %60 = vector.broadcast %43 : vector<1x32xf32> to vector<32x32xf32>
    %61 = arith.addf %59, %60 : vector<32x32xf32>
    %cst_17 = arith.constant 0.000000e+00 : f32
    %62 = vector.broadcast %cst_17 : f32 to vector<32x32xf32>
    %63 = arith.maximumf %61, %62 : vector<32x32xf32>
    %64 = arith.truncf %63 : vector<32x32xf32> to vector<32x32xbf16>
    %65 = vector.shape_cast %64 : vector<32x32xbf16> to vector<2x16x32xbf16>
    %c3 = arith.constant 3 : index
    %c0_18 = arith.constant 0 : index
    %66 = vector.load %arg12[%c3, %c0_18] : memref<16x256xf32, #tpu.memory_space<vmem>>, vector<1x64xf32>
    %cst_19 = arith.constant 0.000000e+00 : bf16
    %67 = vector.broadcast %cst_19 : bf16 to vector<2x5x32xbf16>
    %68 = tpu.concatenate %67, %65, %67 in 1 : vector<2x5x32xbf16>, vector<2x16x32xbf16>, vector<2x5x32xbf16> -> vector<2x26x32xbf16>
    %69 = vector.extract_strided_slice %68 {offsets = [0, 0, 0], sizes = [2, 16, 32], strides = [1, 1, 1]} : vector<2x26x32xbf16> to vector<2x16x32xbf16>
    %70 = vector.extract_strided_slice %68 {offsets = [0, 1, 0], sizes = [2, 16, 32], strides = [1, 1, 1]} : vector<2x26x32xbf16> to vector<2x16x32xbf16>
    %71 = vector.extract_strided_slice %68 {offsets = [0, 2, 0], sizes = [2, 16, 32], strides = [1, 1, 1]} : vector<2x26x32xbf16> to vector<2x16x32xbf16>
    %72 = vector.extract_strided_slice %68 {offsets = [0, 3, 0], sizes = [2, 16, 32], strides = [1, 1, 1]} : vector<2x26x32xbf16> to vector<2x16x32xbf16>
    %73 = vector.extract_strided_slice %68 {offsets = [0, 4, 0], sizes = [2, 16, 32], strides = [1, 1, 1]} : vector<2x26x32xbf16> to vector<2x16x32xbf16>
    %74 = vector.extract_strided_slice %68 {offsets = [0, 5, 0], sizes = [2, 16, 32], strides = [1, 1, 1]} : vector<2x26x32xbf16> to vector<2x16x32xbf16>
    %75 = vector.extract_strided_slice %68 {offsets = [0, 6, 0], sizes = [2, 16, 32], strides = [1, 1, 1]} : vector<2x26x32xbf16> to vector<2x16x32xbf16>
    %76 = vector.extract_strided_slice %68 {offsets = [0, 7, 0], sizes = [2, 16, 32], strides = [1, 1, 1]} : vector<2x26x32xbf16> to vector<2x16x32xbf16>
    %77 = tpu.concatenate %69, %70, %71, %72, %73, %74, %75, %76 in 2 : vector<2x16x32xbf16>, vector<2x16x32xbf16>, vector<2x16x32xbf16>, vector<2x16x32xbf16>, vector<2x16x32xbf16>, vector<2x16x32xbf16>, vector<2x16x32xbf16>, vector<2x16x32xbf16> -> vector<2x16x256xbf16>
    %78 = vector.shape_cast %77 : vector<2x16x256xbf16> to vector<32x256xbf16>
    %c0_20 = arith.constant 0 : index
    %c0_21 = arith.constant 0 : index
    %79 = vector.load %arg4[%c0_20, %c0_21] : memref<352x64xbf16, #tpu.memory_space<vmem>>, vector<256x64xbf16>
    %cst_22 = arith.constant dense<0.000000e+00> : vector<32x64xf32>
    %80 = tpu.matmul %78, %79, %cst_22 {dimension_numbers = #tpu.dot_dimension_numbers<[1], [0], [0], [1], [0, 0, 1, 1], [], []>} : vector<32x256xbf16>, vector<256x64xbf16>, vector<32x64xf32> -> vector<32x64xf32>
    %81 = vector.extract_strided_slice %68 {offsets = [0, 8, 0], sizes = [2, 16, 32], strides = [1, 1, 1]} : vector<2x26x32xbf16> to vector<2x16x32xbf16>
    %82 = vector.extract_strided_slice %68 {offsets = [0, 9, 0], sizes = [2, 16, 32], strides = [1, 1, 1]} : vector<2x26x32xbf16> to vector<2x16x32xbf16>
    %83 = vector.extract_strided_slice %68 {offsets = [0, 10, 0], sizes = [2, 16, 32], strides = [1, 1, 1]} : vector<2x26x32xbf16> to vector<2x16x32xbf16>
    %84 = tpu.concatenate %81, %82, %83 in 2 : vector<2x16x32xbf16>, vector<2x16x32xbf16>, vector<2x16x32xbf16> -> vector<2x16x96xbf16>
    %85 = vector.shape_cast %84 : vector<2x16x96xbf16> to vector<32x96xbf16>
    %c256 = arith.constant 256 : index
    %c0_23 = arith.constant 0 : index
    %86 = vector.load %arg4[%c256, %c0_23] : memref<352x64xbf16, #tpu.memory_space<vmem>>, vector<96x64xbf16>
    %cst_24 = arith.constant dense<0.000000e+00> : vector<32x64xf32>
    %87 = tpu.matmul %85, %86, %cst_24 {dimension_numbers = #tpu.dot_dimension_numbers<[1], [0], [0], [1], [0, 0, 1, 1], [], []>} : vector<32x96xbf16>, vector<96x64xbf16>, vector<32x64xf32> -> vector<32x64xf32>
    %88 = arith.addf %80, %87 : vector<32x64xf32>
    %89 = vector.broadcast %66 : vector<1x64xf32> to vector<32x64xf32>
    %90 = arith.addf %88, %89 : vector<32x64xf32>
    %cst_25 = arith.constant 0.000000e+00 : f32
    %91 = vector.broadcast %cst_25 : f32 to vector<32x64xf32>
    %92 = arith.maximumf %90, %91 : vector<32x64xf32>
    %93 = arith.truncf %92 : vector<32x64xf32> to vector<32x64xbf16>
    %94 = vector.shape_cast %93 : vector<32x64xbf16> to vector<2x16x64xbf16>
    %c4 = arith.constant 4 : index
    %c0_26 = arith.constant 0 : index
    %95 = vector.load %arg12[%c4, %c0_26] : memref<16x256xf32, #tpu.memory_space<vmem>>, vector<1x128xf32>
    %cst_27 = arith.constant 0.000000e+00 : bf16
    %96 = vector.broadcast %cst_27 : bf16 to vector<2x5x64xbf16>
    %97 = tpu.concatenate %96, %94, %96 in 1 : vector<2x5x64xbf16>, vector<2x16x64xbf16>, vector<2x5x64xbf16> -> vector<2x26x64xbf16>
    %98 = vector.extract_strided_slice %97 {offsets = [0, 0, 0], sizes = [2, 16, 64], strides = [1, 1, 1]} : vector<2x26x64xbf16> to vector<2x16x64xbf16>
    %99 = vector.extract_strided_slice %97 {offsets = [0, 1, 0], sizes = [2, 16, 64], strides = [1, 1, 1]} : vector<2x26x64xbf16> to vector<2x16x64xbf16>
    %100 = vector.extract_strided_slice %97 {offsets = [0, 2, 0], sizes = [2, 16, 64], strides = [1, 1, 1]} : vector<2x26x64xbf16> to vector<2x16x64xbf16>
    %101 = vector.extract_strided_slice %97 {offsets = [0, 3, 0], sizes = [2, 16, 64], strides = [1, 1, 1]} : vector<2x26x64xbf16> to vector<2x16x64xbf16>
    %102 = tpu.concatenate %98, %99, %100, %101 in 2 : vector<2x16x64xbf16>, vector<2x16x64xbf16>, vector<2x16x64xbf16>, vector<2x16x64xbf16> -> vector<2x16x256xbf16>
    %103 = vector.shape_cast %102 : vector<2x16x256xbf16> to vector<32x256xbf16>
    %c0_28 = arith.constant 0 : index
    %c0_29 = arith.constant 0 : index
    %104 = vector.load %arg5[%c0_28, %c0_29] : memref<704x128xbf16, #tpu.memory_space<vmem>>, vector<256x128xbf16>
    %cst_30 = arith.constant dense<0.000000e+00> : vector<32x128xf32>
    %105 = tpu.matmul %103, %104, %cst_30 {dimension_numbers = #tpu.dot_dimension_numbers<[1], [0], [0], [1], [0, 0, 1, 1], [], []>} : vector<32x256xbf16>, vector<256x128xbf16>, vector<32x128xf32> -> vector<32x128xf32>
    %106 = vector.extract_strided_slice %97 {offsets = [0, 4, 0], sizes = [2, 16, 64], strides = [1, 1, 1]} : vector<2x26x64xbf16> to vector<2x16x64xbf16>
    %107 = vector.extract_strided_slice %97 {offsets = [0, 5, 0], sizes = [2, 16, 64], strides = [1, 1, 1]} : vector<2x26x64xbf16> to vector<2x16x64xbf16>
    %108 = vector.extract_strided_slice %97 {offsets = [0, 6, 0], sizes = [2, 16, 64], strides = [1, 1, 1]} : vector<2x26x64xbf16> to vector<2x16x64xbf16>
    %109 = vector.extract_strided_slice %97 {offsets = [0, 7, 0], sizes = [2, 16, 64], strides = [1, 1, 1]} : vector<2x26x64xbf16> to vector<2x16x64xbf16>
    %110 = tpu.concatenate %106, %107, %108, %109 in 2 : vector<2x16x64xbf16>, vector<2x16x64xbf16>, vector<2x16x64xbf16>, vector<2x16x64xbf16> -> vector<2x16x256xbf16>
    %111 = vector.shape_cast %110 : vector<2x16x256xbf16> to vector<32x256xbf16>
    %c256_31 = arith.constant 256 : index
    %c0_32 = arith.constant 0 : index
    %112 = vector.load %arg5[%c256_31, %c0_32] : memref<704x128xbf16, #tpu.memory_space<vmem>>, vector<256x128xbf16>
    %cst_33 = arith.constant dense<0.000000e+00> : vector<32x128xf32>
    %113 = tpu.matmul %111, %112, %cst_33 {dimension_numbers = #tpu.dot_dimension_numbers<[1], [0], [0], [1], [0, 0, 1, 1], [], []>} : vector<32x256xbf16>, vector<256x128xbf16>, vector<32x128xf32> -> vector<32x128xf32>
    %114 = arith.addf %105, %113 : vector<32x128xf32>
    %115 = vector.extract_strided_slice %97 {offsets = [0, 8, 0], sizes = [2, 16, 64], strides = [1, 1, 1]} : vector<2x26x64xbf16> to vector<2x16x64xbf16>
    %116 = vector.extract_strided_slice %97 {offsets = [0, 9, 0], sizes = [2, 16, 64], strides = [1, 1, 1]} : vector<2x26x64xbf16> to vector<2x16x64xbf16>
    %117 = vector.extract_strided_slice %97 {offsets = [0, 10, 0], sizes = [2, 16, 64], strides = [1, 1, 1]} : vector<2x26x64xbf16> to vector<2x16x64xbf16>
    %118 = tpu.concatenate %115, %116, %117 in 2 : vector<2x16x64xbf16>, vector<2x16x64xbf16>, vector<2x16x64xbf16> -> vector<2x16x192xbf16>
    %119 = vector.shape_cast %118 : vector<2x16x192xbf16> to vector<32x192xbf16>
    %c512 = arith.constant 512 : index
    %c0_34 = arith.constant 0 : index
    %120 = vector.load %arg5[%c512, %c0_34] : memref<704x128xbf16, #tpu.memory_space<vmem>>, vector<192x128xbf16>
    %cst_35 = arith.constant dense<0.000000e+00> : vector<32x128xf32>
    %121 = tpu.matmul %119, %120, %cst_35 {dimension_numbers = #tpu.dot_dimension_numbers<[1], [0], [0], [1], [0, 0, 1, 1], [], []>} : vector<32x192xbf16>, vector<192x128xbf16>, vector<32x128xf32> -> vector<32x128xf32>
    %122 = arith.addf %114, %121 : vector<32x128xf32>
    %123 = vector.broadcast %95 : vector<1x128xf32> to vector<32x128xf32>
    %124 = arith.addf %122, %123 : vector<32x128xf32>
    %cst_36 = arith.constant 0.000000e+00 : f32
    %125 = vector.broadcast %cst_36 : f32 to vector<32x128xf32>
    %126 = arith.maximumf %124, %125 : vector<32x128xf32>
    %127 = arith.truncf %126 : vector<32x128xf32> to vector<32x128xbf16>
    %128 = vector.shape_cast %127 : vector<32x128xbf16> to vector<2x16x128xbf16>
    %c5 = arith.constant 5 : index
    %c0_37 = arith.constant 0 : index
    %129 = vector.load %arg12[%c5, %c0_37] : memref<16x256xf32, #tpu.memory_space<vmem>>, vector<1x256xf32>
    %cst_38 = arith.constant 0.000000e+00 : bf16
    %130 = vector.broadcast %cst_38 : bf16 to vector<2x5x128xbf16>
    %131 = tpu.concatenate %130, %128, %130 in 1 : vector<2x5x128xbf16>, vector<2x16x128xbf16>, vector<2x5x128xbf16> -> vector<2x26x128xbf16>
    %132 = vector.extract_strided_slice %131 {offsets = [0, 0, 0], sizes = [2, 16, 128], strides = [1, 1, 1]} : vector<2x26x128xbf16> to vector<2x16x128xbf16>
    %133 = vector.extract_strided_slice %131 {offsets = [0, 1, 0], sizes = [2, 16, 128], strides = [1, 1, 1]} : vector<2x26x128xbf16> to vector<2x16x128xbf16>
    %134 = tpu.concatenate %132, %133 in 2 : vector<2x16x128xbf16>, vector<2x16x128xbf16> -> vector<2x16x256xbf16>
    %135 = vector.shape_cast %134 : vector<2x16x256xbf16> to vector<32x256xbf16>
    %c0_39 = arith.constant 0 : index
    %c0_40 = arith.constant 0 : index
    %136 = vector.load %arg6[%c0_39, %c0_40] : memref<1408x256xbf16, #tpu.memory_space<vmem>>, vector<256x256xbf16>
    %cst_41 = arith.constant dense<0.000000e+00> : vector<32x256xf32>
    %137 = tpu.matmul %135, %136, %cst_41 {dimension_numbers = #tpu.dot_dimension_numbers<[1], [0], [0], [1], [0, 0, 1, 1], [], []>} : vector<32x256xbf16>, vector<256x256xbf16>, vector<32x256xf32> -> vector<32x256xf32>
    %138 = vector.extract_strided_slice %131 {offsets = [0, 2, 0], sizes = [2, 16, 128], strides = [1, 1, 1]} : vector<2x26x128xbf16> to vector<2x16x128xbf16>
    %139 = vector.extract_strided_slice %131 {offsets = [0, 3, 0], sizes = [2, 16, 128], strides = [1, 1, 1]} : vector<2x26x128xbf16> to vector<2x16x128xbf16>
    %140 = tpu.concatenate %138, %139 in 2 : vector<2x16x128xbf16>, vector<2x16x128xbf16> -> vector<2x16x256xbf16>
    %141 = vector.shape_cast %140 : vector<2x16x256xbf16> to vector<32x256xbf16>
    %c256_42 = arith.constant 256 : index
    %c0_43 = arith.constant 0 : index
    %142 = vector.load %arg6[%c256_42, %c0_43] : memref<1408x256xbf16, #tpu.memory_space<vmem>>, vector<256x256xbf16>
    %cst_44 = arith.constant dense<0.000000e+00> : vector<32x256xf32>
    %143 = tpu.matmul %141, %142, %cst_44 {dimension_numbers = #tpu.dot_dimension_numbers<[1], [0], [0], [1], [0, 0, 1, 1], [], []>} : vector<32x256xbf16>, vector<256x256xbf16>, vector<32x256xf32> -> vector<32x256xf32>
    %144 = arith.addf %137, %143 : vector<32x256xf32>
    %145 = vector.extract_strided_slice %131 {offsets = [0, 4, 0], sizes = [2, 16, 128], strides = [1, 1, 1]} : vector<2x26x128xbf16> to vector<2x16x128xbf16>
    %146 = vector.extract_strided_slice %131 {offsets = [0, 5, 0], sizes = [2, 16, 128], strides = [1, 1, 1]} : vector<2x26x128xbf16> to vector<2x16x128xbf16>
    %147 = tpu.concatenate %145, %146 in 2 : vector<2x16x128xbf16>, vector<2x16x128xbf16> -> vector<2x16x256xbf16>
    %148 = vector.shape_cast %147 : vector<2x16x256xbf16> to vector<32x256xbf16>
    %c512_45 = arith.constant 512 : index
    %c0_46 = arith.constant 0 : index
    %149 = vector.load %arg6[%c512_45, %c0_46] : memref<1408x256xbf16, #tpu.memory_space<vmem>>, vector<256x256xbf16>
    %cst_47 = arith.constant dense<0.000000e+00> : vector<32x256xf32>
    %150 = tpu.matmul %148, %149, %cst_47 {dimension_numbers = #tpu.dot_dimension_numbers<[1], [0], [0], [1], [0, 0, 1, 1], [], []>} : vector<32x256xbf16>, vector<256x256xbf16>, vector<32x256xf32> -> vector<32x256xf32>
    %151 = arith.addf %144, %150 : vector<32x256xf32>
    %152 = vector.extract_strided_slice %131 {offsets = [0, 6, 0], sizes = [2, 16, 128], strides = [1, 1, 1]} : vector<2x26x128xbf16> to vector<2x16x128xbf16>
    %153 = vector.extract_strided_slice %131 {offsets = [0, 7, 0], sizes = [2, 16, 128], strides = [1, 1, 1]} : vector<2x26x128xbf16> to vector<2x16x128xbf16>
    %154 = tpu.concatenate %152, %153 in 2 : vector<2x16x128xbf16>, vector<2x16x128xbf16> -> vector<2x16x256xbf16>
    %155 = vector.shape_cast %154 : vector<2x16x256xbf16> to vector<32x256xbf16>
    %c768 = arith.constant 768 : index
    %c0_48 = arith.constant 0 : index
    %156 = vector.load %arg6[%c768, %c0_48] : memref<1408x256xbf16, #tpu.memory_space<vmem>>, vector<256x256xbf16>
    %cst_49 = arith.constant dense<0.000000e+00> : vector<32x256xf32>
    %157 = tpu.matmul %155, %156, %cst_49 {dimension_numbers = #tpu.dot_dimension_numbers<[1], [0], [0], [1], [0, 0, 1, 1], [], []>} : vector<32x256xbf16>, vector<256x256xbf16>, vector<32x256xf32> -> vector<32x256xf32>
    %158 = arith.addf %151, %157 : vector<32x256xf32>
    %159 = vector.extract_strided_slice %131 {offsets = [0, 8, 0], sizes = [2, 16, 128], strides = [1, 1, 1]} : vector<2x26x128xbf16> to vector<2x16x128xbf16>
    %160 = vector.extract_strided_slice %131 {offsets = [0, 9, 0], sizes = [2, 16, 128], strides = [1, 1, 1]} : vector<2x26x128xbf16> to vector<2x16x128xbf16>
    %161 = tpu.concatenate %159, %160 in 2 : vector<2x16x128xbf16>, vector<2x16x128xbf16> -> vector<2x16x256xbf16>
    %162 = vector.shape_cast %161 : vector<2x16x256xbf16> to vector<32x256xbf16>
    %c1024 = arith.constant 1024 : index
    %c0_50 = arith.constant 0 : index
    %163 = vector.load %arg6[%c1024, %c0_50] : memref<1408x256xbf16, #tpu.memory_space<vmem>>, vector<256x256xbf16>
    %cst_51 = arith.constant dense<0.000000e+00> : vector<32x256xf32>
    %164 = tpu.matmul %162, %163, %cst_51 {dimension_numbers = #tpu.dot_dimension_numbers<[1], [0], [0], [1], [0, 0, 1, 1], [], []>} : vector<32x256xbf16>, vector<256x256xbf16>, vector<32x256xf32> -> vector<32x256xf32>
    %165 = arith.addf %158, %164 : vector<32x256xf32>
    %166 = vector.extract_strided_slice %131 {offsets = [0, 10, 0], sizes = [2, 16, 128], strides = [1, 1, 1]} : vector<2x26x128xbf16> to vector<2x16x128xbf16>
    %167 = vector.shape_cast %166 : vector<2x16x128xbf16> to vector<32x128xbf16>
    %c1280 = arith.constant 1280 : index
    %c0_52 = arith.constant 0 : index
    %168 = vector.load %arg6[%c1280, %c0_52] : memref<1408x256xbf16, #tpu.memory_space<vmem>>, vector<128x256xbf16>
    %cst_53 = arith.constant dense<0.000000e+00> : vector<32x256xf32>
    %169 = tpu.matmul %167, %168, %cst_53 {dimension_numbers = #tpu.dot_dimension_numbers<[1], [0], [0], [1], [0, 0, 1, 1], [], []>} : vector<32x128xbf16>, vector<128x256xbf16>, vector<32x256xf32> -> vector<32x256xf32>
    %170 = arith.addf %165, %169 : vector<32x256xf32>
    %171 = vector.broadcast %129 : vector<1x256xf32> to vector<32x256xf32>
    %172 = arith.addf %170, %171 : vector<32x256xf32>
    %cst_54 = arith.constant 0.000000e+00 : f32
    %173 = vector.broadcast %cst_54 : f32 to vector<32x256xf32>
    %174 = arith.maximumf %172, %173 : vector<32x256xf32>
    %175 = arith.truncf %174 : vector<32x256xf32> to vector<32x256xbf16>
    %176 = vector.shape_cast %175 : vector<32x256xbf16> to vector<2x16x256xbf16>
    %cst_55 = arith.constant dense<0xFF80> : vector<2x256xbf16>
    %177 = vector.multi_reduction <maximumf>, %176, %cst_55 [1] : vector<2x16x256xbf16> to vector<2x256xbf16>
    %c0_56 = arith.constant 0 : index
    %c0_57 = arith.constant 0 : index
    %c0_58 = arith.constant 0 : index
    %178 = vector.load %arg2[%c0_56, %c0_57, %c0_58] : memref<2x32x50xf32, #tpu.memory_space<vmem>>, vector<2x32x50xf32>
    %c6 = arith.constant 6 : index
    %c0_59 = arith.constant 0 : index
    %179 = vector.load %arg12[%c6, %c0_59] : memref<16x256xf32, #tpu.memory_space<vmem>>, vector<1x96xf32>
    %180 = arith.truncf %178 : vector<2x32x50xf32> to vector<2x32x50xbf16>
    %cst_60 = arith.constant 0.000000e+00 : bf16
    %181 = vector.broadcast %cst_60 : bf16 to vector<2x2x50xbf16>
    %182 = tpu.concatenate %181, %180, %181 in 1 : vector<2x2x50xbf16>, vector<2x32x50xbf16>, vector<2x2x50xbf16> -> vector<2x36x50xbf16>
    %183 = vector.extract_strided_slice %182 {offsets = [0, 0, 0], sizes = [2, 32, 50], strides = [1, 1, 1]} : vector<2x36x50xbf16> to vector<2x32x50xbf16>
    %184 = vector.extract_strided_slice %182 {offsets = [0, 1, 0], sizes = [2, 32, 50], strides = [1, 1, 1]} : vector<2x36x50xbf16> to vector<2x32x50xbf16>
    %185 = vector.extract_strided_slice %182 {offsets = [0, 2, 0], sizes = [2, 32, 50], strides = [1, 1, 1]} : vector<2x36x50xbf16> to vector<2x32x50xbf16>
    %186 = vector.extract_strided_slice %182 {offsets = [0, 3, 0], sizes = [2, 32, 50], strides = [1, 1, 1]} : vector<2x36x50xbf16> to vector<2x32x50xbf16>
    %187 = vector.extract_strided_slice %182 {offsets = [0, 4, 0], sizes = [2, 32, 50], strides = [1, 1, 1]} : vector<2x36x50xbf16> to vector<2x32x50xbf16>
    %188 = tpu.concatenate %183, %184, %185, %186, %187 in 2 : vector<2x32x50xbf16>, vector<2x32x50xbf16>, vector<2x32x50xbf16>, vector<2x32x50xbf16>, vector<2x32x50xbf16> -> vector<2x32x250xbf16>
    %189 = vector.shape_cast %188 : vector<2x32x250xbf16> to vector<64x250xbf16>
    %c0_61 = arith.constant 0 : index
    %c0_62 = arith.constant 0 : index
    %190 = vector.load %arg7[%c0_61, %c0_62] : memref<250x96xbf16, #tpu.memory_space<vmem>>, vector<250x96xbf16>
    %cst_63 = arith.constant dense<0.000000e+00> : vector<64x96xf32>
    %191 = tpu.matmul %189, %190, %cst_63 {dimension_numbers = #tpu.dot_dimension_numbers<[1], [0], [0], [1], [0, 0, 1, 1], [], []>} : vector<64x250xbf16>, vector<250x96xbf16>, vector<64x96xf32> -> vector<64x96xf32>
    %192 = vector.broadcast %179 : vector<1x96xf32> to vector<64x96xf32>
    %193 = arith.addf %191, %192 : vector<64x96xf32>
    %cst_64 = arith.constant 0.000000e+00 : f32
    %194 = vector.broadcast %cst_64 : f32 to vector<64x96xf32>
    %195 = arith.maximumf %193, %194 : vector<64x96xf32>
    %196 = arith.truncf %195 : vector<64x96xf32> to vector<64x96xbf16>
    %197 = vector.shape_cast %196 : vector<64x96xbf16> to vector<2x32x96xbf16>
    %c7 = arith.constant 7 : index
    %c0_65 = arith.constant 0 : index
    %198 = vector.load %arg12[%c7, %c0_65] : memref<16x256xf32, #tpu.memory_space<vmem>>, vector<1x128xf32>
    %cst_66 = arith.constant 0.000000e+00 : bf16
    %199 = vector.broadcast %cst_66 : bf16 to vector<2x3x96xbf16>
    %200 = tpu.concatenate %199, %197, %199 in 1 : vector<2x3x96xbf16>, vector<2x32x96xbf16>, vector<2x3x96xbf16> -> vector<2x38x96xbf16>
    %201 = vector.extract_strided_slice %200 {offsets = [0, 0, 0], sizes = [2, 32, 96], strides = [1, 1, 1]} : vector<2x38x96xbf16> to vector<2x32x96xbf16>
    %202 = vector.extract_strided_slice %200 {offsets = [0, 1, 0], sizes = [2, 32, 96], strides = [1, 1, 1]} : vector<2x38x96xbf16> to vector<2x32x96xbf16>
    %203 = tpu.concatenate %201, %202 in 2 : vector<2x32x96xbf16>, vector<2x32x96xbf16> -> vector<2x32x192xbf16>
    %204 = vector.shape_cast %203 : vector<2x32x192xbf16> to vector<64x192xbf16>
    %c0_67 = arith.constant 0 : index
    %c0_68 = arith.constant 0 : index
    %205 = vector.load %arg8[%c0_67, %c0_68] : memref<672x128xbf16, #tpu.memory_space<vmem>>, vector<192x128xbf16>
    %cst_69 = arith.constant dense<0.000000e+00> : vector<64x128xf32>
    %206 = tpu.matmul %204, %205, %cst_69 {dimension_numbers = #tpu.dot_dimension_numbers<[1], [0], [0], [1], [0, 0, 1, 1], [], []>} : vector<64x192xbf16>, vector<192x128xbf16>, vector<64x128xf32> -> vector<64x128xf32>
    %207 = vector.extract_strided_slice %200 {offsets = [0, 2, 0], sizes = [2, 32, 96], strides = [1, 1, 1]} : vector<2x38x96xbf16> to vector<2x32x96xbf16>
    %208 = vector.extract_strided_slice %200 {offsets = [0, 3, 0], sizes = [2, 32, 96], strides = [1, 1, 1]} : vector<2x38x96xbf16> to vector<2x32x96xbf16>
    %209 = tpu.concatenate %207, %208 in 2 : vector<2x32x96xbf16>, vector<2x32x96xbf16> -> vector<2x32x192xbf16>
    %210 = vector.shape_cast %209 : vector<2x32x192xbf16> to vector<64x192xbf16>
    %c192 = arith.constant 192 : index
    %c0_70 = arith.constant 0 : index
    %211 = vector.load %arg8[%c192, %c0_70] : memref<672x128xbf16, #tpu.memory_space<vmem>>, vector<192x128xbf16>
    %cst_71 = arith.constant dense<0.000000e+00> : vector<64x128xf32>
    %212 = tpu.matmul %210, %211, %cst_71 {dimension_numbers = #tpu.dot_dimension_numbers<[1], [0], [0], [1], [0, 0, 1, 1], [], []>} : vector<64x192xbf16>, vector<192x128xbf16>, vector<64x128xf32> -> vector<64x128xf32>
    %213 = arith.addf %206, %212 : vector<64x128xf32>
    %214 = vector.extract_strided_slice %200 {offsets = [0, 4, 0], sizes = [2, 32, 96], strides = [1, 1, 1]} : vector<2x38x96xbf16> to vector<2x32x96xbf16>
    %215 = vector.extract_strided_slice %200 {offsets = [0, 5, 0], sizes = [2, 32, 96], strides = [1, 1, 1]} : vector<2x38x96xbf16> to vector<2x32x96xbf16>
    %216 = tpu.concatenate %214, %215 in 2 : vector<2x32x96xbf16>, vector<2x32x96xbf16> -> vector<2x32x192xbf16>
    %217 = vector.shape_cast %216 : vector<2x32x192xbf16> to vector<64x192xbf16>
    %c384 = arith.constant 384 : index
    %c0_72 = arith.constant 0 : index
    %218 = vector.load %arg8[%c384, %c0_72] : memref<672x128xbf16, #tpu.memory_space<vmem>>, vector<192x128xbf16>
    %cst_73 = arith.constant dense<0.000000e+00> : vector<64x128xf32>
    %219 = tpu.matmul %217, %218, %cst_73 {dimension_numbers = #tpu.dot_dimension_numbers<[1], [0], [0], [1], [0, 0, 1, 1], [], []>} : vector<64x192xbf16>, vector<192x128xbf16>, vector<64x128xf32> -> vector<64x128xf32>
    %220 = arith.addf %213, %219 : vector<64x128xf32>
    %221 = vector.extract_strided_slice %200 {offsets = [0, 6, 0], sizes = [2, 32, 96], strides = [1, 1, 1]} : vector<2x38x96xbf16> to vector<2x32x96xbf16>
    %222 = vector.shape_cast %221 : vector<2x32x96xbf16> to vector<64x96xbf16>
    %c576 = arith.constant 576 : index
    %c0_74 = arith.constant 0 : index
    %223 = vector.load %arg8[%c576, %c0_74] : memref<672x128xbf16, #tpu.memory_space<vmem>>, vector<96x128xbf16>
    %cst_75 = arith.constant dense<0.000000e+00> : vector<64x128xf32>
    %224 = tpu.matmul %222, %223, %cst_75 {dimension_numbers = #tpu.dot_dimension_numbers<[1], [0], [0], [1], [0, 0, 1, 1], [], []>} : vector<64x96xbf16>, vector<96x128xbf16>, vector<64x128xf32> -> vector<64x128xf32>
    %225 = arith.addf %220, %224 : vector<64x128xf32>
    %226 = vector.broadcast %198 : vector<1x128xf32> to vector<64x128xf32>
    %227 = arith.addf %225, %226 : vector<64x128xf32>
    %cst_76 = arith.constant 0.000000e+00 : f32
    %228 = vector.broadcast %cst_76 : f32 to vector<64x128xf32>
    %229 = arith.maximumf %227, %228 : vector<64x128xf32>
    %230 = arith.truncf %229 : vector<64x128xf32> to vector<64x128xbf16>
    %231 = vector.shape_cast %230 : vector<64x128xbf16> to vector<2x32x128xbf16>
    %c8 = arith.constant 8 : index
    %c0_77 = arith.constant 0 : index
    %232 = vector.load %arg12[%c8, %c0_77] : memref<16x256xf32, #tpu.memory_space<vmem>>, vector<1x256xf32>
    %cst_78 = arith.constant 0.000000e+00 : bf16
    %233 = vector.broadcast %cst_78 : bf16 to vector<2x4x128xbf16>
    %234 = tpu.concatenate %233, %231, %233 in 1 : vector<2x4x128xbf16>, vector<2x32x128xbf16>, vector<2x4x128xbf16> -> vector<2x40x128xbf16>
    %235 = vector.extract_strided_slice %234 {offsets = [0, 0, 0], sizes = [2, 32, 128], strides = [1, 1, 1]} : vector<2x40x128xbf16> to vector<2x32x128xbf16>
    %236 = vector.extract_strided_slice %234 {offsets = [0, 1, 0], sizes = [2, 32, 128], strides = [1, 1, 1]} : vector<2x40x128xbf16> to vector<2x32x128xbf16>
    %237 = tpu.concatenate %235, %236 in 2 : vector<2x32x128xbf16>, vector<2x32x128xbf16> -> vector<2x32x256xbf16>
    %238 = vector.shape_cast %237 : vector<2x32x256xbf16> to vector<64x256xbf16>
    %c0_79 = arith.constant 0 : index
    %c0_80 = arith.constant 0 : index
    %239 = vector.load %arg9[%c0_79, %c0_80] : memref<1152x256xbf16, #tpu.memory_space<vmem>>, vector<256x256xbf16>
    %cst_81 = arith.constant dense<0.000000e+00> : vector<64x256xf32>
    %240 = tpu.matmul %238, %239, %cst_81 {dimension_numbers = #tpu.dot_dimension_numbers<[1], [0], [0], [1], [0, 0, 1, 1], [], []>} : vector<64x256xbf16>, vector<256x256xbf16>, vector<64x256xf32> -> vector<64x256xf32>
    %241 = vector.extract_strided_slice %234 {offsets = [0, 2, 0], sizes = [2, 32, 128], strides = [1, 1, 1]} : vector<2x40x128xbf16> to vector<2x32x128xbf16>
    %242 = vector.extract_strided_slice %234 {offsets = [0, 3, 0], sizes = [2, 32, 128], strides = [1, 1, 1]} : vector<2x40x128xbf16> to vector<2x32x128xbf16>
    %243 = tpu.concatenate %241, %242 in 2 : vector<2x32x128xbf16>, vector<2x32x128xbf16> -> vector<2x32x256xbf16>
    %244 = vector.shape_cast %243 : vector<2x32x256xbf16> to vector<64x256xbf16>
    %c256_82 = arith.constant 256 : index
    %c0_83 = arith.constant 0 : index
    %245 = vector.load %arg9[%c256_82, %c0_83] : memref<1152x256xbf16, #tpu.memory_space<vmem>>, vector<256x256xbf16>
    %cst_84 = arith.constant dense<0.000000e+00> : vector<64x256xf32>
    %246 = tpu.matmul %244, %245, %cst_84 {dimension_numbers = #tpu.dot_dimension_numbers<[1], [0], [0], [1], [0, 0, 1, 1], [], []>} : vector<64x256xbf16>, vector<256x256xbf16>, vector<64x256xf32> -> vector<64x256xf32>
    %247 = arith.addf %240, %246 : vector<64x256xf32>
    %248 = vector.extract_strided_slice %234 {offsets = [0, 4, 0], sizes = [2, 32, 128], strides = [1, 1, 1]} : vector<2x40x128xbf16> to vector<2x32x128xbf16>
    %249 = vector.extract_strided_slice %234 {offsets = [0, 5, 0], sizes = [2, 32, 128], strides = [1, 1, 1]} : vector<2x40x128xbf16> to vector<2x32x128xbf16>
    %250 = tpu.concatenate %248, %249 in 2 : vector<2x32x128xbf16>, vector<2x32x128xbf16> -> vector<2x32x256xbf16>
    %251 = vector.shape_cast %250 : vector<2x32x256xbf16> to vector<64x256xbf16>
    %c512_85 = arith.constant 512 : index
    %c0_86 = arith.constant 0 : index
    %252 = vector.load %arg9[%c512_85, %c0_86] : memref<1152x256xbf16, #tpu.memory_space<vmem>>, vector<256x256xbf16>
    %cst_87 = arith.constant dense<0.000000e+00> : vector<64x256xf32>
    %253 = tpu.matmul %251, %252, %cst_87 {dimension_numbers = #tpu.dot_dimension_numbers<[1], [0], [0], [1], [0, 0, 1, 1], [], []>} : vector<64x256xbf16>, vector<256x256xbf16>, vector<64x256xf32> -> vector<64x256xf32>
    %254 = arith.addf %247, %253 : vector<64x256xf32>
    %255 = vector.extract_strided_slice %234 {offsets = [0, 6, 0], sizes = [2, 32, 128], strides = [1, 1, 1]} : vector<2x40x128xbf16> to vector<2x32x128xbf16>
    %256 = vector.extract_strided_slice %234 {offsets = [0, 7, 0], sizes = [2, 32, 128], strides = [1, 1, 1]} : vector<2x40x128xbf16> to vector<2x32x128xbf16>
    %257 = tpu.concatenate %255, %256 in 2 : vector<2x32x128xbf16>, vector<2x32x128xbf16> -> vector<2x32x256xbf16>
    %258 = vector.shape_cast %257 : vector<2x32x256xbf16> to vector<64x256xbf16>
    %c768_88 = arith.constant 768 : index
    %c0_89 = arith.constant 0 : index
    %259 = vector.load %arg9[%c768_88, %c0_89] : memref<1152x256xbf16, #tpu.memory_space<vmem>>, vector<256x256xbf16>
    %cst_90 = arith.constant dense<0.000000e+00> : vector<64x256xf32>
    %260 = tpu.matmul %258, %259, %cst_90 {dimension_numbers = #tpu.dot_dimension_numbers<[1], [0], [0], [1], [0, 0, 1, 1], [], []>} : vector<64x256xbf16>, vector<256x256xbf16>, vector<64x256xf32> -> vector<64x256xf32>
    %261 = arith.addf %254, %260 : vector<64x256xf32>
    %262 = vector.extract_strided_slice %234 {offsets = [0, 8, 0], sizes = [2, 32, 128], strides = [1, 1, 1]} : vector<2x40x128xbf16> to vector<2x32x128xbf16>
    %263 = vector.shape_cast %262 : vector<2x32x128xbf16> to vector<64x128xbf16>
    %c1024_91 = arith.constant 1024 : index
    %c0_92 = arith.constant 0 : index
    %264 = vector.load %arg9[%c1024_91, %c0_92] : memref<1152x256xbf16, #tpu.memory_space<vmem>>, vector<128x256xbf16>
    %cst_93 = arith.constant dense<0.000000e+00> : vector<64x256xf32>
    %265 = tpu.matmul %263, %264, %cst_93 {dimension_numbers = #tpu.dot_dimension_numbers<[1], [0], [0], [1], [0, 0, 1, 1], [], []>} : vector<64x128xbf16>, vector<128x256xbf16>, vector<64x256xf32> -> vector<64x256xf32>
    %266 = arith.addf %261, %265 : vector<64x256xf32>
    %267 = vector.broadcast %232 : vector<1x256xf32> to vector<64x256xf32>
    %268 = arith.addf %266, %267 : vector<64x256xf32>
    %cst_94 = arith.constant 0.000000e+00 : f32
    %269 = vector.broadcast %cst_94 : f32 to vector<64x256xf32>
    %270 = arith.maximumf %268, %269 : vector<64x256xf32>
    %271 = arith.truncf %270 : vector<64x256xf32> to vector<64x256xbf16>
    %272 = vector.shape_cast %271 : vector<64x256xbf16> to vector<2x32x256xbf16>
    %cst_95 = arith.constant dense<0xFF80> : vector<2x256xbf16>
    %273 = vector.multi_reduction <maximumf>, %272, %cst_95 [1] : vector<2x32x256xbf16> to vector<2x256xbf16>
    %274 = tpu.concatenate %177, %273 in 1 : vector<2x256xbf16>, vector<2x256xbf16> -> vector<2x512xbf16>
    %c0_96 = arith.constant 0 : index
    %c0_97 = arith.constant 0 : index
    %275 = vector.load %arg10[%c0_96, %c0_97] : memref<512x256xbf16, #tpu.memory_space<vmem>>, vector<512x256xbf16>
    %cst_98 = arith.constant dense<0.000000e+00> : vector<2x256xf32>
    %276 = tpu.matmul %274, %275, %cst_98 {dimension_numbers = #tpu.dot_dimension_numbers<[1], [0], [0], [1], [0, 0, 1, 1], [], []>} : vector<2x512xbf16>, vector<512x256xbf16>, vector<2x256xf32> -> vector<2x256xf32>
    %c9 = arith.constant 9 : index
    %c0_99 = arith.constant 0 : index
    %277 = vector.load %arg12[%c9, %c0_99] : memref<16x256xf32, #tpu.memory_space<vmem>>, vector<1x256xf32>
    %278 = vector.broadcast %277 : vector<1x256xf32> to vector<2x256xf32>
    %279 = arith.addf %276, %278 : vector<2x256xf32>
    %cst_100 = arith.constant 0.000000e+00 : f32
    %280 = vector.broadcast %cst_100 : f32 to vector<2x256xf32>
    %281 = arith.maximumf %279, %280 : vector<2x256xf32>
    %282 = arith.truncf %281 : vector<2x256xf32> to vector<2x256xbf16>
    %c0_101 = arith.constant 0 : index
    %c0_102 = arith.constant 0 : index
    %283 = vector.load %arg11[%c0_101, %c0_102] : memref<256x128xbf16, #tpu.memory_space<vmem>>, vector<256x128xbf16>
    %cst_103 = arith.constant dense<0.000000e+00> : vector<2x128xf32>
    %284 = tpu.matmul %282, %283, %cst_103 {dimension_numbers = #tpu.dot_dimension_numbers<[1], [0], [0], [1], [0, 0, 1, 1], [], []>} : vector<2x256xbf16>, vector<256x128xbf16>, vector<2x128xf32> -> vector<2x128xf32>
    %c10 = arith.constant 10 : index
    %c0_104 = arith.constant 0 : index
    %285 = vector.load %arg12[%c10, %c0_104] : memref<16x256xf32, #tpu.memory_space<vmem>>, vector<1x128xf32>
    %286 = vector.broadcast %285 : vector<1x128xf32> to vector<2x128xf32>
    %287 = arith.addf %284, %286 : vector<2x128xf32>
    %cst_105 = arith.constant 0.000000e+00 : f32
    %288 = vector.broadcast %cst_105 : f32 to vector<2x128xf32>
    %289 = arith.maximumf %287, %288 : vector<2x128xf32>
    %c14 = arith.constant 14 : index
    %c0_106 = arith.constant 0 : index
    %290 = vector.load %arg12[%c14, %c0_106] : memref<16x256xf32, #tpu.memory_space<vmem>>, vector<1x128xf32>
    %291 = vector.broadcast %290 : vector<1x128xf32> to vector<2x128xf32>
    %292 = arith.mulf %289, %291 : vector<2x128xf32>
    %cst_107 = arith.constant dense<0.000000e+00> : vector<2xf32>
    %293 = vector.multi_reduction <add>, %292, %cst_107 [1] : vector<2x128xf32> to vector<2xf32>
    %294 = vector.shape_cast %293 : vector<2xf32> to vector<2x1xf32>
    %c11 = arith.constant 11 : index
    %c0_108 = arith.constant 0 : index
    %295 = vector.load %arg12[%c11, %c0_108] : memref<16x256xf32, #tpu.memory_space<vmem>>, vector<1x1xf32>
    %296 = vector.broadcast %295 : vector<1x1xf32> to vector<2x1xf32>
    %297 = arith.addf %294, %296 : vector<2x1xf32>
    %cst_109 = arith.constant 0.000000e+00 : f32
    %298 = vector.broadcast %cst_109 : f32 to vector<2x1xf32>
    %299 = arith.subf %298, %297 : vector<2x1xf32>
    %300 = math.exp %299 : vector<2x1xf32>
    %cst_110 = arith.constant 1.000000e+00 : f32
    %301 = vector.broadcast %cst_110 : f32 to vector<2x1xf32>
    %302 = arith.addf %301, %300 : vector<2x1xf32>
    %303 = tpu.reciprocal %302 {approx = true} : vector<2x1xf32> -> vector<2x1xf32>
    %c0_111 = arith.constant 0 : index
    %c0_112 = arith.constant 0 : index
    %304 = vector.load %arg13[%c0_111, %c0_112] : memref<2x1xf32, #tpu.memory_space<vmem>>, vector<2x1xf32>
    tpu.vector_store %arg13[%c0_111, %c0_112], %303 {strides = array<i32>} : memref<2x1xf32, #tpu.memory_space<vmem>>, vector<2x1xf32>,
    return
  }
  func.func @transform_0(%arg0: i32) -> (i32, i32, i32) {
    %c0_i32 = arith.constant 0 : i32
    %c0_i32_0 = arith.constant 0 : i32
    %c0_i32_1 = arith.constant 0 : i32
    return %arg0, %c0_i32, %c0_i32_0 : i32, i32, i32
  }
  func.func @transform_1(%arg0: i32) -> (i32, i32, i32) {
    %c0_i32 = arith.constant 0 : i32
    %c0_i32_0 = arith.constant 0 : i32
    %c0_i32_1 = arith.constant 0 : i32
    return %arg0, %c0_i32, %c0_i32_0 : i32, i32, i32
  }
  func.func @transform_2(%arg0: i32) -> (i32, i32) {
    %c0_i32 = arith.constant 0 : i32
    %c0_i32_0 = arith.constant 0 : i32
    %c0_i32_1 = arith.constant 0 : i32
    return %c0_i32, %c0_i32_0 : i32, i32
  }
  func.func @transform_3(%arg0: i32) -> (i32, i32) {
    %c0_i32 = arith.constant 0 : i32
    %c0_i32_0 = arith.constant 0 : i32
    %c0_i32_1 = arith.constant 0 : i32
    return %c0_i32, %c0_i32_0 : i32, i32
  }
  func.func @transform_4(%arg0: i32) -> (i32, i32) {
    %c0_i32 = arith.constant 0 : i32
    %c0_i32_0 = arith.constant 0 : i32
    %c0_i32_1 = arith.constant 0 : i32
    return %c0_i32, %c0_i32_0 : i32, i32
  }
  func.func @transform_5(%arg0: i32) -> (i32, i32) {
    %c0_i32 = arith.constant 0 : i32
    %c0_i32_0 = arith.constant 0 : i32
    %c0_i32_1 = arith.constant 0 : i32
    return %c0_i32, %c0_i32_0 : i32, i32
  }
  func.func @transform_6(%arg0: i32) -> (i32, i32) {
    %c0_i32 = arith.constant 0 : i32
    %c0_i32_0 = arith.constant 0 : i32
    %c0_i32_1 = arith.constant 0 : i32
    return %c0_i32, %c0_i32_0 : i32, i32
  }
  func.func @transform_7(%arg0: i32) -> (i32, i32) {
    %c0_i32 = arith.constant 0 : i32
    %c0_i32_0 = arith.constant 0 : i32
    %c0_i32_1 = arith.constant 0 : i32
    return %c0_i32, %c0_i32_0 : i32, i32
  }
  func.func @transform_8(%arg0: i32) -> (i32, i32) {
    %c0_i32 = arith.constant 0 : i32
    %c0_i32_0 = arith.constant 0 : i32
    %c0_i32_1 = arith.constant 0 : i32
    return %c0_i32, %c0_i32_0 : i32, i32
  }
  func.func @transform_9(%arg0: i32) -> (i32, i32) {
    %c0_i32 = arith.constant 0 : i32
    %c0_i32_0 = arith.constant 0 : i32
    %c0_i32_1 = arith.constant 0 : i32
    return %c0_i32, %c0_i32_0 : i32, i32
  }
  func.func @transform_10(%arg0: i32) -> (i32, i32) {
    %c0_i32 = arith.constant 0 : i32
    %c0_i32_0 = arith.constant 0 : i32
    %c0_i32_1 = arith.constant 0 : i32
    return %c0_i32, %c0_i32_0 : i32, i32
  }
  func.func @transform_11(%arg0: i32) -> (i32, i32) {
    %c0_i32 = arith.constant 0 : i32
    %c0_i32_0 = arith.constant 0 : i32
    %c0_i32_1 = arith.constant 0 : i32
    return %c0_i32, %c0_i32_0 : i32, i32
  }
  func.func @transform_12(%arg0: i32) -> (i32, i32) {
    %c0_i32 = arith.constant 0 : i32
    %c0_i32_0 = arith.constant 0 : i32
    return %arg0, %c0_i32 : i32, i32
  }
}

</mosaic_0001>

<bundles_post_ra>
// kernel: cpi_forward.1
= control target key start
LH: loop header
LB: loop body
LE: loop exit
PB: predicated region body
PF: predicated region fallthrough
CT: control target
= control target key end

     0   :  { %vm11613_vm0 = vcmask 1041408   ;;  %vm120_vm1 = vcmask 1044480   ;;  %vm11618_vm2 = vcmask 1045504   ;;  %s8491_s29 = smov 100   ;;  %vm74_vm3 = vcmask 1046528   ;;  %s8492_s30 = smov 50   ;;  %s11598_s0 = inlined_call_operand.vmem [shape: f32[2,16,50], index: 0, kind: input, shape index: {}]   ;;  %s11599_s11 = inlined_call_operand.vmem [shape: f32[16,256], index: 11, kind: input, shape index: {}]   ;;  %s11600_s2 = inlined_call_operand.vmem [shape: bf16[9,32], index: 2, kind: input, shape index: {}]   ;;  %s11601_s3 = inlined_call_operand.vmem [shape: bf16[352,64], index: 3, kind: input, shape index: {}]   ;;  %s11602_s4 = inlined_call_operand.vmem [shape: bf16[704,128], index: 4, kind: input, shape index: {}]   ;;  %s11603_s5 = inlined_call_operand.vmem [shape: bf16[1408,256], index: 5, kind: input, shape index: {}]   ;;  %s11604_s1 = inlined_call_operand.vmem [shape: f32[2,32,50], index: 1, kind: input, shape index: {}]   ;;  %s11605_s6 = inlined_call_operand.vmem [shape: bf16[250,96], index: 6, kind: input, shape index: {}]   ;;  %s11606_s7 = inlined_call_operand.vmem [shape: bf16[672,128], index: 7, kind: input, shape index: {}]   ;;  %s11607_s8 = inlined_call_operand.vmem [shape: bf16[1152,256], index: 8, kind: input, shape index: {}]   ;;  %s11608_s9 = inlined_call_operand.vmem [shape: bf16[512,256], index: 9, kind: input, shape index: {}]   ;;  %s11609_s10 = inlined_call_operand.vmem [shape: bf16[256,128], index: 10, kind: input, shape index: {}]   ;;  %s11610_s12 = inlined_call_operand.vmem [shape: f32[2,1], index: 12, kind: output, shape index: {}]  }
   0x1   :  { %v42_v0 = vld [vmem:[%s11598_s0] sm:$0xff]  ;;  %v43_v1 = vld [vmem:[%s11598_s0 + $0x8] sm:$0xff]  ;;  %v44_v4 = vld [vmem:[%s11598_s0 + $0x10] sm:$0xff]  ;;  %vm11617_vm4 = vcmask 1043456   ;;  %s8493_s13 = smov 72   ;;  %v187_v58 = vlaneseq  ;;  %vm11612_vm5 = vcmask 408576  }
   0x2   :  { %v54_v2 = vrot.slane %v42_v0, 6  ;;  %v55_v3 = vrot.slane %v43_v1, 6  ;;  %v45_v5 = vld [vmem:[%s11598_s0 + $0x18] sm:$0xff]  ;;  %v57_v15 = vrot.slane %v44_v4, 6  ;;  %s8490_s0 = smov 22   ;;  %vm11616_vm6 = vcmask 179200  }
   0x3   :  { %v58_v16 = vrot.slane %v45_v5, 6  ;;  %v188_v61 = vshrl.u32 %v187_v58, 7  ;;  %v6983_v4 = vld [vmem:[%s11599_s11 + $0x14] ss:$8 sm:$0x3]  ;;  %vm11611_vm7 = vcmask 818176  }
   0x4   :  { %v8585_v6 = vsel %vm11613_vm0, %v54_v2, %v55_v3  ;;  %v8588_v7 = vsel %vm11613_vm0, 0.0, %v54_v2  ;;  %v68_v8 = vsel %vm11613_vm0, %v55_v3, 0.0  ;;  %v8608_v26 = vsel %vm11613_vm0, 0.0, %v57_v15  ;;  %s8494_s18 = smov 1   ;;  %s8495_s19 = smov 2  }
   0x5   :  { %v121_v9 = vrot.slane %v8588_v7, 3  ;;  %v122_v10 = vrot.slane %v8585_v6, 3  ;;  %v98_v11 = vrot.slane %v8588_v7, 2  ;;  %v99_v12 = vrot.slane %v8585_v6, 2  ;;  %s8496_s20 = smov 3   ;;  %s8497_s21 = smov 4  }
   0x6   :  { %v124_v13 = vrot.slane %v68_v8, 3  ;;  %v101_v14 = vrot.slane %v68_v8, 2  ;;  %v76_v19 = vrot.slane %v8585_v6, 1  ;;  %v78_v20 = vrot.slane %v68_v8, 1  ;;  %s8498_s22 = smov 5   ;;  %s8499_s23 = smov 6  }
   0x7   :  { %v123_v17 = vsel %vm120_vm1, %v121_v9, %v122_v10  ;;  %v100_v18 = vsel %vm11618_vm2, %v98_v11, %v99_v12  ;;  %v75_v23 = vrot.slane %v8588_v7, 1  ;;  %v8604_v24 = vsel %vm11613_vm0, %v57_v15, %v58_v16  ;;  %s8501_s15 = smov 7   ;;  %s8503_s16 = smov 64  }
   0x8   :  { %131 = vrot.lane.b32.xlu1 %v123_v17, %s8490_s0  ;;  %108 = vrot.lane.b32.xlu0 %v100_v18, %s8491_s29  ;;  %v125_v21 = vsel %vm120_vm1, %v122_v10, %v124_v13  ;;  %v102_v22 = vsel %vm11618_vm2, %v99_v12, %v101_v14  ;;  %v69_v25 = vsel %vm11613_vm0, %v58_v16, 0.0  ;;  %v79_v27 = vsel %vm74_vm3, %v76_v19, %v78_v20  ;;  %s8504_s14 = smov 32  }
   0x9   :  { %v77_v28 = vsel %vm74_vm3, %v75_v23, %v76_v19  ;;  %v104_v29 = vrot.slane %v8604_v24, 2  ;;  %v106_v30 = vrot.slane %v69_v25, 2  ;;  %v103_v31 = vrot.slane %v8608_v26, 2 }
   0xa   :  { %v127_v32 = vrot.slane %v8604_v24, 3  ;;  %v129_v35 = vrot.slane %v69_v25, 3  ;;  %v126_v36 = vrot.slane %v8608_v26, 3  ;;  %v145_v37 = vrot.slane %v8585_v6, 4 }
   0xb   :  { %v107_v33 = vsel %vm11618_vm2, %v104_v29, %v106_v30  ;;  %v105_v34 = vsel %vm11618_vm2, %v103_v31, %v104_v29  ;;  %v147_v40 = vrot.slane %v68_v8, 4  ;;  %v144_v41 = vrot.slane %v8588_v7, 4 }
   0xc   :  { %133 = vrot.lane.b32.xlu1 %v125_v21, %s8490_s0  ;;  %110 = vrot.lane.b32.xlu0 %v102_v22, %s8491_s29  ;;  %v130_v38 = vsel %vm120_vm1, %v127_v32, %v129_v35  ;;  %v128_v39 = vsel %vm120_vm1, %v126_v36, %v127_v32  ;;  %v81_v42 = vrot.slane %v8604_v24, 1  ;;  %v83_v45 = vrot.slane %v69_v25, 1 }
   0xd   :  { %v148_v43 = vsel %vm11617_vm4, %v145_v37, %v147_v40  ;;  %v146_v44 = vsel %vm11617_vm4, %v144_v41, %v145_v37  ;;  %v80_v46 = vrot.slane %v8608_v26, 1  ;;  %v150_v47 = vrot.slane %v8604_v24, 4 }
   0xe   :  { %v84_v48 = vsel %vm74_vm3, %v81_v42, %v83_v45  ;;  %v152_v50 = vrot.slane %v69_v25, 4  ;;  %v149_v51 = vrot.slane %v8608_v26, 4  ;;  %v8646_v0 = vsub.s32 1, %v188_v61 }
   0xf   :  { %v82_v49 = vsel %vm74_vm3, %v80_v46, %v81_v42  ;;  %v8648_v1 = vsub.s32 0, %v188_v61  ;;  %vm11615_vm8 = vcmask 588800   ;;  %vm11614_vm9 = vcmask 998400  }
  0x10   :  { %87 = vrot.lane.b32.xlu1 %v79_v27, %s8492_s30  ;;  %85 = vrot.lane.b32.xlu0 %v77_v28, %s8492_s30  ;;  %v153_v52 = vsel %vm11617_vm4, %v150_v47, %v152_v50  ;;  %v151_v53 = vsel %vm11617_vm4, %v149_v51, %v150_v47  ;;  %v194_v9 = vrot.slane %v6983_v4, %v8646_v0  ;;  %vm236_vm10 = vcmask 1042432  }
  0x11   :  { %v190_v10 = vrot.slane %v6983_v4, %v8648_v1  ;;  %vm389_vm11 = vcmask 7168   ;;  %vm394_vm12 = vcmask 15360   ;;  %vm399_vm13 = vcmask 23552  }
  0x12   :  { %vm404_vm14 = vcmask 31744   ;;  %vm409_vm15 = vcmask 39936  }
  0x14   :  { %114 = vrot.lane.b32.xlu1 %v107_v33, %s8491_s29  ;;  %112 = vrot.lane.b32.xlu0 %v105_v34, %s8491_s29 }
  0x18   :  { %137 = vrot.lane.b32.xlu1 %v130_v38, %s8490_s0  ;;  %135 = vrot.lane.b32.xlu0 %v128_v39, %s8490_s0 }
  0x1c   :  { %156 = vrot.lane.b32.xlu1 %v148_v43, %s8493_s13  ;;  %154 = vrot.lane.b32.xlu0 %v146_v44, %s8493_s13 }
  0x20   :  { %91 = vrot.lane.b32.xlu1 %v84_v48, %s8492_s30  ;;  %89 = vrot.lane.b32.xlu0 %v82_v49, %s8492_s30 }
  0x24   :  { %160 = vrot.lane.b32.xlu1 %v153_v52, %s8493_s13  ;;  %158 = vrot.lane.b32.xlu0 %v151_v53, %s8493_s13 }
  0x7a   :  { %v132_v54 = vpop.permute.xlu1 %131  ;;  %v109_v55 = vpop.permute.xlu0 %108 }
  0x7b   :  { %v177_v11 = vsel %vm11616_vm6, %v109_v55, %v132_v54 }
  0x7e   :  { %v134_v56 = vpop.permute.xlu1 %133  ;;  %v111_v57 = vpop.permute.xlu0 %110 }
  0x7f   :  { %v178_v12 = vsel %vm11616_vm6, %v111_v57, %v134_v56 }
  0x82   :  { %v88_v59 = vpop.permute.xlu1 %87  ;;  %v86_v60 = vpop.permute.xlu0 %85 }
  0x83   :  { %v168_v5 = vsel %vm11612_vm5, %v8585_v6, %v88_v59  ;;  %v167_v8 = vsel %vm11612_vm5, %v8588_v7, %v86_v60 }
  0x84   :  { %v173_v13 = vsel %vm11611_vm7, %v168_v5, %v111_v57  ;;  %v172_v14 = vsel %vm11611_vm7, %v167_v8, %v109_v55 }
  0x85   :  { %v199_v19 = vmul.f32 %v190_v10, %v173_v13  ;;  %v197_v20 = vmul.f32 %v190_v10, %v172_v14 }
  0x86   :  { %v115_v62 = vpop.permute.xlu1 %114  ;;  %v113_v63 = vpop.permute.xlu0 %112 }
  0x8a   :  { %v138_v2 = vpop.permute.xlu1 %137  ;;  %v136_v3 = vpop.permute.xlu0 %135 }
  0x8b   :  { %v180_v30 = vsel %vm11616_vm6, %v115_v62, %v138_v2  ;;  %v179_v31 = vsel %vm11616_vm6, %v113_v63, %v136_v3  ;;  %vm562_vm6 = vsmask.f32 4352 }
  0x8e   :  { %v157_v15 = vpop.permute.xlu1 %156  ;;  %v155_v16 = vpop.permute.xlu0 %154 }
  0x8f   :  { %v183_v6 = vsel %vm11615_vm8, %v178_v12, %v157_v15  ;;  %v182_v17 = vsel %vm11615_vm8, %v177_v11, %v155_v16 }
  0x90   :  { %v200_v7 = vmul.f32 %v194_v9, %v183_v6  ;;  %v198_v18 = vmul.f32 %v194_v9, %v182_v17 }
  0x92   :  { %v92_v21 = vpop.permute.xlu1 %91  ;;  %v90_v22 = vpop.permute.xlu0 %89  ;;  %v210_v23 = vsel %vm11614_vm9, %v200_v7, 0.0  ;;  %v206_v25 = vsel %vm11614_vm9, %v198_v18, 0.0 }
  0x93   :  { %v169_v27 = vsel %vm11612_vm5, %v8608_v26, %v90_v22  ;;  %v211_v28 = vadd.f32 %v210_v23, %v199_v19  ;;  %v207_v29 = vadd.f32 %v206_v25, %v197_v20  ;;  %v170_v35 = vsel %vm11612_vm5, %v8604_v24, %v92_v21  ;;  %v48_v24 = vld [vmem:[%s11599_s11] ss:$0 sm:$0xff] }
  0x94   :  { %v174_v32 = vsel %vm11611_vm7, %v169_v27, %v113_v63  ;;  %v175_v40 = vsel %vm11611_vm7, %v170_v35, %v115_v62  ;;  %vm414_vm7 = vcmask 48128   ;;  %vm423_vm5 = vcmask 56320  }
  0x95   :  { %212 = vadd.xlane.f32.xlu1 %v211_v28  ;;  %208 = vadd.xlane.f32.xlu0 %v207_v29  ;;  %v201_v39 = vmul.f32 %v190_v10, %v174_v32  ;;  %v203_v44 = vmul.f32 %v190_v10, %v175_v40 }
  0x96   :  { %v161_v33 = vpop.permute.xlu1 %160  ;;  %v159_v34 = vpop.permute.xlu0 %158 }
  0x97   :  { %v185_v36 = vsel %vm11615_vm8, %v180_v30, %v161_v33  ;;  %v184_v37 = vsel %vm11615_vm8, %v179_v31, %v159_v34  ;;  %vm532_vm8 = vsmask.f32 5376 }
  0x98   :  { %v204_v26 = vmul.f32 %v194_v9, %v185_v36  ;;  %v202_v38 = vmul.f32 %v194_v9, %v184_v37 }
  0x9a   :  { %v214_v41 = vsel %vm11614_vm9, %v202_v38, 0.0  ;;  %v218_v43 = vsel %vm11614_vm9, %v204_v26, 0.0  ;;  %vm498_vm9 = vsmask.f32 6400 }
  0x9b   :  { %v215_v42 = vadd.f32 %v214_v41, %v201_v39  ;;  %v219_v45 = vadd.f32 %v218_v43, %v203_v44 }
  0x9d   :  { %216 = vadd.xlane.f32.xlu0 %v215_v42 }
  0xa1   :  { %220 = vadd.xlane.f32.xlu0 %v219_v45 }
 0x11e   :  { %v213_v46 = vpop.xlane.xlu1 %212  ;;  %v209_v47 = vpop.xlane.xlu0 %208 }
 0x11f   :  { %v223_v48 = vadd.f32 %v213_v46, %v48_v24  ;;  %v222_v49 = vadd.f32 %v209_v47, %v48_v24 }
 0x121   :  { %v227_v50 = vmax.f32 %v223_v48, 0.0  ;;  %v226_v51 = vmax.f32 %v222_v49, 0.0 }
 0x123   :  { %v238_v52 = vrot.slane %v227_v50, 5  ;;  %v237_v53 = vrot.slane %v226_v51, 5 }
 0x125   :  { %v8683_v54 = vsel %vm236_vm10, %v238_v52, 0.0  ;;  %v8686_v55 = vsel %vm236_vm10, %v237_v53, %v238_v52  ;;  %v8689_v56 = vsel %vm236_vm10, 0.0, %v237_v53 }
 0x126   :  { %v217_v57 = vpop.xlane.xlu0 %216  ;;  %v258_v58 = vrot.slane %v8686_v55, 1  ;;  %v260_v59 = vrot.slane %v8683_v54, 1  ;;  %v257_v60 = vrot.slane %v8689_v56, 1  ;;  %v279_v2 = vrot.slane %v8689_v56, 2 }
 0x127   :  { %v224_v61 = vadd.f32 %v217_v57, %v48_v24  ;;  %v280_v3 = vrot.slane %v8686_v55, 2  ;;  %v301_v18 = vrot.slane %v8689_v56, 3  ;;  %v302_v21 = vrot.slane %v8686_v55, 3 }
 0x128   :  { %v261_v62 = vsel %vm74_vm3, %v258_v58, %v260_v59  ;;  %v259_v63 = vsel %vm74_vm3, %v257_v60, %v258_v58  ;;  %v282_v28 = vrot.slane %v8683_v54, 2  ;;  %v323_v30 = vrot.slane %v8689_v56, 4 }
 0x129   :  { %v228_v4 = vmax.f32 %v224_v61, 0.0  ;;  %269 = vrot.lane.b32.xlu0 %v261_v62, %s8494_s18  ;;  %267 = vrot.lane.b32.xlu1 %v259_v63, %s8494_s18  ;;  %v281_v10 = vsel %vm11618_vm2, %v279_v2, %v280_v3  ;;  %v303_v23 = vsel %vm120_vm1, %v301_v18, %v302_v21  ;;  %v324_v33 = vrot.slane %v8686_v55, 4 }
 0x12a   :  { %v221_v5 = vpop.xlane.xlu0 %220  ;;  %v283_v32 = vsel %vm11618_vm2, %v280_v3, %v282_v28  ;;  %v304_v26 = vrot.slane %v8683_v54, 3  ;;  %v345_v39 = vrot.slane %v8689_v56, 5  ;;  %v346_v42 = vrot.slane %v8686_v55, 5 }
 0x12b   :  { %v240_v8 = vrot.slane %v228_v4, 5  ;;  %v225_v9 = vadd.f32 %v221_v5, %v48_v24  ;;  %v325_v35 = vsel %vm11617_vm4, %v323_v30, %v324_v33  ;;  %v326_v46 = vrot.slane %v8683_v54, 4 }
 0x12c   :  { %v305_v41 = vsel %vm120_vm1, %v302_v21, %v304_v26  ;;  %v347_v44 = vsel %vm236_vm10, %v345_v39, %v346_v42  ;;  %v367_v48 = vrot.slane %v8689_v56, 6  ;;  %v368_v51 = vrot.slane %v8686_v55, 6 }
 0x12d   :  { %v229_v11 = vmax.f32 %v225_v9, 0.0  ;;  %289 = vrot.lane.b32.xlu0 %v281_v10, %s8495_s19  ;;  %v8703_v12 = vsel %vm236_vm10, 0.0, %v240_v8  ;;  %v327_v50 = vsel %vm11617_vm4, %v324_v33, %v326_v46  ;;  %v348_v59 = vrot.slane %v8683_v54, 5 }
 0x12e   :  { %v284_v16 = vrot.slane %v8703_v12, 2  ;;  %v262_v17 = vrot.slane %v8703_v12, 1  ;;  %v306_v29 = vrot.slane %v8703_v12, 3  ;;  %v328_v38 = vrot.slane %v8703_v12, 4 }
 0x12f   :  { %v241_v13 = vrot.slane %v229_v11, 5  ;;  %v350_v47 = vrot.slane %v8703_v12, 5  ;;  %v369_v53 = vsel %vm11613_vm0, %v367_v48, %v368_v51  ;;  %v372_v60 = vrot.slane %v8703_v12, 6 }
 0x130   :  { %v349_v62 = vsel %vm236_vm10, %v346_v42, %v348_v59  ;;  %v370_v3 = vrot.slane %v8683_v54, 6 }
 0x131   :  { %v8706_v14 = vsel %vm236_vm10, %v240_v8, %v241_v13  ;;  %v8709_v15 = vsel %vm236_vm10, %v241_v13, 0.0 }
 0x132   :  { %v285_v6 = vrot.slane %v8706_v14, 2  ;;  %v263_v7 = vrot.slane %v8706_v14, 1  ;;  %v265_v22 = vrot.slane %v8709_v15, 1  ;;  %v307_v27 = vrot.slane %v8706_v14, 3 }
 0x133   :  { %v287_v34 = vrot.slane %v8709_v15, 2  ;;  %v329_v37 = vrot.slane %v8706_v14, 4  ;;  %v309_v43 = vrot.slane %v8709_v15, 3  ;;  %v351_v24 = vrot.slane %v8706_v14, 5 }
 0x134   :  { %v286_v19 = vsel %vm11618_vm2, %v284_v16, %v285_v6  ;;  %v264_v20 = vsel %vm74_vm3, %v262_v17, %v263_v7  ;;  %v266_v25 = vsel %vm74_vm3, %v263_v7, %v265_v22  ;;  %v308_v31 = vsel %vm120_vm1, %v306_v29, %v307_v27 }
 0x135   :  { %293 = vrot.lane.b32.xlu0 %v286_v19, %s8495_s19  ;;  %271 = vrot.lane.b32.xlu1 %v264_v20, %s8494_s18  ;;  %v288_v36 = vsel %vm11618_vm2, %v285_v6, %v287_v34  ;;  %v330_v40 = vsel %vm11617_vm4, %v328_v38, %v329_v37  ;;  %v310_v45 = vsel %vm120_vm1, %v307_v27, %v309_v43  ;;  %v331_v52 = vrot.slane %v8709_v15, 4 }
 0x136   :  { %v352_v49 = vsel %vm236_vm10, %v350_v47, %v351_v24  ;;  %v373_v58 = vrot.slane %v8706_v14, 6  ;;  %v353_v63 = vrot.slane %v8709_v15, 5  ;;  %v371_v4 = vsel %vm11613_vm0, %v368_v51, %v370_v3  ;;  %v231_v3 = vld [vmem:[%s11599_s11 + $0x1] ss:$0 sm:$0xff] }
 0x137   :  { %v332_v57 = vsel %vm11617_vm4, %v329_v37, %v331_v52  ;;  %v375_v5 = vrot.slane %v8709_v15, 6 }
 0x138   :  { %v374_v61 = vsel %vm11613_vm0, %v372_v60, %v373_v58  ;;  %v354_v2 = vsel %vm236_vm10, %v351_v24, %v353_v63 }
 0x139   :  { %311 = vrot.lane.b32.xlu0 %v303_v23, %s8496_s20  ;;  %273 = vrot.lane.b32.xlu1 %v266_v25, %s8494_s18  ;;  %v376_v8 = vsel %vm11613_vm0, %v373_v58, %v375_v5 }
 0x13d   :  { %315 = vrot.lane.b32.xlu0 %v308_v31, %s8496_s20  ;;  %291 = vrot.lane.b32.xlu1 %v283_v32, %s8495_s19  ;;  %v230_v32 = vld [vmem:[%s11599_s11 + $0x15] ss:$0 sm:$0xff] }
 0x141   :  { %333 = vrot.lane.b32.xlu0 %v325_v35, %s8497_s21  ;;  %295 = vrot.lane.b32.xlu1 %v288_v36, %s8495_s19 }
 0x145   :  { %337 = vrot.lane.b32.xlu0 %v330_v40, %s8497_s21  ;;  %313 = vrot.lane.b32.xlu1 %v305_v41, %s8496_s20 }
 0x149   :  { %355 = vrot.lane.b32.xlu0 %v347_v44, %s8498_s22  ;;  %317 = vrot.lane.b32.xlu1 %v310_v45, %s8496_s20 }
 0x14d   :  { %359 = vrot.lane.b32.xlu0 %v352_v49, %s8498_s22  ;;  %335 = vrot.lane.b32.xlu1 %v327_v50, %s8497_s21 }
 0x151   :  { %377 = vrot.lane.b32.xlu0 %v369_v53, %s8499_s23  ;;  %339 = vrot.lane.b32.xlu1 %v332_v57, %s8497_s21 }
 0x155   :  { %381 = vrot.lane.b32.xlu0 %v374_v61, %s8499_s23  ;;  %357 = vrot.lane.b32.xlu1 %v349_v62, %s8498_s22 }
 0x159   :  { %361 = vrot.lane.b32.xlu1 %v354_v2, %s8498_s22 }
 0x15d   :  { %379 = vrot.lane.b32.xlu1 %v371_v4, %s8499_s23 }
 0x161   :  { %383 = vrot.lane.b32.xlu1 %v376_v8, %s8499_s23 }
 0x19b   :  { %v270_v9 = vpop.permute.xlu0 %269  ;;  %v268_v10 = vpop.permute.xlu1 %267 }
 0x19c   :  { %v390_v23 = vsel %vm389_vm11, %v8689_v56, %v268_v10  ;;  %v391_v44 = vsel %vm389_vm11, %v8686_v55, %v270_v9 }
 0x19f   :  { %v290_v11 = vpop.permute.xlu0 %289 }
 0x1a0   :  { %v395_v28 = vsel %vm394_vm12, %v390_v23, %v290_v11 }
 0x1a7   :  { %v272_v13 = vpop.permute.xlu1 %271  ;;  %v294_v16 = vpop.permute.xlu0 %293 }
 0x1a8   :  { %v392_v29 = vsel %vm389_vm11, %v8703_v12, %v272_v13 }
 0x1a9   :  { %v397_v35 = vsel %vm394_vm12, %v392_v29, %v294_v16 }
 0x1ab   :  { %v274_v6 = vpop.permute.xlu1 %273  ;;  %v312_v17 = vpop.permute.xlu0 %311 }
 0x1ac   :  { %v400_v30 = vsel %vm399_vm13, %v395_v28, %v312_v17  ;;  %v393_v49 = vsel %vm389_vm11, %v8706_v14, %v274_v6 }
 0x1af   :  { %v292_v54 = vpop.permute.xlu1 %291  ;;  %v316_v7 = vpop.permute.xlu0 %315 }
 0x1b0   :  { %v402_v12 = vsel %vm399_vm13, %v397_v35, %v316_v7  ;;  %v396_v46 = vsel %vm394_vm12, %v391_v44, %v292_v54 }
 0x1b3   :  { %v296_v18 = vpop.permute.xlu1 %295  ;;  %v334_v19 = vpop.permute.xlu0 %333 }
 0x1b4   :  { %v405_v31 = vsel %vm404_vm14, %v400_v30, %v334_v19  ;;  %v398_v52 = vsel %vm394_vm12, %v393_v49, %v296_v18 }
 0x1b7   :  { %v314_v20 = vpop.permute.xlu1 %313  ;;  %v338_v21 = vpop.permute.xlu0 %337 }
 0x1b8   :  { %v407_v26 = vsel %vm404_vm14, %v402_v12, %v338_v21  ;;  %v401_v47 = vsel %vm399_vm13, %v396_v46, %v314_v20 }
 0x1bb   :  { %v318_v15 = vpop.permute.xlu1 %317  ;;  %v356_v22 = vpop.permute.xlu0 %355 }
 0x1bc   :  { %v410_v56 = vsel %vm409_vm15, %v405_v31, %v356_v22  ;;  %v403_v53 = vsel %vm399_vm13, %v398_v52, %v318_v15 }
 0x1bf   :  { %v336_v25 = vpop.permute.xlu1 %335  ;;  %v360_v27 = vpop.permute.xlu0 %359 }
 0x1c0   :  { %v412_v38 = vsel %vm409_vm15, %v407_v26, %v360_v27  ;;  %v406_v48 = vsel %vm404_vm14, %v401_v47, %v336_v25 }
 0x1c3   :  { %v340_v33 = vpop.permute.xlu1 %339  ;;  %v378_v34 = vpop.permute.xlu0 %377 }
 0x1c4   :  { %v415_v36 = vsel %vm414_vm7, %v410_v56, %v378_v34  ;;  %v408_v58 = vsel %vm404_vm14, %v403_v53, %v340_v33 }
 0x1c5   :  { %v419_v37 = vmul.f32 %v415_v36, %v230_v32 }
 0x1c7   :  { %v358_v39 = vpop.permute.xlu1 %357  ;;  %v382_v40 = vpop.permute.xlu0 %381  ;;  %v424_v41 = vsel %vm423_vm5, %v419_v37, 0.0 }
 0x1c8   :  { %v417_v42 = vsel %vm414_vm7, %v412_v38, %v382_v40  ;;  %425 = vadd.xlane.f32.xlu0 %v424_v41  ;;  %v411_v50 = vsel %vm409_vm15, %v406_v48, %v358_v39 }
 0x1c9   :  { %v421_v43 = vmul.f32 %v417_v42, %v230_v32 }
 0x1cb   :  { %v362_v45 = vpop.permute.xlu1 %361  ;;  %v430_v24 = vsel %vm423_vm5, %v421_v43, 0.0 }
 0x1cc   :  { %431 = vadd.xlane.f32.xlu0 %v430_v24  ;;  %v413_v59 = vsel %vm409_vm15, %v408_v58, %v362_v45 }
 0x1cf   :  { %v380_v51 = vpop.permute.xlu1 %379 }
 0x1d0   :  { %v416_v55 = vsel %vm414_vm7, %v411_v50, %v380_v51 }
 0x1d1   :  { %v420_v57 = vmul.f32 %v416_v55, %v230_v32 }
 0x1d3   :  { %v384_v60 = vpop.permute.xlu1 %383  ;;  %v427_v61 = vsel %vm423_vm5, %v420_v57, 0.0 }
 0x1d4   :  { %v418_v62 = vsel %vm414_vm7, %v413_v59, %v384_v60  ;;  %428 = vadd.xlane.f32.xlu1 %v427_v61 }
 0x1d5   :  { %v422_v14 = vmul.f32 %v418_v62, %v230_v32 }
 0x1d7   :  { %v433_v63 = vsel %vm423_vm5, %v422_v14, 0.0 }
 0x1d8   :  { %434 = vadd.xlane.f32.xlu0 %v433_v63 }
 0x251   :  { %v426_v2 = vpop.xlane.xlu0 %425 }
 0x252   :  { %v436_v4 = vadd.f32 %v426_v2, %v231_v3 }
 0x254   :  { %v440_v10 = vmax.f32 %v436_v4, 0.0 }
 0x255   :  { %v432_v5 = vpop.xlane.xlu0 %431 }
 0x256   :  { %v438_v11 = vadd.f32 %v432_v5, %v231_v3 }
 0x258   :  { %v442_v54 = vmax.f32 %v438_v11, 0.0 }
 0x25d   :  { %v429_v8 = vpop.xlane.xlu1 %428 }
 0x25e   :  { %v437_v9 = vadd.f32 %v429_v8, %v231_v3 }
 0x260   :  { %v441_v13 = vmax.f32 %v437_v9, 0.0 }
 0x261   :  { %v435_v16 = vpop.xlane.xlu0 %434 }
 0x262   :  { %v445_v6 = vpack.c.bf16 %v441_v13, %v440_v10  ;;  %v439_v17 = vadd.f32 %v435_v16, %v231_v3 }
 0x264   :  { %v449_v7 = vrot.slane %v445_v6, 6  ;;  %v443_v18 = vmax.f32 %v439_v17, 0.0 }
 0x266   :  { %v8823_v19 = vsel %vm11613_vm0, 0, %v449_v7  ;;  %v8826_v20 = vsel %vm11613_vm0, %v449_v7, 0  ;;  %v446_v21 = vpack.c.bf16 %v443_v18, %v442_v54 }
 0x267   :  { %v522_v15 = vrot.slane %v8823_v19, 2  ;;  %v523_v22 = vrot.slane %v8826_v20, 2  ;;  %v488_v23 = vrot.slane %v8823_v19, 1  ;;  %v489_v27 = vrot.slane %v8826_v20, 1 }
 0x268   :  { %v450_v25 = vrot.slane %v446_v21, 6  ;;  %v552_v28 = vrot.slane %v8823_v19, 3  ;;  %v553_v30 = vrot.slane %v8826_v20, 3  ;;  %v8836_v31 = vshrl.u32 %v8823_v19, 16 }
 0x269   :  { %v524_v29 = vsel %vm11618_vm2, %v522_v15, %v523_v22  ;;  %v8839_v32 = vshll.u32 %v8823_v19, 16  ;;  %v490_v34 = vsel %vm74_vm3, %v488_v23, %v489_v27  ;;  %v502_v35 = vshrl.u32 %v8826_v20, 16 }
 0x26a   :  { %v8842_v56 = vsel %vm11613_vm0, 0, %v450_v25  ;;  %v8845_v33 = vsel %vm11613_vm0, %v450_v25, 0  ;;  %528 = vrot.lane.b32.xlu0 %v524_v29, %s8497_s21  ;;  %v465_v36 = vshll.u32 %v8826_v20, 16  ;;  %494 = vrot.lane.b32.xlu1 %v490_v34, %s8495_s19  ;;  %v554_v41 = vsel %vm120_vm1, %v552_v28, %v553_v30 }
 0x26b   :  { %v491_v12 = vrot.slane %v8842_v56, 1  ;;  %v492_v37 = vrot.slane %v8845_v33, 1  ;;  %v525_v26 = vrot.slane %v8842_v56, 2  ;;  %v526_v38 = vrot.slane %v8845_v33, 2 }
 0x26c   :  { %v8857_v39 = vshll.u32 %v8842_v56, 16  ;;  %v8860_v40 = vshll.u32 %v8845_v33, 16  ;;  %v499_v43 = vrot.slane %v8836_v31, 1  ;;  %v8867_v44 = vshrl.u32 %v8842_v56, 16 }
 0x26d   :  { %v493_v42 = vsel %vm74_vm3, %v491_v12, %v492_v37  ;;  %v500_v24 = vrot.slane %v8839_v32, 2  ;;  %v504_v46 = vrot.slane %v502_v35, 1  ;;  %v555_v47 = vrot.slane %v8842_v56, 3 }
 0x26e   :  { %558 = vrot.lane.b32.xlu0 %v554_v41, %s8499_s23  ;;  %v473_v45 = vrot.slane %v8857_v39, 1  ;;  %496 = vrot.lane.b32.xlu1 %v493_v42, %s8495_s19  ;;  %v556_v48 = vrot.slane %v8845_v33, 3  ;;  %v505_v49 = vrot.slane %v465_v36, 2  ;;  %v527_v50 = vsel %vm11618_vm2, %v525_v26, %v526_v38 }
 0x26f   :  { %vm458_vm0 = vsmask.f32 7424  ;;  %v477_v52 = vrot.slane %v8860_v40, 1  ;;  %v501_v55 = vor.u32 %v500_v24, %v499_v43  ;;  %v463_v53 = vrot.slane %v8839_v32, 1 }
 0x270   :  { %v474_v51 = vor.u32 %v473_v45, %v8867_v44  ;;  %v533_v57 = vrot.slane %v8836_v31, 2  ;;  %v534_v58 = vrot.slane %v8839_v32, 3  ;;  %v506_v60 = vor.u32 %v505_v49, %v504_v46 }
 0x271   :  { %v536_v61 = vrot.slane %v502_v35, 2  ;;  %v537_v62 = vrot.slane %v465_v36, 3  ;;  %v557_v14 = vsel %vm120_vm1, %v555_v47, %v556_v48  ;;  %v511_v63 = vshrl.u32 %v8845_v33, 16 }
 0x272   :  { %v478_v59 = vsel %vm458_vm0, %v474_v51, %v477_v52  ;;  %530 = vrot.lane.b32.xlu1 %v527_v50, %s8497_s21  ;;  %v508_v2 = vrot.slane %v8867_v44, 1  ;;  %v509_v3 = vrot.slane %v8857_v39, 2  ;;  %v514_v4 = vrot.slane %v8860_v40, 2 }
 0x273   :  { %481 = vrot.lane.b32.xlu0 %v478_v59, %s8494_s18  ;;  %v563_v5 = vrot.slane %v8836_v31, 3  ;;  %v513_v8 = vrot.slane %v511_v63, 1  ;;  %v564_v9 = vrot.slane %v8839_v32, 4  ;;  %v566_v10 = vrot.slane %v502_v35, 3  ;;  %v7769_v35 = vld [vmem:[%s11600_s2] sm:$0x1f]  }
 0x274   :  { %v567_v11 = vrot.slane %v465_v36, 4  ;;  %v507_v13 = vsel %vm498_vm9, %v501_v55, %v506_v60  ;;  %v464_v16 = vor.u32 %v463_v53, %v8836_v31  ;;  %v535_v6 = vor.u32 %v534_v58, %v533_v57  ;;  %s8502_s2 = smov 8  }
 0x275   :  { %v538_v17 = vor.u32 %v537_v62, %v536_v61  ;;  %v467_v54 = vrot.slane %v465_v36, 1  ;;  %v540_v7 = vrot.slane %v8867_v44, 2  ;;  %v541_v18 = vrot.slane %v8857_v39, 3 }
 0x276   :  { %560 = vrot.lane.b32.xlu1 %v557_v14, %s8499_s23  ;;  %v510_v21 = vor.u32 %v509_v3, %v508_v2  ;;  %v515_v15 = vor.u32 %v514_v4, %v513_v8  ;;  %v565_v22 = vor.u32 %v564_v9, %v563_v5  ;;  %v568_v23 = vor.u32 %v567_v11, %v566_v10 }
 0x277   :  { %517 = vrot.lane.b32.xlu0 %v507_v13, %s8496_s20  ;;  %v468_v25 = vsel %vm458_vm0, %v464_v16, %v467_v54  ;;  %v539_v27 = vsel %vm532_vm8, %v535_v6, %v538_v17  ;;  %v543_v28 = vrot.slane %v511_v63, 2  ;;  %v544_v29 = vrot.slane %v8860_v40, 3 }
 0x278   :  { %v582_v30 = vrot.slane %v8823_v19, 4  ;;  %v583_v31 = vrot.slane %v8826_v20, 4  ;;  %v542_v32 = vor.u32 %v541_v18, %v540_v7  ;;  %v570_v34 = vrot.slane %v8867_v44, 3 }
 0x279   :  { %v516_v36 = vsel %vm498_vm9, %v510_v21, %v515_v15  ;;  %v569_v12 = vsel %vm562_vm6, %v565_v22, %v568_v23  ;;  %v571_v37 = vrot.slane %v8857_v39, 4  ;;  %v8500_v26 = vmov 65535   ;;  %v7770_v15 = vld [vmem:[%s11601_s3 + $0x78] sm:$0xff]   ;;  %v7772_v23 = vld [vmem:[%s11601_s3 + $0x70] sm:$0xff]  }
 0x27a   :  { %479 = vrot.lane.b32.xlu1 %v468_v25, %s8494_s18  ;;  %v637_v38 = vsel %vm11617_vm4, 4294967295, %v8500_v26  ;;  %v545_v41 = vor.u32 %v544_v29, %v543_v28  ;;  %v573_v42 = vrot.slane %v511_v63, 3  ;;  %v574_v20 = vrot.slane %v8860_v40, 4  ;;  %v7771_v22 = vld [vmem:[%s11601_s3 + $0x38] sm:$0xff]   ;;  %7553 = vmatprep.subr.bf16.mxu0 %v7770_v15  ;;  %v7773_v25 = vld [vmem:[%s11601_s3 + $0x30] sm:$0xff]   ;;  %v7775_v28 = vld [vmem:[%s11601_s3 + $0x28] sm:$0xff]  }
 0x27b   :  { %547 = vrot.lane.b32.xlu0 %v539_v27, %s8498_s22  ;;  %v638_v43 = vsel %vm120_vm1, %v637_v38, 0  ;;  %v584_v24 = vsel %vm11617_vm4, %v582_v30, %v583_v31  ;;  %v572_v39 = vor.u32 %v571_v37, %v570_v34  ;;  %v585_v47 = vrot.slane %v8842_v56, 4  ;;  %7554 = vmatpush3.bf16.msra.mxu0 %v7771_v22  ;;  %v7774_v27 = vld [vmem:[%s11601_s3 + $0x68] sm:$0xff]   ;;  %v444_v30 = vld [vmem:[%s11599_s11 + $0x2] ss:$0 sm:$0xff] }
 0x27c   :  { %v640_v44 = vand.u32 %v7769_v35, %v638_v43  ;;  %v546_v45 = vsel %vm532_vm8, %v542_v32, %v545_v41  ;;  %v575_v46 = vor.u32 %v574_v20, %v573_v42  ;;  %v586_v48 = vrot.slane %v8845_v33, 4  ;;  %7555 = vmatprep.subr.bf16.mxu0 %v7772_v23  ;;  %v7776_v41 = vld [vmem:[%s11601_s3 + $0xa8] sm:$0xff]   ;;  %v7777_v42 = vld [vmem:[%s11601_s3 + $0x60] sm:$0xff]  }
 0x27d   :  { %vm632_vm2 = vcmask 72704   ;;  %v7778_v20 = vld [vmem:[%s11601_s3 + $0x20] sm:$0xff]   ;;  %v7787_v15 = vld [vmem:[%s11601_s3 + $0x8] sm:$0xff]  }
 0x27e   :  { %519 = vrot.lane.b32.xlu1 %v516_v36, %s8496_s20  ;;  %7709 = vmatprep.subr.bf16.mxu1 %v640_v44  ;;  %v576_v40 = vsel %vm562_vm6, %v572_v39, %v575_v46  ;;  %v587_v49 = vsel %vm11617_vm4, %v585_v47, %v586_v48  ;;  %vm620_vm4 = vcmask 64512   ;;  %v7780_v47 = vld [vmem:[%s11601_s3 + $0x58] sm:$0xff]  }
 0x27f   :  { %577 = vrot.lane.b32.xlu0 %v569_v12, %s8501_s15  ;;  %7710 = vmatpush3.bf16.msra.mxu1 %v640_v44  ;;  %v7781_v48 = vld [vmem:[%s11601_s3 + $0x18] sm:$0xff]  }
 0x280   :  { %7556 = vmatpush3.bf16.msra.mxu0 %v7773_v25  ;;  %7715 = vmatprep.subr.bf16.mxu1 %v7776_v41 }
 0x281   :  { %7557 = vmatprep.subr.bf16.mxu0 %v7774_v27 }
 0x282   :  { %549 = vrot.lane.b32.xlu1 %v546_v45, %s8498_s22 }
 0x283   :  { %588 = vrot.lane.b32.xlu0 %v584_v24, %s8502_s2 }
 0x284   :  { %7558 = vmatpush3.bf16.msra.mxu0 %v7775_v28 }
 0x285   :  { %7559 = vmatprep.subr.bf16.mxu0 %v7777_v42 }
 0x286   :  { %579 = vrot.lane.b32.xlu1 %v576_v40, %s8501_s15  ;;  %v7779_v40 = vld [vmem:[%s11601_s3 + $0xa0] sm:$0xff]  }
 0x288   :  { %7560 = vmatpush3.bf16.msra.mxu0 %v7778_v20 }
 0x289   :  { %7561 = vmatprep.subr.bf16.mxu0 %v7780_v47 }
 0x28a   :  { %590 = vrot.lane.b32.xlu1 %v587_v49, %s8502_s2 }
 0x28c   :  { %7562 = vmatpush3.bf16.msra.mxu0 %v7781_v48 }
 0x2dc   :  { %v529_v50 = vpop.permute.xlu0 %528  ;;  %v495_v51 = vpop.permute.xlu1 %494 }
 0x2e0   :  { %v559_v52 = vpop.permute.xlu0 %558  ;;  %v497_v55 = vpop.permute.xlu1 %496 }
 0x2e4   :  { %v531_v53 = vpop.permute.xlu1 %530 }
 0x2e5   :  { %v482_v57 = vpop.permute.xlu0 %481 }
 0x2e6   :  { %v595_v63 = vsel %vm389_vm11, %v8842_v56, %v482_v57 }
 0x2e7   :  { %v599_v9 = vsel %vm394_vm12, %v595_v63, %v497_v55 }
 0x2e8   :  { %v561_v58 = vpop.permute.xlu1 %560 }
 0x2e9   :  { %v518_v59 = vpop.permute.xlu0 %517 }
 0x2ec   :  { %v480_v60 = vpop.permute.xlu1 %479 }
 0x2ed   :  { %v548_v61 = vpop.permute.xlu0 %547  ;;  %v593_v62 = vsel %vm389_vm11, %v8823_v19, %v480_v60  ;;  %vm11622_vm11 = vcmask 1043456  }
 0x2ee   :  { %v597_v14 = vsel %vm394_vm12, %v593_v62, %v495_v51 }
 0x2ef   :  { %v601_v33 = vsel %vm399_vm13, %v597_v14, %v518_v59  ;;  %v7782_v59 = vld [vmem:[%s11601_s3 + $0x98] sm:$0xff]  }
 0x2f0   :  { %v605_v2 = vsel %vm404_vm14, %v601_v33, %v529_v50  ;;  %v520_v3 = vpop.permute.xlu1 %519 }
 0x2f1   :  { %v578_v4 = vpop.permute.xlu0 %577  ;;  %v609_v5 = vsel %vm409_vm15, %v605_v2, %v548_v61  ;;  %v603_v10 = vsel %vm399_vm13, %v599_v9, %v520_v3  ;;  %vm11624_vm13 = vmmov %vm11622_vm11 }
 0x2f2   :  { %v613_v8 = vsel %vm414_vm7, %v609_v5, %v559_v52  ;;  %v607_v56 = vsel %vm404_vm14, %v603_v10, %v531_v53  ;;  %v7783_v5 = vld [vmem:[%s11601_s3 + $0x50] sm:$0xff]  }
 0x2f3   :  { %v617_v19 = vsel %vm423_vm5, %v613_v8, %v578_v4  ;;  %v7784_v8 = vld [vmem:[%s11601_s3 + $0x10] sm:$0xff]   ;;  %7563 = vmatprep.subr.bf16.mxu0 %v7783_v5 }
 0x2f4   :  { %v550_v11 = vpop.permute.xlu1 %549  ;;  %7564 = vmatpush3.bf16.msra.mxu0 %v7784_v8 }
 0x2f5   :  { %v589_v13 = vpop.permute.xlu0 %588  ;;  %v611_v6 = vsel %vm409_vm15, %v607_v56, %v550_v11 }
 0x2f6   :  { %v622_v16 = vsel %vm620_vm4, %v617_v19, %v589_v13  ;;  %v615_v54 = vsel %vm414_vm7, %v611_v6, %v561_v58  ;;  %vm844_vm7 = vcmask 523264  }
 0x2f7   :  { %7711 = vmatprep.mubr.msk.bf16.mxu1 %vm632_vm2, %v622_v16 }
 0x2f8   :  { %v580_v17 = vpop.permute.xlu1 %579 }
 0x2f9   :  { %v619_v7 = vsel %vm423_vm5, %v615_v54, %v580_v17  ;;  %vm839_vm5 = vcmask 261120  }
 0x2fc   :  { %v591_v18 = vpop.permute.xlu1 %590 }
 0x2fd   :  { %v624_v21 = vsel %vm620_vm4, %v619_v7, %v591_v18  ;;  %v7785_v18 = vld [vmem:[%s11601_s3 + $0x90] sm:$0xff]  }
 0x2fe   :  { %7712 = vmatmul.mubr.msk.bf16.vlgmr.msra.gmra.mxu1 %vm632_vm2, %v624_v21  ;;  %vm717_vm2 = vsmask.f32 2304  ;;  %v7786_v21 = vld [vmem:[%s11601_s3 + $0x48] sm:$0xff]  }
 0x2ff   :  { %7716 = vmatpush3.bf16.msra.mxu1 %v7776_v41  ;;  %vm8977_vm4 = vmand %vm236_vm10, %vm717_vm2  ;;  %7565 = vmatprep.subr.bf16.mxu0 %v7786_v21 }
 0x300   :  { %7717 = vmatprep.subr.bf16.mxu1 %v7779_v40  ;;  %7566 = vmatpush3.bf16.msra.mxu0 %v7787_v15 }
 0x303   :  { %7718 = vmatpush3.bf16.msra.mxu1 %v7779_v40 }
 0x304   :  { %7719 = vmatprep.subr.bf16.mxu1 %v7782_v59 }
 0x307   :  { %7720 = vmatpush3.bf16.msra.mxu1 %v7782_v59 }
 0x308   :  { %7721 = vmatprep.subr.bf16.mxu1 %v7785_v18 }
 0x30b   :  { %7722 = vmatpush3.bf16.msra.mxu1 %v7785_v18 }
 0x3be   :  { %v7713_v29 = vpop.f32.mrf.mxu1 }
 0x3bf   :  { %v685_v32 = vadd.f32 %v7713_v29, %v444_v30 }
 0x3c0   :  { %v676_v31 = vpop.f32.mrf.mxu1 }
 0x3c1   :  { %v677_v35 = vadd.f32 %v676_v31, %v444_v30  ;;  %v693_v37 = vmax.f32 %v685_v32, 0.0 }
 0x3c2   :  { %v7714_v34 = vpop.f32.mrf.mxu1 }
 0x3c3   :  { %v688_v36 = vadd.f32 %v7714_v34, %v444_v30  ;;  %v691_v43 = vmax.f32 %v677_v35, 0.0  ;;  %v7788_v35 = vld [vmem:[%s11601_s3 + $0x88] sm:$0xff]  }
 0x3c4   :  { %v679_v12 = vpop.f32.mrf.mxu1  ;;  %7723 = vmatprep.subr.bf16.mxu1 %v7788_v35 }
 0x3c5   :  { %v694_v26 = vmax.f32 %v688_v36, 0.0  ;;  %v680_v38 = vadd.f32 %v679_v12, %v444_v30  ;;  %v7789_v36 = vld [vmem:[%s11601_s3 + $0x40] sm:$0xff]   ;;  %7724 = vmatpush3.bf16.msra.mxu1 %v7788_v35 }
 0x3c6   :  { %v7790_v12 = vld [vmem:[%s11601_s3] sm:$0xff]   ;;  %7567 = vmatprep.subr.bf16.mxu0 %v7789_v36 }
 0x3c7   :  { %v696_v44 = vpack.c.bf16 %v694_v26, %v693_v37  ;;  %v692_v45 = vmax.f32 %v680_v38, 0.0  ;;  %7568 = vmatpush3.bf16.msra.mxu0 %v7790_v12 }
 0x3c9   :  { %v707_v24 = vshrl.u32 %v696_v44, 16  ;;  %v710_v39 = vshll.u32 %v696_v44, 16  ;;  %v695_v46 = vpack.c.bf16 %v692_v45, %v691_v43 }
 0x3cb   :  { %v709_v49 = vrot.slane %v707_v24, 5  ;;  %v712_v50 = vrot.slane %v710_v39, 6  ;;  %v699_v51 = vshrl.u32 %v695_v46, 16  ;;  %v702_v52 = vshll.u32 %v695_v46, 16  ;;  %v7791_v24 = vld [vmem:[%s11601_s3 + $0x80] sm:$0xff]   ;;  %s8505_s3 = smov 96  }
 0x3cc   :  { %7725 = vmatprep.subr.bf16.mxu1 %v7791_v24 }
 0x3cd   :  { %v713_v53 = vor.u32 %v712_v50, %v709_v49  ;;  %v701_v57 = vrot.slane %v699_v51, 5  ;;  %v704_v58 = vrot.slane %v702_v52, 6  ;;  %7726 = vmatpush3.bf16.msra.mxu1 %v7791_v24 }
 0x3cf   :  { %v8986_v60 = vsel %vm8977_vm4, 0, %v713_v53  ;;  %v8990_v61 = vsel %vm8977_vm4, %v713_v53, 0  ;;  %v705_v62 = vor.u32 %v704_v58, %v701_v57 }
 0x3d0   :  { %v758_v14 = vrot.slane %v8986_v60, 1  ;;  %v759_v33 = vrot.slane %v8990_v61, 1  ;;  %v9003_v3 = vshll.u32 %v8990_v61, 16  ;;  %v9006_v4 = vshll.u32 %v8986_v60, 16 }
 0x3d1   :  { %v8996_v63 = vsel %vm8977_vm4, 0, %v705_v62  ;;  %v9000_v2 = vsel %vm8977_vm4, %v705_v62, 0  ;;  %v9020_v11 = vshrl.u32 %v8986_v60, 16  ;;  %v9048_v30 = vshrl.u32 %v8990_v61, 16 }
 0x3d2   :  { %v760_v9 = vsel %vm74_vm3, %v758_v14, %v759_v33  ;;  %v756_v19 = vrot.slane %v9000_v2, 1  ;;  %v755_v10 = vrot.slane %v8996_v63, 1  ;;  %v811_v13 = vrot.slane %v8996_v63, 3 }
 0x3d3   :  { %763 = vrot.lane.b32.xlu0 %v760_v9, %s8503_s16  ;;  %v812_v16 = vrot.slane %v9000_v2, 3  ;;  %v740_v56 = vrot.slane %v9006_v4, 1  ;;  %v9027_v6 = vshll.u32 %v9000_v2, 16  ;;  %v768_v17 = vshrl.u32 %v9000_v2, 16 }
 0x3d4   :  { %910 = vrot.lane.b32.xlu1 %v756_v19, %s8503_s16  ;;  %v724_v54 = vshrl.u32 %v8996_v63, 16  ;;  %v726_v7 = vshll.u32 %v8996_v63, 16  ;;  %v745_v22 = vrot.slane %v9003_v3, 1  ;;  %v757_v23 = vsel %vm74_vm3, %v755_v10, %v756_v19 }
 0x3d5   :  { %v741_v25 = vor.u32 %v740_v56, %v9020_v11  ;;  %v813_v29 = vsel %vm120_vm1, %v811_v13, %v812_v16  ;;  %v796_v31 = vrot.slane %v768_v17, 2  ;;  %v797_v32 = vrot.slane %v9027_v6, 3 }
 0x3d6   :  { %v793_v27 = vrot.slane %v724_v54, 2  ;;  %v794_v28 = vrot.slane %v726_v7, 3  ;;  %v733_v34 = vrot.slane %v9027_v6, 1  ;;  %v905_v37 = vor.u32 %v9048_v30, %v745_v22 }
 0x3d7   :  { %761 = vrot.lane.b32.xlu0 %v757_v23, %s8503_s16  ;;  %v746_v26 = vsel %vm458_vm0, %v741_v25, %v745_v22  ;;  %v728_v41 = vrot.slane %v726_v7, 1  ;;  %v821_v42 = vrot.slane %v724_v54, 3  ;;  %v798_v20 = vor.u32 %v797_v32, %v796_v31 }
 0x3d8   :  { %817 = vrot.lane.b32.xlu1 %v813_v29, %s8503_s16  ;;  %v795_v38 = vor.u32 %v794_v28, %v793_v27  ;;  %v822_v43 = vrot.slane %v726_v7, 4  ;;  %v824_v44 = vrot.slane %v768_v17, 3  ;;  %v825_v45 = vrot.slane %v9027_v6, 4 }
 0x3d9   :  { %v904_v39 = vor.u32 %v768_v17, %v733_v34  ;;  %v765_v46 = vrot.slane %v724_v54, 1  ;;  %v766_v40 = vrot.slane %v726_v7, 2  ;;  %v770_v47 = vrot.slane %v768_v17, 1 }
 0x3da   :  { %v771_v48 = vrot.slane %v9027_v6, 2  ;;  %v729_v49 = vor.u32 %v728_v41, %v724_v54  ;;  %v799_v50 = vsel %vm532_vm8, %v795_v38, %v798_v20  ;;  %v823_v51 = vor.u32 %v822_v43, %v821_v42 }
 0x3db   :  { %908 = vrot.lane.b32.xlu0 %v905_v37, %s8504_s14  ;;  %v826_v52 = vor.u32 %v825_v45, %v824_v44  ;;  %v767_v53 = vor.u32 %v766_v40, %v765_v46  ;;  %v800_v58 = vrot.slane %v9020_v11, 2  ;;  %v801_v59 = vrot.slane %v9006_v4, 3 }
 0x3dc   :  { %749 = vrot.lane.b32.xlu1 %v746_v26, %s8504_s14  ;;  %v772_v57 = vor.u32 %v771_v48, %v770_v47  ;;  %v734_v62 = vsel %vm458_vm0, %v729_v49, %v733_v34  ;;  %v803_v14 = vrot.slane %v9048_v30, 2  ;;  %v804_v5 = vrot.slane %v9003_v3, 3 }
 0x3dd   :  { %v827_v8 = vsel %vm562_vm6, %v823_v51, %v826_v52  ;;  %v814_v9 = vrot.slane %v8986_v60, 3  ;;  %v802_v10 = vor.u32 %v801_v59, %v800_v58  ;;  %v815_v13 = vrot.slane %v8990_v61, 3 }
 0x3de   :  { %v773_v19 = vsel %vm498_vm9, %v767_v53, %v772_v57  ;;  %v828_v16 = vrot.slane %v9020_v11, 3  ;;  %v805_v56 = vor.u32 %v804_v5, %v803_v14  ;;  %v829_v6 = vrot.slane %v9006_v4, 4 }
 0x3df   :  { %906 = vrot.lane.b32.xlu0 %v904_v39, %s8504_s14  ;;  %v831_v17 = vrot.slane %v9048_v30, 3  ;;  %v832_v54 = vrot.slane %v9003_v3, 4  ;;  %v774_v7 = vrot.slane %v9020_v11, 1  ;;  %v775_v18 = vrot.slane %v9006_v4, 2 }
 0x3e0   :  { %807 = vrot.lane.b32.xlu1 %v799_v50, %s8504_s14  ;;  %v779_v21 = vrot.slane %v9048_v30, 1  ;;  %v780_v15 = vrot.slane %v9003_v3, 2  ;;  %v806_v22 = vsel %vm532_vm8, %v802_v10, %v805_v56  ;;  %v830_v23 = vor.u32 %v829_v6, %v828_v16  ;;  %v7792_v16 = vld [vmem:[%s11602_s4 + $0x78] sm:$0xff]  }
 0x3e1   :  { %v833_v25 = vor.u32 %v832_v54, %v831_v17  ;;  %v816_v27 = vsel %vm120_vm1, %v814_v9, %v815_v13  ;;  %v776_v28 = vor.u32 %v775_v18, %v774_v7  ;;  %v787_v35 = vrot.slane %v8996_v63, 2  ;;  %v7793_v56 = vld [vmem:[%s11602_s4 + $0x38] sm:$0xff]   ;;  %7609 = vmatprep.subr.bf16.mxu0 %v7792_v16  ;;  %v7796_v54 = vld [vmem:[%s11602_s4 + $0x70] sm:$0xff]   ;;  %v7821_v16 = vld [vmem:[%s11602_s4] sm:$0xff]  }
 0x3e2   :  { %v788_v36 = vrot.slane %v9000_v2, 2  ;;  %vm849_vm8 = vcmask 785408   ;;  %v790_v50 = vrot.slane %v8986_v60, 2  ;;  %v7794_v6 = vld [vmem:[%s11602_s4 + $0xf8] sm:$0xff]   ;;  %v7797_v7 = vld [vmem:[%s11602_s4 + $0x30] sm:$0xff]  }
 0x3e3   :  { %747 = vrot.lane.b32.xlu0 %v734_v62, %s8504_s14  ;;  %v834_v4 = vsel %vm562_vm6, %v830_v23, %v833_v25  ;;  %vm11621_vm6 = vcmask 1045504   ;;  %v7795_v17 = vld [vmem:[%s11602_s4 + $0xb8] sm:$0xff]   ;;  %7581 = vmatprep.subr.bf16.mxu1 %v7794_v6  ;;  %v7798_v18 = vld [vmem:[%s11602_s4 + $0xf0] sm:$0xff]   ;;  %v7802_v23 = vld [vmem:[%s11602_s4 + $0xe8] sm:$0xff]  }
 0x3e4   :  { %835 = vrot.lane.b32.xlu1 %v827_v8, %s8505_s3  ;;  %v789_v26 = vsel %vm11621_vm6, %v787_v35, %v788_v36  ;;  %vm11623_vm12 = vmmov %vm11621_vm6  ;;  %v7803_v25 = vld [vmem:[%s11602_s4 + $0xa8] sm:$0xff]   ;;  %v7815_v35 = vld [vmem:[%s11602_s4 + $0x90] sm:$0xff]  }
 0x3e5   :  { %v7816_v36 = vld [vmem:[%s11602_s4 + $0x48] sm:$0xff]   ;;  %vm11625_vm14 = vmmov %vm11621_vm6 }
 0x3e6   :  { %vm11626_vm15 = vmmov %vm11621_vm6 }
 0x3e7   :  { %912 = vrot.lane.b32.xlu0 %v759_v33, %s8503_s16  ;;  %v781_v33 = vor.u32 %v780_v15, %v779_v21  ;;  %v7799_v21 = vld [vmem:[%s11602_s4 + $0xb0] sm:$0xff]   ;;  %v7800_v15 = vld [vmem:[%s11602_s4 + $0x68] sm:$0xff]   ;;  %vm11627_vm2 = vmmov %vm11621_vm6 }
 0x3e8   :  { %783 = vrot.lane.b32.xlu1 %v773_v19, %s8505_s3  ;;  %vm11629_vm6 = vmmov %vm11622_vm11 }
 0x3e9   :  { %v782_v3 = vsel %vm498_vm9, %v776_v28, %v781_v33  ;;  %v7805_v28 = vld [vmem:[%s11602_s4 + $0x20] sm:$0xff]  }
 0x3ea   :  { %v7806_v33 = vld [vmem:[%s11602_s4 + $0xe0] sm:$0xff]  }
 0x3eb   :  { %809 = vrot.lane.b32.xlu0 %v806_v22, %s8504_s14  ;;  %v7801_v22 = vld [vmem:[%s11602_s4 + $0x28] sm:$0xff]  }
 0x3ec   :  { %819 = vrot.lane.b32.xlu1 %v816_v27, %s8503_s16  ;;  %v7804_v27 = vld [vmem:[%s11602_s4 + $0x60] sm:$0xff]  }
 0x3ef   :  { %837 = vrot.lane.b32.xlu0 %v834_v4, %s8505_s3  ;;  %v7807_v4 = vld [vmem:[%s11602_s4 + $0xa0] sm:$0xff]  }
 0x3f0   :  { %785 = vrot.lane.b32.xlu1 %v782_v3, %s8505_s3  ;;  %v7808_v3 = vld [vmem:[%s11602_s4 + $0x58] sm:$0xff]  }
 0x445   :  { %v764_v11 = vpop.permute.xlu0 %763 }
 0x446   :  { %v911_v29 = vpop.permute.xlu1 %910 }
 0x449   :  { %v762_v30 = vpop.permute.xlu0 %761 }
 0x44a   :  { %v818_v31 = vpop.permute.xlu1 %817 }
 0x44d   :  { %v909_v32 = vpop.permute.xlu0 %908 }
 0x44e   :  { %v750_v34 = vpop.permute.xlu1 %749  ;;  %v917_v48 = vsel %vm839_vm5, %v8990_v61, %v909_v32  ;;  %v7813_v32 = vld [vmem:[%s11602_s4 + $0x10] sm:$0xff]  }
 0x44f   :  { %v843_v42 = vsel %vm839_vm5, %v8986_v60, %v750_v34  ;;  %v7814_v34 = vld [vmem:[%s11602_s4 + $0xd0] sm:$0xff]  }
 0x450   :  { %v848_v46 = vsel %vm844_vm7, %v843_v42, %v764_v11  ;;  %v7809_v11 = vld [vmem:[%s11602_s4 + $0x18] sm:$0xff]  }
 0x451   :  { %v907_v12 = vpop.permute.xlu0 %906  ;;  %v929_v57 = vrot.slane %v848_v46, 4 }
 0x452   :  { %v915_v37 = vsel %vm839_vm5, %v9000_v2, %v907_v12  ;;  %v808_v38 = vpop.permute.xlu1 %807  ;;  %v7817_v12 = vld [vmem:[%s11602_s4 + $0x8] sm:$0xff]  }
 0x453   :  { %v858_v41 = vsel %vm839_vm5, %v789_v26, %v808_v38  ;;  %v919_v20 = vsel %vm844_vm7, %v915_v37, %v911_v29  ;;  %v7810_v29 = vld [vmem:[%s11602_s4 + $0xd8] sm:$0xff]  }
 0x454   :  { %v863_v24 = vsel %vm844_vm7, %v858_v41, %v818_v31  ;;  %v927_v40 = vrot.slane %v919_v20, 4  ;;  %v7812_v31 = vld [vmem:[%s11602_s4 + $0x50] sm:$0xff]  }
 0x455   :  { %v748_v43 = vpop.permute.xlu0 %747 }
 0x456   :  { %v841_v44 = vsel %vm839_vm5, %v8996_v63, %v748_v43  ;;  %v836_v45 = vpop.permute.xlu1 %835  ;;  %v791_v63 = vrot.slane %v8990_v61, 2 }
 0x457   :  { %v846_v2 = vsel %vm844_vm7, %v841_v44, %v762_v30  ;;  %v867_v39 = vsel %vm849_vm8, %v863_v24, %v836_v45  ;;  %v7811_v30 = vld [vmem:[%s11602_s4 + $0x98] sm:$0xff]   ;;  %v697_v44 = vld [vmem:[%s11599_s11 + $0x3] ss:$0 sm:$0xff] }
 0x458   :  { %v926_v47 = vrot.slane %v846_v2, 4  ;;  %1163 = vmatprep.mubr.bf16.mxu0 %v867_v39  ;;  %v792_v62 = vsel %vm11623_vm12, %v790_v50, %v791_v63  ;;  %vm11631_vm12 = vmmov %vm11629_vm6 }
 0x459   :  { %v913_v49 = vpop.permute.xlu0 %912 }
 0x45a   :  { %v921_v51 = vsel %vm844_vm7, %v917_v48, %v913_v49  ;;  %v784_v52 = vpop.permute.xlu1 %783  ;;  %v928_v53 = vsel %vm11622_vm11, %v926_v47, %v927_v40  ;;  %vm11630_vm11 = vmmov %vm11629_vm6 }
 0x45b   :  { %v930_v58 = vrot.slane %v921_v51, 4  ;;  %7727 = vmatprep.mubr.msk.bf16.mxu1 %vm849_vm8, %v928_v53  ;;  %v851_v59 = vsel %vm849_vm8, %v846_v2, %v784_v52 }
 0x45c   :  { %1164 = vmatmul.mubr.bf16.vlgmr.msra.gmra.mxu0 %v851_v59 }
 0x45d   :  { %v810_v14 = vpop.permute.xlu0 %809  ;;  %v931_v5 = vsel %vm11624_vm13, %v929_v57, %v930_v58  ;;  %7610 = vmatpush3.bf16.msra.mxu0 %v7793_v56  ;;  %vm11632_vm13 = vmmov %vm11629_vm6 }
 0x45e   :  { %v861_v60 = vsel %vm839_vm5, %v792_v62, %v810_v14  ;;  %v820_v61 = vpop.permute.xlu1 %819  ;;  %7728 = vmatmul.mubr.msk.bf16.vlgmr.msra.gmra.mxu1 %vm849_vm8, %v931_v5  ;;  %7611 = vmatprep.subr.bf16.mxu0 %v7796_v54  ;;  %v7822_v54 = vld [vmem:[%s11602_s4 + $0xc0] sm:$0xff]   ;;  %vm11628_vm5 = vmmov %vm11627_vm2 }
 0x45f   :  { %v865_v8 = vsel %vm844_vm7, %v861_v60, %v820_v61  ;;  %7582 = vmatpush3.bf16.msra.mxu1 %v7795_v17  ;;  %v7818_v61 = vld [vmem:[%s11602_s4 + $0xc8] sm:$0xff]  }
 0x460   :  { %7583 = vmatprep.subr.bf16.mxu1 %v7798_v18 }
 0x461   :  { %v838_v9 = vpop.permute.xlu0 %837  ;;  %7612 = vmatpush3.bf16.msra.mxu0 %v7797_v7 }
 0x462   :  { %v786_v19 = vpop.permute.xlu1 %785  ;;  %v870_v10 = vsel %vm849_vm8, %v865_v8, %v838_v9  ;;  %7613 = vmatprep.subr.bf16.mxu0 %v7800_v15  ;;  %v7819_v8 = vld [vmem:[%s11602_s4 + $0x88] sm:$0xff]   ;;  %v7820_v9 = vld [vmem:[%s11602_s4 + $0x40] sm:$0xff]  }
 0x463   :  { %1171 = vmatprep.mubr.bf16.mxu0 %v870_v10  ;;  %v854_v13 = vsel %vm849_vm8, %v848_v46, %v786_v19  ;;  %7584 = vmatpush3.bf16.msra.mxu1 %v7799_v21  ;;  %v7823_v15 = vld [vmem:[%s11602_s4 + $0x80] sm:$0xff]  }
 0x464   :  { %1172 = vmatmul.mubr.bf16.gmra.mxu0 %v854_v13  ;;  %7585 = vmatprep.subr.bf16.mxu1 %v7802_v23 }
 0x465   :  { %7614 = vmatpush3.bf16.msra.mxu0 %v7801_v22 }
 0x466   :  { %7615 = vmatprep.subr.bf16.mxu0 %v7804_v27 }
 0x467   :  { %7586 = vmatpush3.bf16.msra.mxu1 %v7803_v25 }
 0x468   :  { %7587 = vmatprep.subr.bf16.mxu1 %v7806_v33 }
 0x469   :  { %7616 = vmatpush3.bf16.msra.mxu0 %v7805_v28 }
 0x46a   :  { %7617 = vmatprep.subr.bf16.mxu0 %v7808_v3 }
 0x46b   :  { %7588 = vmatpush3.bf16.msra.mxu1 %v7807_v4 }
 0x46c   :  { %7589 = vmatprep.subr.bf16.mxu1 %v7810_v29 }
 0x46d   :  { %7618 = vmatpush3.bf16.msra.mxu0 %v7809_v11 }
 0x46e   :  { %7619 = vmatprep.subr.bf16.mxu0 %v7812_v31 }
 0x46f   :  { %7590 = vmatpush3.bf16.msra.mxu1 %v7811_v30 }
 0x470   :  { %7591 = vmatprep.subr.bf16.mxu1 %v7814_v34 }
 0x471   :  { %7620 = vmatpush3.bf16.msra.mxu0 %v7813_v32 }
 0x472   :  { %7621 = vmatprep.subr.bf16.mxu0 %v7816_v36 }
 0x473   :  { %7592 = vmatpush3.bf16.msra.mxu1 %v7815_v35 }
 0x474   :  { %7593 = vmatprep.subr.bf16.mxu1 %v7818_v61 }
 0x475   :  { %7622 = vmatpush3.bf16.msra.mxu0 %v7817_v12 }
 0x476   :  { %7623 = vmatprep.subr.bf16.mxu0 %v7820_v9 }
 0x477   :  { %7594 = vmatpush3.bf16.msra.mxu1 %v7819_v8 }
 0x478   :  { %7595 = vmatprep.subr.bf16.mxu1 %v7822_v54 }
 0x479   :  { %7624 = vmatpush3.bf16.msra.mxu0 %v7821_v16 }
 0x47b   :  { %7596 = vmatpush3.bf16.msra.mxu1 %v7823_v15 }
 0x51c   :  { %v7569_v37 = vpop.f32.mrf.mxu0 }
 0x51e   :  { %v7729_v26 = vpop.f32.mrf.mxu1  ;;  %v7570_v38 = vpop.f32.mrf.mxu0 }
 0x51f   :  { %v7571_v41 = vadd.f32 %v7570_v38, %v7569_v37 }
 0x520   :  { %v1020_v42 = vpop.f32.mrf.mxu1  ;;  %v7572_v20 = vpop.f32.mrf.mxu0 }
 0x521   :  { %v1166_v43 = vadd.f32 %v7571_v41, %v1020_v42 }
 0x522   :  { %v7730_v45 = vpop.f32.mrf.mxu1  ;;  %v7573_v24 = vpop.f32.mrf.mxu0 }
 0x523   :  { %v7574_v2 = vadd.f32 %v7573_v24, %v7572_v20  ;;  %v1180_v40 = vadd.f32 %v1166_v43, %v697_v44 }
 0x524   :  { %v1023_v39 = vpop.f32.mrf.mxu1  ;;  %v7575_v46 = vpop.f32.mrf.mxu0 }
 0x525   :  { %v1169_v47 = vadd.f32 %v7574_v2, %v1023_v39  ;;  %v1184_v51 = vmax.f32 %v1180_v40, 0.0 }
 0x526   :  { %v7576_v48 = vpop.f32.mrf.mxu0 }
 0x527   :  { %v1181_v49 = vadd.f32 %v1169_v47, %v697_v44  ;;  %v7577_v50 = vadd.f32 %v7576_v48, %v7575_v46 }
 0x528   :  { %v7578_v63 = vpop.f32.mrf.mxu0 }
 0x529   :  { %v1185_v52 = vmax.f32 %v1181_v49, 0.0  ;;  %v1174_v53 = vadd.f32 %v7729_v26, %v7577_v50  ;;  %v8506_v26 = vmov 0  }
 0x52a   :  { %v7579_v57 = vpop.f32.mrf.mxu0  ;;  %1801 = vmatprep.subr.bf16.mxu1 %v8506_v26 }
 0x52b   :  { %v1188_v58 = vpack.c.bf16 %v1185_v52, %v1184_v51  ;;  %v7580_v59 = vadd.f32 %v7579_v57, %v7578_v63  ;;  %v1182_v5 = vadd.f32 %v1174_v53, %v697_v44 }
 0x52d   :  { %v1192_v62 = vshrl.u32 %v1188_v58, 16  ;;  %v1195_v14 = vshll.u32 %v1188_v58, 16  ;;  %v1177_v60 = vadd.f32 %v7730_v45, %v7580_v59  ;;  %v1186_v6 = vmax.f32 %v1182_v5, 0.0 }
 0x52f   :  { %v1194_v19 = vrot.slane %v1192_v62, 5  ;;  %v1197_v10 = vrot.slane %v1195_v14, 6  ;;  %v1183_v13 = vadd.f32 %v1177_v60, %v697_v44 }
 0x531   :  { %v1198_v56 = vor.u32 %v1197_v10, %v1194_v19  ;;  %v1187_v17 = vmax.f32 %v1183_v13, 0.0 }
 0x533   :  { %v9233_v7 = vsel %vm8977_vm4, 0, %v1198_v56  ;;  %v1189_v18 = vpack.c.bf16 %v1187_v17, %v1186_v6  ;;  %v9237_v21 = vsel %vm8977_vm4, %v1198_v56, 0 }
 0x534   :  { %v1221_v22 = vshll.u32 %v9237_v21, 16  ;;  %v1254_v23 = vshrl.u32 %v9237_v21, 16  ;;  %v1214_v25 = vshrl.u32 %v9233_v7, 16  ;;  %v1216_v27 = vshll.u32 %v9233_v7, 16 }
 0x535   :  { %v1200_v28 = vshrl.u32 %v1189_v18, 16  ;;  %v1203_v33 = vshll.u32 %v1189_v18, 16  ;;  %v1246_v58 = vrot.slane %v9237_v21, 1  ;;  %v1245_v59 = vrot.slane %v9233_v7, 1 }
 0x536   :  { %v1256_v4 = vrot.slane %v1254_v23, 1  ;;  %v1257_v3 = vrot.slane %v1221_v22, 2  ;;  %v1251_v11 = vrot.slane %v1214_v25, 1  ;;  %v1252_v29 = vrot.slane %v1216_v27, 2 }
 0x537   :  { %v1202_v30 = vrot.slane %v1200_v28, 5  ;;  %v1205_v31 = vrot.slane %v1203_v33, 6  ;;  %v1223_v32 = vrot.slane %v1221_v22, 1  ;;  %v1218_v34 = vrot.slane %v1216_v27, 1 }
 0x538   :  { %v1258_v35 = vor.u32 %v1257_v3, %v1256_v4  ;;  %v1253_v36 = vor.u32 %v1252_v29, %v1251_v11  ;;  %v1247_v60 = vsel %vm74_vm3, %v1245_v59, %v1246_v58  ;;  %v7825_v4 = vld [vmem:[%s11602_s4 + $0x130] sm:$0xff]  }
 0x539   :  { %v1206_v12 = vor.u32 %v1205_v31, %v1202_v30  ;;  %v1219_v37 = vor.u32 %v1218_v34, %v1214_v25  ;;  %v1319_v41 = vor.u32 %v1254_v23, %v1223_v32  ;;  %v1688_v31 = vrot.slane %v1247_v60, 4  ;;  %v7841_v59 = vld [vmem:[%s11603_s5 + $0x174] ss:$8 sps:$4 sm:$0xff]  }
 0x53a   :  { %1325 = vrot.lane.b32.xlu1 %v1258_v35, %s8503_s16  ;;  %v1259_v38 = vsel %vm498_vm9, %v1253_v36, %v1258_v35  ;;  %v1689_v35 = vrot.slane %v1246_v58, 4  ;;  %2164 = vmatprep.subr.bf16.mxu0 %v7841_v59  ;;  %v7934_v59 = vld [vmem:[%s11603_s5 + $0x374] ss:$8 sps:$4 sm:$0xff]  }
 0x53b   :  { %1269 = vrot.lane.b32.xlu0 %v1259_v38, %s8503_s16  ;;  %v1212_v42 = vsel %vm8977_vm4, %v1206_v12, 0  ;;  %v9254_v20 = vsel %vm8977_vm4, 0, %v1206_v12  ;;  %v1224_v2 = vsel %vm458_vm0, %v1219_v37, %v1223_v32  ;;  %v7826_v12 = vld [vmem:[%s11602_s4 + $0x128] sm:$0xff]  }
 0x53c   :  { %v1233_v43 = vshll.u32 %v1212_v42, 16  ;;  %v1263_v44 = vshrl.u32 %v1212_v42, 16  ;;  %v1226_v45 = vshrl.u32 %v9254_v20, 16  ;;  %v1228_v24 = vshll.u32 %v9254_v20, 16 }
 0x53d   :  { %v9277_v56 = vrot.slane %v1212_v42, 1  ;;  %v1248_v6 = vrot.slane %v9254_v20, 1  ;;  %v1690_v38 = vsel %vm11629_vm6, %v1688_v31, %v1689_v35  ;;  %v7884_v31 = vld [vmem:[%s11603_s5 + $0xf0] ss:$8 sps:$4 sm:$0xff]   ;;  %v7890_v35 = vld [vmem:[%s11603_s5 + $0xe0] ss:$8 sps:$4 sm:$0xff]   ;;  %vm11635_vm6 = vmmov %vm11627_vm2 }
 0x53e   :  { %1321 = vrot.lane.b32.xlu1 %v1319_v41, %s8503_s16  ;;  %v1265_v39 = vrot.slane %v1263_v44, 1  ;;  %v1266_v46 = vrot.slane %v1233_v43, 2  ;;  %v1260_v40 = vrot.slane %v1226_v45, 1  ;;  %v1261_v47 = vrot.slane %v1228_v24, 2  ;;  %v7827_v41 = vld [vmem:[%s11602_s4 + $0x120] sm:$0xff]  }
 0x53f   :  { %1237 = vrot.lane.b32.xlu0 %v1224_v2, %s8503_s16  ;;  %v1230_v48 = vrot.slane %v1228_v24, 1  ;;  %v1235_v63 = vrot.slane %v1233_v43, 1  ;;  %v7830_v43 = vld [vmem:[%s11602_s4 + $0x108] sm:$0xff]   ;;  %v7833_v24 = vld [vmem:[%s11602_s4 + $0x150] sm:$0xff]  }
 0x540   :  { %v1267_v49 = vor.u32 %v1266_v46, %v1265_v39  ;;  %v1262_v50 = vor.u32 %v1261_v47, %v1260_v40  ;;  %v7834_v2 = vld [vmem:[%s11602_s4 + $0x148] sm:$0xff]   ;;  %v7835_v39 = vld [vmem:[%s11602_s4 + $0x140] sm:$0xff]  }
 0x541   :  { %v1231_v52 = vor.u32 %v1230_v48, %v1226_v45  ;;  %v1320_v53 = vor.u32 %v1263_v44, %v1235_v63  ;;  %v7831_v44 = vld [vmem:[%s11602_s4 + $0x100] sm:$0xff]   ;;  %v7832_v45 = vld [vmem:[%s11602_s4 + $0x158] sm:$0xff]   ;;  %v1695_v48 = vrot.slane %v9277_v56, 4 }
 0x542   :  { %1327 = vrot.lane.b32.xlu1 %v1267_v49, %s8503_s16  ;;  %v1268_v51 = vsel %vm498_vm9, %v1262_v50, %v1267_v49 }
 0x543   :  { %1271 = vrot.lane.b32.xlu0 %v1268_v51, %s8503_s16  ;;  %v1236_v57 = vsel %vm458_vm0, %v1231_v52, %v1235_v63 }
 0x546   :  { %1323 = vrot.lane.b32.xlu1 %v1320_v53, %s8503_s16  ;;  %v7836_v53 = vld [vmem:[%s11603_s5 + $0x70] ss:$8 sps:$4 sm:$0xff]  }
 0x547   :  { %1239 = vrot.lane.b32.xlu0 %v1236_v57, %s8503_s16  ;;  %v7838_v57 = vld [vmem:[%s11603_s5 + $0x74] ss:$8 sps:$4 sm:$0xff]  }
 0x5ac   :  { %v1326_v62 = vpop.permute.xlu1 %1325 }
 0x5ad   :  { %v1335_v14 = vsel %vm844_vm7, %v1246_v58, %v1326_v62  ;;  %v1270_v5 = vpop.permute.xlu0 %1269  ;;  %v7839_v58 = vld [vmem:[%s11603_s5 + $0x170] ss:$8 sps:$4 sm:$0xff]   ;;  %v7842_v62 = vld [vmem:[%s11603_s5 + $0x60] ss:$8 sps:$4 sm:$0xff]  }
 0x5ae   :  { %v1351_v61 = vrot.slane %v1335_v14, 2  ;;  %v1281_v8 = vsel %vm844_vm7, %v1247_v60, %v1270_v5  ;;  %v7844_v14 = vld [vmem:[%s11603_s5 + $0x64] ss:$8 sps:$4 sm:$0xff]   ;;  %v7845_v5 = vld [vmem:[%s11603_s5 + $0x160] ss:$8 sps:$4 sm:$0xff]  }
 0x5af   :  { %v1350_v9 = vrot.slane %v1281_v8, 2  ;;  %1668 = vmatprep.mubr.bf16.mxu0 %v1281_v8  ;;  %v7847_v60 = vld [vmem:[%s11603_s5 + $0x164] ss:$8 sps:$4 sm:$0xff]   ;;  %v7848_v8 = vld [vmem:[%s11603_s5 + $0x50] ss:$8 sps:$4 sm:$0xff]  }
 0x5b0   :  { %v1322_v19 = vpop.permute.xlu1 %1321 }
 0x5b1   :  { %v9274_v10 = vsel %vm844_vm7, %v9237_v21, %v1322_v19  ;;  %v1238_v13 = vpop.permute.xlu0 %1237  ;;  %v1352_v16 = vsel %vm11625_vm14, %v1350_v9, %v1351_v61  ;;  %v7824_v21 = vld [vmem:[%s11602_s4 + $0x138] sm:$0xff]   ;;  %vm3490_vm14 = vcmask 1040384  }
 0x5b2   :  { %v1348_v17 = vrot.slane %v9274_v10, 2  ;;  %v9283_v54 = vsel %vm844_vm7, %v9233_v7, %v1238_v13  ;;  %1523 = vmatprep.mubr.bf16.mxu1 %v1352_v16  ;;  %v9295_v7 = vsel %vm74_vm3, %v1248_v6, %v9277_v56  ;;  %v1686_v46 = vrot.slane %v9274_v10, 4  ;;  %v7850_v61 = vld [vmem:[%s11603_s5 + $0x54] ss:$8 sps:$4 sm:$0xff]   ;;  %v7851_v19 = vld [vmem:[%s11603_s5 + $0x150] ss:$8 sps:$4 sm:$0xff]  }
 0x5b3   :  { %v1347_v18 = vrot.slane %v9283_v54, 2  ;;  %1669 = vmatmul.mubr.bf16.vlgmr.msra.gmra.mxu0 %v9283_v54  ;;  %v1685_v40 = vrot.slane %v9283_v54, 4  ;;  %v1694_v47 = vrot.slane %v9295_v7, 4  ;;  %v7853_v9 = vld [vmem:[%s11603_s5 + $0x154] ss:$8 sps:$4 sm:$0xff]  }
 0x5b4   :  { %v1328_v15 = vpop.permute.xlu1 %1327  ;;  %2165 = vmatpush1.bf16.msra.mxu0 %v7839_v58  ;;  %v7856_v10 = vld [vmem:[%s11603_s5 + $0x44] ss:$8 sps:$4 sm:$0xff]   ;;  %v7854_v16 = vld [vmem:[%s11603_s5 + $0x40] ss:$8 sps:$4 sm:$0xff]   ;;  %v7862_v6 = vld [vmem:[%s11603_s5 + $0x34] ss:$8 sps:$4 sm:$0xff]  }
 0x5b5   :  { %v1338_v22 = vsel %vm844_vm7, %v9277_v56, %v1328_v15  ;;  %v1272_v23 = vpop.permute.xlu0 %1271  ;;  %v1349_v25 = vsel %vm11626_vm15, %v1347_v18, %v1348_v17  ;;  %v1687_v49 = vsel %vm11630_vm11, %v1685_v40, %v1686_v46  ;;  %v1696_v50 = vsel %vm11631_vm12, %v1694_v47, %v1695_v48  ;;  %2166 = vmatprep.subr.bf16.mxu0 %v7847_v60  ;;  %v7859_v13 = vld [vmem:[%s11603_s5 + $0x144] ss:$8 sps:$4 sm:$0xff]   ;;  %v7857_v56 = vld [vmem:[%s11603_s5 + $0x140] ss:$8 sps:$4 sm:$0xff]   ;;  %v7865_v17 = vld [vmem:[%s11603_s5 + $0x134] ss:$8 sps:$4 sm:$0xff]  }
 0x5b6   :  { %v1357_v27 = vrot.slane %v1338_v22, 2  ;;  %1524 = vmatmul.mubr.bf16.vlgmr.msra.gmra.mxu1 %v1349_v25  ;;  %v1285_v28 = vsel %vm844_vm7, %v9295_v7, %v1272_v23  ;;  %v7860_v54 = vld [vmem:[%s11603_s5 + $0x30] ss:$8 sps:$4 sm:$0xff]   ;;  %v7871_v15 = vld [vmem:[%s11603_s5 + $0x124] ss:$8 sps:$4 sm:$0xff]   ;;  %vm11633_vm15 = vmmov %vm11627_vm2 }
 0x5b7   :  { %1802 = vmatpush1.bf16.msra.mxu1 %v7824_v21  ;;  %v1356_v33 = vrot.slane %v1285_v28, 2  ;;  %1676 = vmatprep.mubr.bf16.mxu0 %v1285_v28  ;;  %v7863_v18 = vld [vmem:[%s11603_s5 + $0x130] ss:$8 sps:$4 sm:$0xff]   ;;  %v7868_v21 = vld [vmem:[%s11603_s5 + $0x24] ss:$8 sps:$4 sm:$0xff]   ;;  %vm11638_vm12 = vmmov %vm11630_vm11 }
 0x5b8   :  { %v1324_v3 = vpop.permute.xlu1 %1323  ;;  %1803 = vmatprep.subr.bf16.mxu1 %v8506_v26  ;;  %2167 = vmatpush1.bf16.msra.mxu0 %v7845_v5  ;;  %v7866_v22 = vld [vmem:[%s11603_s5 + $0x20] ss:$8 sps:$4 sm:$0xff]   ;;  %v7874_v25 = vld [vmem:[%s11603_s5 + $0x14] ss:$8 sps:$4 sm:$0xff]   ;;  %v7875_v28 = vld [vmem:[%s11603_s5 + $0x110] ss:$8 sps:$4 sm:$0xff]  }
 0x5b9   :  { %v1332_v11 = vsel %vm844_vm7, %v1212_v42, %v1324_v3  ;;  %v1240_v29 = vpop.permute.xlu0 %1239  ;;  %v1358_v30 = vsel %vm11627_vm2, %v1356_v33, %v1357_v27  ;;  %v7828_v42 = vld [vmem:[%s11602_s4 + $0x118] sm:$0xff]   ;;  %2168 = vmatprep.subr.bf16.mxu0 %v7853_v9  ;;  %v7869_v23 = vld [vmem:[%s11603_s5 + $0x120] ss:$8 sps:$4 sm:$0xff]   ;;  %v7880_v33 = vld [vmem:[%s11603_s5 + $0x4] ss:$8 sps:$4 sm:$0xff]  }
 0x5ba   :  { %v1354_v32 = vrot.slane %v1332_v11, 2  ;;  %1531 = vmatprep.mubr.bf16.mxu1 %v1358_v30  ;;  %v1277_v34 = vsel %vm844_vm7, %v9254_v20, %v1240_v29  ;;  %v7829_v20 = vld [vmem:[%s11602_s4 + $0x110] sm:$0xff]   ;;  %v1692_v63 = vrot.slane %v1332_v11, 4  ;;  %v7878_v3 = vld [vmem:[%s11603_s5] ss:$8 sps:$4 sm:$0xff]  }
 0x5bb   :  { %1804 = vmatpush1.bf16.msra.mxu1 %v7825_v4  ;;  %v1353_v36 = vrot.slane %v1277_v34, 2  ;;  %1677 = vmatmul.mubr.bf16.gmra.mxu0 %v1277_v34  ;;  %v1691_v51 = vrot.slane %v1277_v34, 4  ;;  %v7877_v7 = vld [vmem:[%s11603_s5 + $0x114] ss:$8 sps:$4 sm:$0xff]   ;;  %v7872_v27 = vld [vmem:[%s11603_s5 + $0x10] ss:$8 sps:$4 sm:$0xff]  }
 0x5bc   :  { %1805 = vmatprep.subr.bf16.mxu1 %v8506_v26  ;;  %2169 = vmatpush1.bf16.msra.mxu0 %v7851_v19  ;;  %v7883_v4 = vld [vmem:[%s11603_s5 + $0x104] ss:$8 sps:$4 sm:$0xff]   ;;  %v7881_v11 = vld [vmem:[%s11603_s5 + $0x100] ss:$8 sps:$4 sm:$0xff]   ;;  %v7886_v29 = vld [vmem:[%s11603_s5 + $0xf4] ss:$8 sps:$4 sm:$0xff]  }
 0x5bd   :  { %v1355_v37 = vsel %vm11628_vm5, %v1353_v36, %v1354_v32  ;;  %v1693_v52 = vsel %vm11632_vm13, %v1691_v51, %v1692_v63  ;;  %2170 = vmatprep.subr.bf16.mxu0 %v7859_v13  ;;  %v7889_v30 = vld [vmem:[%s11603_s5 + $0x1f4] ss:$8 sps:$4 sm:$0xff]   ;;  %v7887_v32 = vld [vmem:[%s11603_s5 + $0x1f0] ss:$8 sps:$4 sm:$0xff]   ;;  %v7892_v34 = vld [vmem:[%s11603_s5 + $0xe4] ss:$8 sps:$4 sm:$0xff]  }
 0x5be   :  { %1532 = vmatmul.mubr.bf16.gmra.mxu1 %v1355_v37  ;;  %v7893_v36 = vld [vmem:[%s11603_s5 + $0x1e0] ss:$8 sps:$4 sm:$0xff]   ;;  %v7896_v37 = vld [vmem:[%s11603_s5 + $0xd0] ss:$8 sps:$4 sm:$0xff]   ;;  %v7913_v46 = vld [vmem:[%s11603_s5 + $0x1b4] ss:$8 sps:$4 sm:$0xff]  }
 0x5bf   :  { %1806 = vmatpush1.bf16.msra.mxu1 %v7826_v12  ;;  %7055 = vmatprep.mubr.msk.bf16.mxu1 %vm844_vm7, %v1690_v38  ;;  %v7895_v12 = vld [vmem:[%s11603_s5 + $0x1e4] ss:$8 sps:$4 sm:$0xff]   ;;  %v7898_v38 = vld [vmem:[%s11603_s5 + $0xd4] ss:$8 sps:$4 sm:$0xff]   ;;  %v7914_v40 = vld [vmem:[%s11603_s5 + $0xa0] ss:$8 sps:$4 sm:$0xff]  }
 0x5c0   :  { %1807 = vmatprep.subr.bf16.mxu1 %v8506_v26  ;;  %2171 = vmatpush1.bf16.msra.mxu0 %v7857_v56  ;;  %v7916_v47 = vld [vmem:[%s11603_s5 + $0xa4] ss:$8 sps:$4 sm:$0xff]   ;;  %v7920_v63 = vld [vmem:[%s11603_s5 + $0x90] ss:$8 sps:$4 sm:$0xff]   ;;  %v7925_v51 = vld [vmem:[%s11603_s5 + $0x194] ss:$8 sps:$4 sm:$0xff]  }
 0x5c1   :  { %2172 = vmatprep.subr.bf16.mxu0 %v7865_v17  ;;  %v7919_v48 = vld [vmem:[%s11603_s5 + $0x1a4] ss:$8 sps:$4 sm:$0xff]   ;;  %vm11634_vm5 = vmmov %vm11627_vm2 }
 0x5c2   :  { %v7931_v58 = vld [vmem:[%s11603_s5 + $0x184] ss:$8 sps:$4 sm:$0xff]   ;;  %vm11639_vm13 = vmmov %vm11627_vm2 }
 0x5c3   :  { %1808 = vmatpush1.bf16.msra.mxu1 %v7827_v41  ;;  %v7899_v41 = vld [vmem:[%s11603_s5 + $0x1d0] ss:$8 sps:$4 sm:$0xff]   ;;  %v3473_v5 = vld [vmem:[%s11604_s1] sm:$0xff]  ;;  %v3474_v60 = vld [vmem:[%s11604_s1 + $0x8] sm:$0xff] }
 0x5c4   :  { %1809 = vmatprep.subr.bf16.mxu1 %v8506_v26  ;;  %2173 = vmatpush1.bf16.msra.mxu0 %v7863_v18  ;;  %v3482_v9 = vpack.c.bf16 %v3474_v60, %v3473_v5 }
 0x5c5   :  { %2174 = vmatprep.subr.bf16.mxu0 %v7871_v15 }
 0x5c7   :  { %1810 = vmatpush1.bf16.msra.mxu1 %v7828_v42  ;;  %v7901_v42 = vld [vmem:[%s11603_s5 + $0x1d4] ss:$8 sps:$4 sm:$0xff]  }
 0x5c8   :  { %1811 = vmatprep.subr.bf16.mxu1 %v8506_v26  ;;  %2175 = vmatpush1.bf16.msra.mxu0 %v7869_v23 }
 0x5c9   :  { %2176 = vmatprep.subr.bf16.mxu0 %v7877_v7 }
 0x5cb   :  { %1812 = vmatpush1.bf16.msra.mxu1 %v7829_v20  ;;  %v7902_v20 = vld [vmem:[%s11603_s5 + $0xc0] ss:$8 sps:$4 sm:$0xff]  }
 0x5cc   :  { %1813 = vmatprep.subr.bf16.mxu1 %v8506_v26  ;;  %2177 = vmatpush1.bf16.msra.mxu0 %v7875_v28 }
 0x5cd   :  { %2178 = vmatprep.subr.bf16.mxu0 %v7883_v4 }
 0x5cf   :  { %1814 = vmatpush1.bf16.msra.mxu1 %v7830_v43  ;;  %v7904_v43 = vld [vmem:[%s11603_s5 + $0xc4] ss:$8 sps:$4 sm:$0xff]  }
 0x5d0   :  { %1815 = vmatprep.subr.bf16.mxu1 %v8506_v26  ;;  %2179 = vmatpush1.bf16.msra.mxu0 %v7881_v11 }
 0x5d1   :  { %2180 = vmatprep.subr.bf16.mxu0 %v7889_v30 }
 0x5d3   :  { %1816 = vmatpush1.bf16.msra.mxu1 %v7831_v44  ;;  %v7905_v44 = vld [vmem:[%s11603_s5 + $0x1c0] ss:$8 sps:$4 sm:$0xff]  }
 0x5d4   :  { %1825 = vmatprep.subr.bf16.mxu1 %v8506_v26  ;;  %2181 = vmatpush2.bf16.msra.mxu0 %v7887_v32 }
 0x5d5   :  { %2182 = vmatprep.subr.bf16.mxu0 %v7895_v12 }
 0x5d7   :  { %1826 = vmatpush2.bf16.msra.mxu1 %v7832_v45  ;;  %v7907_v45 = vld [vmem:[%s11603_s5 + $0x1c4] ss:$8 sps:$4 sm:$0xff]  }
 0x5d8   :  { %1827 = vmatprep.subr.bf16.mxu1 %v8506_v26  ;;  %2183 = vmatpush2.bf16.msra.mxu0 %v7893_v36 }
 0x5d9   :  { %2184 = vmatprep.subr.bf16.mxu0 %v7901_v42 }
 0x5db   :  { %1828 = vmatpush2.bf16.msra.mxu1 %v7833_v24  ;;  %v7908_v24 = vld [vmem:[%s11603_s5 + $0xb0] ss:$8 sps:$4 sm:$0xff]  }
 0x5dc   :  { %1829 = vmatprep.subr.bf16.mxu1 %v8506_v26  ;;  %2185 = vmatpush2.bf16.msra.mxu0 %v7899_v41 }
 0x5dd   :  { %2186 = vmatprep.subr.bf16.mxu0 %v7907_v45 }
 0x5df   :  { %1830 = vmatpush2.bf16.msra.mxu1 %v7834_v2  ;;  %v7910_v2 = vld [vmem:[%s11603_s5 + $0xb4] ss:$8 sps:$4 sm:$0xff]  }
 0x5e0   :  { %1831 = vmatprep.subr.bf16.mxu1 %v8506_v26  ;;  %2187 = vmatpush2.bf16.msra.mxu0 %v7905_v44 }
 0x5e1   :  { %2188 = vmatprep.subr.bf16.mxu0 %v7913_v46  ;;  %v3478_v46 = vld [vmem:[%s11604_s1 + $0x28] sm:$0xff] }
 0x5e3   :  { %1832 = vmatpush2.bf16.msra.mxu1 %v7835_v39  ;;  %v7911_v39 = vld [vmem:[%s11603_s5 + $0x1b0] ss:$8 sps:$4 sm:$0xff]  }
 0x5e4   :  { %2377 = vmatprep.subr.bf16.mxu1 %v7838_v57  ;;  %2189 = vmatpush2.bf16.msra.mxu0 %v7911_v39  ;;  %v7926_v57 = vld [vmem:[%s11603_s5 + $0x80] ss:$8 sps:$4 sm:$0xff]  }
 0x5e5   :  { %2190 = vmatprep.subr.bf16.mxu0 %v7919_v48  ;;  %v3477_v39 = vld [vmem:[%s11604_s1 + $0x20] sm:$0xff] }
 0x5e6   :  { %1834 = vmatmul.mubr.bf16.vlgmr.msra.gmra.mxu1 %v1687_v49  ;;  %v7922_v49 = vld [vmem:[%s11603_s5 + $0x94] ss:$8 sps:$4 sm:$0xff]   ;;  %v3484_v48 = vpack.c.bf16 %v3478_v46, %v3477_v39 }
 0x5e7   :  { %7056 = vmatprep.mubr.msk.bf16.mxu1 %vm844_vm7, %v1696_v50  ;;  %2378 = vmatpush1.bf16.msra.mxu1 %v7836_v53  ;;  %v7917_v50 = vld [vmem:[%s11603_s5 + $0x1a0] ss:$8 sps:$4 sm:$0xff]   ;;  %v7923_v53 = vld [vmem:[%s11603_s5 + $0x190] ss:$8 sps:$4 sm:$0xff]  }
 0x5e8   :  { %2379 = vmatprep.subr.bf16.mxu1 %v7844_v14  ;;  %2191 = vmatpush2.bf16.msra.mxu0 %v7917_v50  ;;  %v7937_v14 = vld [vmem:[%s11603_s5 + $0x274] ss:$8 sps:$4 sm:$0xff]  }
 0x5e9   :  { %2192 = vmatprep.subr.bf16.mxu0 %v7925_v51 }
 0x5eb   :  { %2380 = vmatpush1.bf16.msra.mxu1 %v7842_v62  ;;  %v7929_v62 = vld [vmem:[%s11603_s5 + $0x180] ss:$8 sps:$4 sm:$0xff]  }
 0x5ec   :  { %2381 = vmatprep.subr.bf16.mxu1 %v7850_v61  ;;  %2193 = vmatpush2.bf16.msra.mxu0 %v7923_v53  ;;  %v3475_v61 = vld [vmem:[%s11604_s1 + $0x10] sm:$0xff] }
 0x5ed   :  { %2194 = vmatprep.subr.bf16.mxu0 %v7931_v58 }
 0x5ee   :  { %1842 = vmatmul.mubr.bf16.gmra.mxu1 %v1693_v52  ;;  %v7928_v52 = vld [vmem:[%s11603_s5 + $0x84] ss:$8 sps:$4 sm:$0xff]  }
 0x5ef   :  { %2382 = vmatpush1.bf16.msra.mxu1 %v7848_v8  ;;  %v3476_v8 = vld [vmem:[%s11604_s1 + $0x18] sm:$0xff] }
 0x5f0   :  { %2383 = vmatprep.subr.bf16.mxu1 %v7856_v10  ;;  %2195 = vmatpush2.bf16.msra.mxu0 %v7929_v62  ;;  %v3483_v19 = vpack.c.bf16 %v3476_v8, %v3475_v61  ;;  %v3491_v10 = vrot.slane %v3482_v9, 7 }
 0x5f1   :  { %2638 = vmatprep.subr.bf16.mxu0 %v7937_v14 }
 0x5f2   :  { %v3492_v13 = vrot.slane %v3483_v19, 7 }
 0x5f3   :  { %2384 = vmatpush1.bf16.msra.mxu1 %v7854_v16  ;;  %v9569_v16 = vsel %vm3490_vm14, 0, %v3491_v10 }
 0x5f4   :  { %2385 = vmatprep.subr.bf16.mxu1 %v7862_v6  ;;  %v9572_v56 = vsel %vm3490_vm14, %v3491_v10, %v3492_v13  ;;  %v3554_v6 = vrot.slane %v9569_v16, 1  ;;  %v3506_v17 = vshrl.u32 %v9569_v16, 16  ;;  %v3606_v7 = vrot.slane %v9569_v16, 2 }
 0x5f5   :  { %v3555_v18 = vrot.slane %v9572_v56, 1  ;;  %v3517_v15 = vshrl.u32 %v9572_v56, 16  ;;  %v3503_v30 = vsel %vm3490_vm14, %v3492_v13, 0 }
 0x5f6   :  { %v3557_v32 = vrot.slane %v3503_v30, 1 }
 0x5f7   :  { %2386 = vmatpush1.bf16.msra.mxu1 %v7860_v54  ;;  %v3508_v54 = vshll.u32 %v9569_v16, 16  ;;  %v3575_v28 = vrot.slane %v3517_v15, 1 }
 0x5f8   :  { %2387 = vmatprep.subr.bf16.mxu1 %v7868_v21  ;;  %v3513_v21 = vshll.u32 %v9572_v56, 16  ;;  %v3558_v42 = vsel %vm74_vm3, %v3555_v18, %v3557_v32 }
 0x5f9   :  { %v3573_v23 = vrot.slane %v3508_v54, 2 }
 0x5fa   :  { %v3515_v4 = vrot.slane %v3513_v21, 1 }
 0x5fb   :  { %2388 = vmatpush1.bf16.msra.mxu1 %v7866_v22  ;;  %v3572_v22 = vrot.slane %v3506_v17, 1 }
 0x5fc   :  { %2389 = vmatprep.subr.bf16.mxu1 %v7874_v25  ;;  %v3510_v25 = vrot.slane %v3508_v54, 1 }
 0x5fe   :  { %v3511_v11 = vor.u32 %v3510_v25, %v3506_v17 }
 0x5ff   :  { %2390 = vmatpush1.bf16.msra.mxu1 %v7872_v27  ;;  %v3556_v27 = vsel %vm74_vm3, %v3554_v6, %v3555_v18 }
 0x600   :  { %2391 = vmatprep.subr.bf16.mxu1 %v7880_v33  ;;  %v3576_v33 = vrot.slane %v3513_v21, 2  ;;  %3564 = vrot.lane.b32.xlu0 %v3556_v27, %s8491_s29  ;;  %v3516_v36 = vsel %vm458_vm0, %v3511_v11, %v3515_v4 }
 0x603   :  { %2392 = vmatpush1.bf16.msra.mxu1 %v7878_v3  ;;  %v3574_v3 = vor.u32 %v3573_v23, %v3572_v22 }
 0x604   :  { %2393 = vmatprep.subr.bf16.mxu1 %v7886_v29  ;;  %v3607_v29 = vrot.slane %v9572_v56, 2  ;;  %3542 = vrot.lane.b32.xlu0 %v3516_v36, %s8492_s30 }
 0x606   :  { %v3608_v41 = vsel %vm11633_vm15, %v3606_v7, %v3607_v29  ;;  %vm11642_vm15 = vmmov %vm11627_vm2 }
 0x607   :  { %2394 = vmatpush2.bf16.msra.mxu1 %v7884_v31  ;;  %v3577_v31 = vor.u32 %v3576_v33, %v3575_v28 }
 0x608   :  { %2395 = vmatprep.subr.bf16.mxu1 %v7892_v34  ;;  %v3520_v34 = vshll.u32 %v3503_v30, 16  ;;  %3566 = vrot.lane.b32.xlu0 %v3558_v42, %s8491_s29 }
 0x609   :  { %v3578_v12 = vsel %vm498_vm9, %v3574_v3, %v3577_v31 }
 0x60a   :  { %3598 = vrot.lane.b32.xlu1 %v3578_v12, %s8490_s0  ;;  %v3522_v44 = vrot.slane %v3520_v34, 1 }
 0x60b   :  { %2396 = vmatpush2.bf16.msra.mxu1 %v7890_v35  ;;  %v3579_v35 = vshrl.u32 %v3503_v30, 16 }
 0x60c   :  { %2397 = vmatprep.subr.bf16.mxu1 %v7898_v38  ;;  %v3582_v38 = vrot.slane %v3520_v34, 2 }
 0x60e   :  { %3616 = vrot.lane.b32.xlu1 %v3608_v41, %s8493_s13 }
 0x60f   :  { %2398 = vmatpush2.bf16.msra.mxu1 %v7896_v37  ;;  %v3581_v37 = vrot.slane %v3579_v35, 1 }
 0x610   :  { %2399 = vmatprep.subr.bf16.mxu1 %v7904_v43  ;;  %v3519_v43 = vor.u32 %v3517_v15, %v3515_v4 }
 0x613   :  { %2400 = vmatpush2.bf16.msra.mxu1 %v7902_v20  ;;  %v3583_v20 = vor.u32 %v3582_v38, %v3581_v37 }
 0x614   :  { %2401 = vmatprep.subr.bf16.mxu1 %v7910_v2  ;;  %v3609_v2 = vrot.slane %v3503_v30, 2 }
 0x615   :  { %v3584_v45 = vsel %vm498_vm9, %v3577_v31, %v3583_v20 }
 0x616   :  { %3600 = vrot.lane.b32.xlu1 %v3584_v45, %s8490_s0  ;;  %v3610_v50 = vsel %vm11627_vm2, %v3607_v29, %v3609_v2 }
 0x617   :  { %2402 = vmatpush2.bf16.msra.mxu1 %v7908_v24  ;;  %v3523_v24 = vsel %vm458_vm0, %v3519_v43, %v3522_v44 }
 0x618   :  { %2403 = vmatprep.subr.bf16.mxu1 %v7916_v47  ;;  %v3480_v47 = vld [vmem:[%s11604_s1 + $0x38] sm:$0xff]  ;;  %3544 = vrot.lane.b32.xlu0 %v3523_v24, %s8492_s30 }
 0x61a   :  { %3618 = vrot.lane.b32.xlu1 %v3610_v50, %s8493_s13 }
 0x61b   :  { %2404 = vmatpush2.bf16.msra.mxu1 %v7914_v40  ;;  %v3479_v40 = vld [vmem:[%s11604_s1 + $0x30] sm:$0xff] }
 0x61c   :  { %2405 = vmatprep.subr.bf16.mxu1 %v7922_v49  ;;  %v3485_v49 = vpack.c.bf16 %v3480_v47, %v3479_v40 }
 0x61e   :  { %v3495_v51 = vrot.slane %v3485_v49, 7 }
 0x61f   :  { %2406 = vmatpush2.bf16.msra.mxu1 %v7920_v63  ;;  %v3494_v63 = vrot.slane %v3484_v48, 7 }
 0x620   :  { %2407 = vmatprep.subr.bf16.mxu1 %v7928_v52  ;;  %v3505_v21 = vsel %vm3490_vm14, %v3495_v51, 0 }
 0x621   :  { %v9611_v52 = vsel %vm3490_vm14, 0, %v3494_v63  ;;  %v9615_v53 = vsel %vm3490_vm14, %v3494_v63, %v3495_v51  ;;  %v3538_v22 = vshll.u32 %v3505_v21, 16  ;;  %v3592_v23 = vshrl.u32 %v3505_v21, 16 }
 0x622   :  { %v3526_v58 = vshll.u32 %v9611_v52, 16  ;;  %v3535_v62 = vshrl.u32 %v9615_v53, 16  ;;  %v3559_v14 = vrot.slane %v9611_v52, 1  ;;  %v3560_v61 = vrot.slane %v9615_v53, 1 }
 0x623   :  { %2408 = vmatpush2.bf16.msra.mxu1 %v7926_v57  ;;  %v3524_v57 = vshrl.u32 %v9611_v52, 16  ;;  %v3611_v13 = vrot.slane %v9611_v52, 2  ;;  %v3612_v54 = vrot.slane %v9615_v53, 2  ;;  %v3562_v27 = vrot.slane %v3505_v21, 1 }
 0x624   :  { %2907 = vmatprep.subr.bf16.mxu1 %v7934_v59  ;;  %v3531_v59 = vshll.u32 %v9615_v53, 16  ;;  %v3586_v60 = vrot.slane %v3526_v58, 2  ;;  %v3588_v8 = vrot.slane %v3535_v62, 1  ;;  %v3561_v10 = vsel %vm74_vm3, %v3559_v14, %v3560_v61 }
 0x625   :  { %v3585_v5 = vrot.slane %v3524_v57, 1  ;;  %v3528_v6 = vrot.slane %v3526_v58, 1  ;;  %3568 = vrot.lane.b32.xlu0 %v3561_v10, %s8491_s29  ;;  %v3594_v33 = vrot.slane %v3592_v23, 1  ;;  %v3595_v4 = vrot.slane %v3538_v22, 2  ;;  %v1190_v58 = vld [vmem:[%s11599_s11 + $0x4] ss:$0 sm:$0xff] }
 0x626   :  { %v3589_v9 = vrot.slane %v3531_v59, 2  ;;  %v3533_v18 = vrot.slane %v3531_v59, 1  ;;  %v3613_v3 = vsel %vm11634_vm5, %v3611_v13, %v3612_v54  ;;  %v3563_v29 = vsel %vm74_vm3, %v3560_v61, %v3562_v27 }
 0x627   :  { %v3587_v19 = vor.u32 %v3586_v60, %v3585_v5  ;;  %v3529_v15 = vor.u32 %v3528_v6, %v3524_v57  ;;  %v3596_v11 = vor.u32 %v3595_v4, %v3594_v33  ;;  %v3540_v31 = vrot.slane %v3538_v22, 1 }
 0x628   :  { %v3590_v17 = vor.u32 %v3589_v9, %v3588_v8  ;;  %v3537_v30 = vor.u32 %v3535_v62, %v3533_v18  ;;  %v3614_v35 = vrot.slane %v3505_v21, 2  ;;  %vm11644_vm5 = vcmask 588800  }
 0x629   :  { %v3534_v28 = vsel %vm458_vm0, %v3529_v15, %v3533_v18 }
 0x62a   :  { %v3591_v7 = vsel %vm498_vm9, %v3587_v19, %v3590_v17  ;;  %3546 = vrot.lane.b32.xlu0 %v3534_v28, %s8492_s30  ;;  %v3597_v34 = vsel %vm498_vm9, %v3590_v17, %v3596_v11  ;;  %v3541_v36 = vsel %vm458_vm0, %v3537_v30, %v3540_v31  ;;  %v3615_v38 = vsel %vm11635_vm6, %v3612_v54, %v3614_v35  ;;  %vm11636_vm9 = vmmov %vm11627_vm2 }
 0x62b   :  { %3602 = vrot.lane.b32.xlu1 %v3591_v7, %s8490_s0  ;;  %vm11645_vm6 = vcmask 998400  }
 0x62e   :  { %3570 = vrot.lane.b32.xlu0 %v3563_v29, %s8491_s29 }
 0x62f   :  { %3620 = vrot.lane.b32.xlu1 %v3613_v3, %s8493_s13 }
 0x632   :  { %3548 = vrot.lane.b32.xlu0 %v3541_v36, %s8492_s30 }
 0x633   :  { %3604 = vrot.lane.b32.xlu1 %v3597_v34, %s8490_s0 }
 0x637   :  { %3622 = vrot.lane.b32.xlu1 %v3615_v38, %s8493_s13 }
 0x673   :  { %v7625_v12 = vpop.f32.mrf.mxu0 }
 0x675   :  { %v7626_v41 = vpop.f32.mrf.mxu0 }
 0x676   :  { %v7597_v25 = vpop.f32.mrf.mxu1  ;;  %v7627_v46 = vadd.f32 %v7626_v41, %v7625_v12 }
 0x677   :  { %v7628_v20 = vpop.f32.mrf.mxu0 }
 0x678   :  { %v7598_v32 = vpop.f32.mrf.mxu1 }
 0x679   :  { %v7629_v44 = vpop.f32.mrf.mxu0  ;;  %v7599_v39 = vadd.f32 %v7598_v32, %v7597_v25 }
 0x67a   :  { %v7600_v37 = vpop.f32.mrf.mxu1  ;;  %v7630_v63 = vadd.f32 %v7629_v44, %v7628_v20 }
 0x67b   :  { %v7631_v24 = vpop.f32.mrf.mxu0  ;;  %v1671_v49 = vadd.f32 %v7627_v46, %v7599_v39 }
 0x67c   :  { %v7601_v42 = vpop.f32.mrf.mxu1 }
 0x67d   :  { %v7632_v40 = vpop.f32.mrf.mxu0  ;;  %v7602_v48 = vadd.f32 %v7601_v42, %v7600_v37 }
 0x67e   :  { %v7603_v43 = vpop.f32.mrf.mxu1  ;;  %v7633_v60 = vadd.f32 %v7632_v40, %v7631_v24 }
 0x67f   :  { %v7634_v57 = vpop.f32.mrf.mxu0  ;;  %v1674_v14 = vadd.f32 %v7630_v63, %v7602_v48 }
 0x680   :  { %v7604_v45 = vpop.f32.mrf.mxu1 }
 0x681   :  { %v7605_v62 = vadd.f32 %v7604_v45, %v7603_v43  ;;  %v7635_v9 = vpop.f32.mrf.mxu0 }
 0x682   :  { %v7606_v2 = vpop.f32.mrf.mxu1  ;;  %v7636_v54 = vadd.f32 %v7635_v9, %v7634_v57 }
 0x683   :  { %v1679_v6 = vadd.f32 %v7633_v60, %v7605_v62 }
 0x684   :  { %v7607_v47 = vpop.f32.mrf.mxu1 }
 0x685   :  { %v7608_v10 = vadd.f32 %v7607_v47, %v7606_v2 }
 0x687   :  { %v1682_v25 = vadd.f32 %v7636_v54, %v7608_v10  ;;  %v7943_v54 = vld [vmem:[%s11603_s5 + $0x264] ss:$8 sps:$4 sm:$0xff]  }
 0x6a6   :  { %v1835_v50 = vpop.f32.mrf.mxu1 }
 0x6a7   :  { %v1850_v51 = vadd.f32 %v1835_v50, %v1671_v49 }
 0x6a8   :  { %v1837_v59 = vpop.f32.mrf.mxu1 }
 0x6a9   :  { %v1854_v61 = vadd.f32 %v1850_v51, %v1190_v58  ;;  %v7932_v51 = vld [vmem:[%s11603_s5 + $0x370] ss:$8 sps:$4 sm:$0xff]   ;;  %v7940_v59 = vld [vmem:[%s11603_s5 + $0x364] ss:$8 sps:$4 sm:$0xff]  }
 0x6aa   :  { %v1838_v5 = vpop.f32.mrf.mxu1 }
 0x6ab   :  { %v1851_v8 = vadd.f32 %v1838_v5, %v1674_v14  ;;  %v1858_v18 = vmax.f32 %v1854_v61, 0.0 }
 0x6ac   :  { %v1840_v19 = vpop.f32.mrf.mxu1 }
 0x6ad   :  { %v1855_v13 = vadd.f32 %v1851_v8, %v1190_v58  ;;  %v7935_v8 = vld [vmem:[%s11603_s5 + $0x270] ss:$8 sps:$4 sm:$0xff]   ;;  %v7938_v19 = vld [vmem:[%s11603_s5 + $0x360] ss:$8 sps:$4 sm:$0xff]  }
 0x6ae   :  { %v1843_v17 = vpop.f32.mrf.mxu1 }
 0x6af   :  { %v1859_v21 = vmax.f32 %v1855_v13, 0.0  ;;  %v1852_v15 = vadd.f32 %v1843_v17, %v1679_v6 }
 0x6b0   :  { %v1845_v22 = vpop.f32.mrf.mxu1 }
 0x6b1   :  { %v1862_v23 = vpack.c.bf16 %v1859_v21, %v1858_v18  ;;  %v1856_v33 = vadd.f32 %v1852_v15, %v1190_v58  ;;  %v7941_v22 = vld [vmem:[%s11603_s5 + $0x260] ss:$8 sps:$4 sm:$0xff]  }
 0x6b2   :  { %v1846_v7 = vpop.f32.mrf.mxu1 }
 0x6b3   :  { %v1867_v27 = vshrl.u32 %v1862_v23, 16  ;;  %v1870_v28 = vshll.u32 %v1862_v23, 16  ;;  %v1853_v4 = vadd.f32 %v1846_v7, %v1682_v25  ;;  %v1860_v32 = vmax.f32 %v1856_v33, 0.0  ;;  %v7944_v33 = vld [vmem:[%s11603_s5 + $0x350] ss:$8 sps:$4 sm:$0xff]  }
 0x6b4   :  { %v1848_v3 = vpop.f32.mrf.mxu1 }
 0x6b5   :  { %v1869_v11 = vrot.slane %v1867_v27, 5  ;;  %v1872_v29 = vrot.slane %v1870_v28, 6  ;;  %v1857_v30 = vadd.f32 %v1853_v4, %v1190_v58  ;;  %v7946_v27 = vld [vmem:[%s11603_s5 + $0x354] ss:$8 sps:$4 sm:$0xff]  }
 0x6b7   :  { %v1873_v31 = vor.u32 %v1872_v29, %v1869_v11  ;;  %v1861_v34 = vmax.f32 %v1857_v30, 0.0 }
 0x6b9   :  { %v9647_v35 = vsel %vm8977_vm4, 0, %v1873_v31  ;;  %v9651_v36 = vsel %vm8977_vm4, %v1873_v31, 0  ;;  %v1863_v12 = vpack.c.bf16 %v1861_v34, %v1860_v32  ;;  %v7949_v32 = vld [vmem:[%s11603_s5 + $0x254] ss:$8 sps:$4 sm:$0xff]  }
 0x6ba   :  { %v1891_v37 = vshll.u32 %v9647_v35, 16  ;;  %v1896_v38 = vshll.u32 %v9651_v36, 16  ;;  %v1889_v20 = vshrl.u32 %v9647_v35, 16  ;;  %v1946_v43 = vshrl.u32 %v9651_v36, 16 }
 0x6bb   :  { %v1875_v41 = vshrl.u32 %v1863_v12, 16  ;;  %v1878_v42 = vshll.u32 %v1863_v12, 16  ;;  %v2699_v24 = vrot.slane %v9647_v35, 3  ;;  %v2700_v2 = vrot.slane %v9651_v36, 3 }
 0x6bc   :  { %v1893_v44 = vrot.slane %v1891_v37, 1  ;;  %v1898_v45 = vrot.slane %v1896_v38, 1  ;;  %v1956_v40 = vrot.slane %v9647_v35, 1  ;;  %v1957_v47 = vrot.slane %v9651_v36, 1  ;;  %v7952_v37 = vld [vmem:[%s11603_s5 + $0x344] ss:$8 sps:$4 sm:$0xff]  }
 0x6bd   :  { %v1877_v39 = vrot.slane %v1875_v41, 5  ;;  %v1880_v46 = vrot.slane %v1878_v42, 6  ;;  %v9664_v50 = vsel %vm120_vm1, %v2699_v24, %v2700_v2  ;;  %v2430_v62 = vrot.slane %v9647_v35, 2 }
 0x6be   :  { %v1894_v48 = vor.u32 %v1893_v44, %v1889_v20  ;;  %v9661_v49 = vor.u32 %v1946_v43, %v1898_v45  ;;  %v2431_v14 = vrot.slane %v9651_v36, 2  ;;  %v1958_v9 = vsel %vm74_vm3, %v1956_v40, %v1957_v47  ;;  %v7950_v40 = vld [vmem:[%s11603_s5 + $0x340] ss:$8 sps:$4 sm:$0xff]  }
 0x6bf   :  { %v1881_v63 = vor.u32 %v1880_v46, %v1877_v39  ;;  %v3237_v13 = vrot.slane %v9647_v35, 5  ;;  %v3238_v6 = vrot.slane %v9651_v36, 5  ;;  %v2968_v2 = vrot.slane %v9647_v35, 4 }
 0x6c0   :  { %v9670_v57 = vsel %vm458_vm0, %v1894_v48, %v1898_v45  ;;  %v1960_v58 = vrot.slane %v9661_v49, 1  ;;  %v2703_v15 = vrot.slane %v9661_v49, 3  ;;  %v9715_v28 = vsel %vm11636_vm9, %v2430_v62, %v2431_v14  ;;  %v7947_v45 = vld [vmem:[%s11603_s5 + $0x250] ss:$8 sps:$4 sm:$0xff]   ;;  %v7955_v48 = vld [vmem:[%s11603_s5 + $0x244] ss:$8 sps:$4 sm:$0xff]  }
 0x6c1   :  { %v9680_v5 = vsel %vm8977_vm4, 0, %v1881_v63  ;;  %v9684_v60 = vsel %vm8977_vm4, %v1881_v63, 0  ;;  %2409 = vmatprep.mubr.bf16.mxu1 %v9670_v57  ;;  %v1959_v61 = vrot.slane %v9670_v57, 1  ;;  %v2702_v21 = vrot.slane %v9670_v57, 3  ;;  %vm11637_vm4 = vmmov %vm11627_vm2 }
 0x6c2   :  { %2410 = vmatmul.mubr.bf16.vlgmr.msra.gmra.mxu1 %v9647_v35  ;;  %v1903_v55 = vshll.u32 %v9680_v5, 16  ;;  %v1908_v10 = vshll.u32 %v9684_v60, 16  ;;  %v1901_v18 = vshrl.u32 %v9680_v5, 16  ;;  %v1949_v7 = vshrl.u32 %v9684_v60, 16  ;;  %v7958_v35 = vld [vmem:[%s11603_s5 + $0x334] ss:$8 sps:$4 sm:$0xff]  }
 0x6c3   :  { %2908 = vmatpush1.bf16.msra.mxu1 %v7932_v51  ;;  %v1961_v17 = vsel %vm74_vm3, %v1959_v61, %v1960_v58  ;;  %v1962_v4 = vrot.slane %v9680_v5, 1  ;;  %v2705_v3 = vrot.slane %v9680_v5, 3  ;;  %v2706_v11 = vrot.slane %v9684_v60, 3  ;;  %v7953_v61 = vld [vmem:[%s11603_s5 + $0x240] ss:$8 sps:$4 sm:$0xff]  }
 0x6c4   :  { %2196 = vmatprep.mubr.bf16.mxu0 %v1961_v17  ;;  %2909 = vmatprep.subr.bf16.mxu1 %v7940_v59  ;;  %v1905_v23 = vrot.slane %v1903_v55, 1  ;;  %v1910_v25 = vrot.slane %v1908_v10, 1  ;;  %v2436_v29 = vrot.slane %v9680_v5, 2  ;;  %v1963_v34 = vrot.slane %v9684_v60, 1 }
 0x6c5   :  { %2197 = vmatmul.mubr.bf16.vlgmr.msra.gmra.mxu0 %v1958_v9  ;;  %v2437_v12 = vrot.slane %v9684_v60, 2  ;;  %v9735_v38 = vsel %vm120_vm1, %v2705_v3, %v2706_v11  ;;  %v2971_v41 = vrot.slane %v9670_v57, 4  ;;  %v2972_v42 = vrot.slane %v9661_v49, 4  ;;  %v7982_v3 = vld [vmem:[%s11603_s5 + $0x3f4] ss:$8 sps:$4 sm:$0xff]  }
 0x6c6   :  { %2639 = vmatpush1.bf16.msra.mxu0 %v7935_v8  ;;  %v1906_v30 = vor.u32 %v1905_v23, %v1901_v18  ;;  %v9724_v31 = vor.u32 %v1949_v7, %v1910_v25  ;;  %v9740_v20 = vsel %vm236_vm10, %v3237_v13, %v3238_v6  ;;  %v2434_v24 = vrot.slane %v9661_v49, 2  ;;  %v7956_v13 = vld [vmem:[%s11603_s5 + $0x330] ss:$8 sps:$4 sm:$0xff]   ;;  %v7962_v18 = vld [vmem:[%s11603_s5 + $0x320] ss:$8 sps:$4 sm:$0xff]  }
 0x6c7   :  { %2910 = vmatpush1.bf16.msra.mxu1 %v7938_v19  ;;  %2640 = vmatprep.subr.bf16.mxu0 %v7943_v54  ;;  %v2704_v39 = vsel %vm120_vm1, %v2702_v21, %v2703_v15  ;;  %v2433_v47 = vrot.slane %v9670_v57, 2  ;;  %v9762_v49 = vsel %vm11637_vm4, %v2436_v29, %v2437_v12  ;;  %v9769_v63 = vsel %vm11630_vm11, %v2971_v41, %v2972_v42  ;;  %v7964_v54 = vld [vmem:[%s11603_s5 + $0x324] ss:$8 sps:$4 sm:$0xff]   ;;  %v7970_v15 = vld [vmem:[%s11603_s5 + $0x314] ss:$8 sps:$4 sm:$0xff]  }
 0x6c8   :  { %v9743_v43 = vsel %vm458_vm0, %v1906_v30, %v1910_v25  ;;  %2911 = vmatprep.subr.bf16.mxu1 %v7946_v27  ;;  %v1966_v44 = vrot.slane %v9724_v31, 1  ;;  %v3240_v51 = vrot.slane %v9680_v5, 5  ;;  %v3241_v57 = vrot.slane %v9684_v60, 5  ;;  %v7967_v21 = vld [vmem:[%s11603_s5 + $0x224] ss:$8 sps:$4 sm:$0xff]  }
 0x6c9   :  { %2419 = vmatprep.mubr.bf16.mxu1 %v9743_v43  ;;  %v1965_v46 = vrot.slane %v9743_v43, 1  ;;  %v2969_v58 = vrot.slane %v9651_v36, 4  ;;  %v1964_v62 = vsel %vm74_vm3, %v1962_v4, %v1963_v34  ;;  %v2977_v14 = vrot.slane %v9743_v43, 4  ;;  %v7968_v23 = vld [vmem:[%s11603_s5 + $0x310] ss:$8 sps:$4 sm:$0xff]  }
 0x6ca   :  { %2641 = vmatpush1.bf16.msra.mxu0 %v7941_v22  ;;  %2420 = vmatmul.mubr.bf16.gmra.mxu1 %v9680_v5  ;;  %v9781_v8 = vsel %vm236_vm10, %v3240_v51, %v3241_v57  ;;  %v2978_v36 = vrot.slane %v9724_v31, 4  ;;  %v2974_v19 = vrot.slane %v9680_v5, 4  ;;  %v2435_v55 = vsel %vm11639_vm13, %v2433_v47, %v2434_v24  ;;  %vm11640_vm10 = vmmov %vm11630_vm11  ;;  %v7961_v5 = vld [vmem:[%s11603_s5 + $0x234] ss:$8 sps:$4 sm:$0xff]   ;;  %v7965_v22 = vld [vmem:[%s11603_s5 + $0x220] ss:$8 sps:$4 sm:$0xff]  }
 0x6cb   :  { %2912 = vmatpush1.bf16.msra.mxu1 %v7944_v33  ;;  %2939 = vmatprep.mubr.bf16.mxu1 %v2704_v39  ;;  %v1967_v59 = vsel %vm74_vm3, %v1965_v46, %v1966_v44  ;;  %v9784_v9 = vsel %vm11638_vm12, %v2968_v2, %v2969_v58  ;;  %v2975_v10 = vrot.slane %v9684_v60, 4  ;;  %vm11641_vm14 = vmmov %vm11640_vm10  ;;  %v7959_v60 = vld [vmem:[%s11603_s5 + $0x230] ss:$8 sps:$4 sm:$0xff]   ;;  %v7973_v25 = vld [vmem:[%s11603_s5 + $0x214] ss:$8 sps:$4 sm:$0xff]   ;;  %vm11643_vm2 = vcmask 179200  }
 0x6cc   :  { %2206 = vmatprep.mubr.bf16.mxu0 %v1967_v59  ;;  %2642 = vmatprep.subr.bf16.mxu0 %v7949_v32  ;;  %v9794_v6 = vsel %vm11640_vm10, %v2977_v14, %v2978_v36  ;;  %v7976_v7 = vld [vmem:[%s11603_s5 + $0x304] ss:$8 sps:$4 sm:$0xff]   ;;  %v7971_v27 = vld [vmem:[%s11603_s5 + $0x210] ss:$8 sps:$4 sm:$0xff]   ;;  %v7974_v33 = vld [vmem:[%s11603_s5 + $0x300] ss:$8 sps:$4 sm:$0xff]  }
 0x6cd   :  { %2207 = vmatmul.mubr.bf16.gmra.mxu0 %v1964_v62  ;;  %2913 = vmatprep.subr.bf16.mxu1 %v7952_v37  ;;  %v9800_v17 = vsel %vm11641_vm14, %v2974_v19, %v2975_v10  ;;  %v7979_v4 = vld [vmem:[%s11603_s5 + $0x204] ss:$8 sps:$4 sm:$0xff]   ;;  %v7977_v11 = vld [vmem:[%s11603_s5 + $0x200] ss:$8 sps:$4 sm:$0xff]   ;;  %v7980_v29 = vld [vmem:[%s11603_s5 + $0x3f0] ss:$8 sps:$4 sm:$0xff]  }
 0x6ce   :  { %2643 = vmatpush1.bf16.msra.mxu0 %v7947_v45  ;;  %2670 = vmatprep.mubr.bf16.mxu0 %v2435_v55  ;;  %v7985_v30 = vld [vmem:[%s11603_s5 + $0x2f4] ss:$8 sps:$4 sm:$0xff]   ;;  %v7988_v32 = vld [vmem:[%s11603_s5 + $0x3e4] ss:$8 sps:$4 sm:$0xff]   ;;  %v7983_v34 = vld [vmem:[%s11603_s5 + $0x2f0] ss:$8 sps:$4 sm:$0xff]  }
 0x6cf   :  { %2914 = vmatpush1.bf16.msra.mxu1 %v7950_v40  ;;  %2644 = vmatprep.subr.bf16.mxu0 %v7955_v48  ;;  %v7986_v12 = vld [vmem:[%s11603_s5 + $0x3e0] ss:$8 sps:$4 sm:$0xff]   ;;  %v7991_v37 = vld [vmem:[%s11603_s5 + $0x2e4] ss:$8 sps:$4 sm:$0xff]   ;;  %v7994_v41 = vld [vmem:[%s11603_s5 + $0x3d4] ss:$8 sps:$4 sm:$0xff]  }
 0x6d0   :  { %2915 = vmatprep.subr.bf16.mxu1 %v7958_v35  ;;  %v7989_v42 = vld [vmem:[%s11603_s5 + $0x2e0] ss:$8 sps:$4 sm:$0xff]   ;;  %v7992_v44 = vld [vmem:[%s11603_s5 + $0x3d0] ss:$8 sps:$4 sm:$0xff]   ;;  %v7997_v45 = vld [vmem:[%s11603_s5 + $0x2d4] ss:$8 sps:$4 sm:$0xff]  }
 0x6d1   :  { %v8000_v24 = vld [vmem:[%s11603_s5 + $0x3c4] ss:$8 sps:$4 sm:$0xff]   ;;  %v7995_v2 = vld [vmem:[%s11603_s5 + $0x2d0] ss:$8 sps:$4 sm:$0xff]   ;;  %v7998_v39 = vld [vmem:[%s11603_s5 + $0x3c0] ss:$8 sps:$4 sm:$0xff]  }
 0x6d2   :  { %2645 = vmatpush1.bf16.msra.mxu0 %v7953_v61  ;;  %v8003_v46 = vld [vmem:[%s11603_s5 + $0x2c4] ss:$8 sps:$4 sm:$0xff]   ;;  %v8006_v40 = vld [vmem:[%s11603_s5 + $0x3b4] ss:$8 sps:$4 sm:$0xff]   ;;  %v8001_v47 = vld [vmem:[%s11603_s5 + $0x2c0] ss:$8 sps:$4 sm:$0xff]  }
 0x6d3   :  { %2916 = vmatpush1.bf16.msra.mxu1 %v7956_v13  ;;  %2646 = vmatprep.subr.bf16.mxu0 %v7961_v5  ;;  %v8004_v48 = vld [vmem:[%s11603_s5 + $0x3b0] ss:$8 sps:$4 sm:$0xff]   ;;  %v8009_v35 = vld [vmem:[%s11603_s5 + $0x2b4] ss:$8 sps:$4 sm:$0xff]   ;;  %v8012_v51 = vld [vmem:[%s11603_s5 + $0x3a4] ss:$8 sps:$4 sm:$0xff]  }
 0x6d4   :  { %2917 = vmatprep.subr.bf16.mxu1 %v7964_v54  ;;  %v8007_v57 = vld [vmem:[%s11603_s5 + $0x2b0] ss:$8 sps:$4 sm:$0xff]   ;;  %v8010_v58 = vld [vmem:[%s11603_s5 + $0x3a0] ss:$8 sps:$4 sm:$0xff]   ;;  %v8015_v59 = vld [vmem:[%s11603_s5 + $0x2a4] ss:$8 sps:$4 sm:$0xff]  }
 0x6d5   :  { %v8018_v62 = vld [vmem:[%s11603_s5 + $0x394] ss:$8 sps:$4 sm:$0xff]   ;;  %v8013_v14 = vld [vmem:[%s11603_s5 + $0x2a0] ss:$8 sps:$4 sm:$0xff]   ;;  %v8016_v61 = vld [vmem:[%s11603_s5 + $0x390] ss:$8 sps:$4 sm:$0xff]  }
 0x6d6   :  { %2647 = vmatpush1.bf16.msra.mxu0 %v7959_v60  ;;  %v8021_v36 = vld [vmem:[%s11603_s5 + $0x294] ss:$8 sps:$4 sm:$0xff]   ;;  %v8024_v19 = vld [vmem:[%s11603_s5 + $0x384] ss:$8 sps:$4 sm:$0xff]   ;;  %v8019_v55 = vld [vmem:[%s11603_s5 + $0x290] ss:$8 sps:$4 sm:$0xff]  }
 0x6d7   :  { %2918 = vmatpush1.bf16.msra.mxu1 %v7962_v18  ;;  %2648 = vmatprep.subr.bf16.mxu0 %v7967_v21  ;;  %v8022_v10 = vld [vmem:[%s11603_s5 + $0x380] ss:$8 sps:$4 sm:$0xff]   ;;  %v8027_v13 = vld [vmem:[%s11603_s5 + $0x284] ss:$8 sps:$4 sm:$0xff]   ;;  %v8030_v5 = vld [vmem:[%s11603_s5 + $0x574] ss:$8 sps:$4 sm:$0xff]  }
 0x6d8   :  { %2919 = vmatprep.subr.bf16.mxu1 %v7970_v15  ;;  %v8025_v60 = vld [vmem:[%s11603_s5 + $0x280] ss:$8 sps:$4 sm:$0xff]   ;;  %v2708_v54 = vrot.slane %v9743_v43, 3  ;;  %v2709_v18 = vrot.slane %v9724_v31, 3  ;;  %v8028_v21 = vld [vmem:[%s11603_s5 + $0x570] ss:$8 sps:$4 sm:$0xff]   ;;  %vm11646_vm9 = vmmov %vm11643_vm2 }
 0x6d9   :  { %v8033_v15 = vld [vmem:[%s11603_s5 + $0x474] ss:$8 sps:$4 sm:$0xff]   ;;  %vm11647_vm4 = vcmask 408576   ;;  %vm11648_vm11 = vmmov %vm11644_vm5  ;;  %vm11649_vm12 = vcmask 818176  }
 0x6da   :  { %2649 = vmatpush1.bf16.msra.mxu0 %v7965_v22  ;;  %v8036_v22 = vld [vmem:[%s11603_s5 + $0x564] ss:$8 sps:$4 sm:$0xff]   ;;  %vm11650_vm13 = vmmov %vm11645_vm6 }
 0x6db   :  { %2920 = vmatpush1.bf16.msra.mxu1 %v7968_v23  ;;  %2650 = vmatprep.subr.bf16.mxu0 %v7973_v25  ;;  %v2439_v23 = vrot.slane %v9743_v43, 2  ;;  %v2440_v25 = vrot.slane %v9724_v31, 2  ;;  %v8039_v43 = vld [vmem:[%s11603_s5 + $0x464] ss:$8 sps:$4 sm:$0xff]   ;;  %vm11651_vm10 = vmmov %vm11643_vm2 }
 0x6dc   :  { %2921 = vmatprep.subr.bf16.mxu1 %v7976_v7  ;;  %v2710_v7 = vsel %vm120_vm1, %v2708_v54, %v2709_v18  ;;  %v8101_v54 = vld [vmem:[%s11605_s6 + $0x38] sm:$0xff]   ;;  %v3599_v18 = vpop.permute.xlu1 %3598  ;;  %vm11652_vm14 = vmmov %vm11647_vm4 }
 0x6dd   :  { %v2441_v31 = vsel %vm11642_vm15, %v2439_v23, %v2440_v25  ;;  %v3565_v23 = vpop.permute.xlu0 %3564  ;;  %vm11653_vm15 = vmmov %vm11644_vm5 }
 0x6de   :  { %2651 = vmatpush1.bf16.msra.mxu0 %v7971_v27  ;;  %v8031_v27 = vld [vmem:[%s11603_s5 + $0x470] ss:$8 sps:$4 sm:$0xff]   ;;  %v3645_v25 = vsel %vm11643_vm2, %v3565_v23, %v3599_v18  ;;  %vm11654_vm2 = vmmov %vm11649_vm12 }
 0x6df   :  { %2922 = vmatpush1.bf16.msra.mxu1 %v7974_v33  ;;  %2652 = vmatprep.subr.bf16.mxu0 %v7979_v4  ;;  %v8034_v33 = vld [vmem:[%s11603_s5 + $0x560] ss:$8 sps:$4 sm:$0xff]  }
 0x6e0   :  { %2923 = vmatprep.subr.bf16.mxu1 %v7982_v3  ;;  %v8037_v4 = vld [vmem:[%s11603_s5 + $0x460] ss:$8 sps:$4 sm:$0xff]   ;;  %v8040_v3 = vld [vmem:[%s11603_s5 + $0x550] ss:$8 sps:$4 sm:$0xff]  }
 0x6e2   :  { %2653 = vmatpush1.bf16.msra.mxu0 %v7977_v11  ;;  %v8045_v11 = vld [vmem:[%s11603_s5 + $0x454] ss:$8 sps:$4 sm:$0xff]  }
 0x6e3   :  { %2924 = vmatpush2.bf16.msra.mxu1 %v7980_v29  ;;  %2654 = vmatprep.subr.bf16.mxu0 %v7985_v30  ;;  %v8043_v29 = vld [vmem:[%s11603_s5 + $0x450] ss:$8 sps:$4 sm:$0xff]   ;;  %v8046_v30 = vld [vmem:[%s11603_s5 + $0x540] ss:$8 sps:$4 sm:$0xff]  }
 0x6e4   :  { %2925 = vmatprep.subr.bf16.mxu1 %v7988_v32  ;;  %v8051_v32 = vld [vmem:[%s11603_s5 + $0x444] ss:$8 sps:$4 sm:$0xff]  }
 0x6e6   :  { %2655 = vmatpush2.bf16.msra.mxu0 %v7983_v34  ;;  %v8049_v34 = vld [vmem:[%s11603_s5 + $0x440] ss:$8 sps:$4 sm:$0xff]  }
 0x6e7   :  { %2926 = vmatpush2.bf16.msra.mxu1 %v7986_v12  ;;  %2656 = vmatprep.subr.bf16.mxu0 %v7991_v37  ;;  %v8052_v12 = vld [vmem:[%s11603_s5 + $0x530] ss:$8 sps:$4 sm:$0xff]   ;;  %v8057_v37 = vld [vmem:[%s11603_s5 + $0x434] ss:$8 sps:$4 sm:$0xff]  }
 0x6e8   :  { %2927 = vmatprep.subr.bf16.mxu1 %v7994_v41  ;;  %v8058_v41 = vld [vmem:[%s11603_s5 + $0x520] ss:$8 sps:$4 sm:$0xff]  }
 0x6ea   :  { %2657 = vmatpush2.bf16.msra.mxu0 %v7989_v42  ;;  %v8063_v42 = vld [vmem:[%s11603_s5 + $0x424] ss:$8 sps:$4 sm:$0xff]  }
 0x6eb   :  { %2928 = vmatpush2.bf16.msra.mxu1 %v7992_v44  ;;  %2658 = vmatprep.subr.bf16.mxu0 %v7997_v45  ;;  %v8066_v44 = vld [vmem:[%s11603_s5 + $0x514] ss:$8 sps:$4 sm:$0xff]   ;;  %v8061_v45 = vld [vmem:[%s11603_s5 + $0x420] ss:$8 sps:$4 sm:$0xff]  }
 0x6ec   :  { %2929 = vmatprep.subr.bf16.mxu1 %v8000_v24  ;;  %v8064_v24 = vld [vmem:[%s11603_s5 + $0x510] ss:$8 sps:$4 sm:$0xff]  }
 0x6ee   :  { %2659 = vmatpush2.bf16.msra.mxu0 %v7995_v2  ;;  %v8069_v2 = vld [vmem:[%s11603_s5 + $0x414] ss:$8 sps:$4 sm:$0xff]  }
 0x6ef   :  { %2930 = vmatpush2.bf16.msra.mxu1 %v7998_v39  ;;  %2660 = vmatprep.subr.bf16.mxu0 %v8003_v46  ;;  %v8072_v39 = vld [vmem:[%s11603_s5 + $0x504] ss:$8 sps:$4 sm:$0xff]   ;;  %v8067_v46 = vld [vmem:[%s11603_s5 + $0x410] ss:$8 sps:$4 sm:$0xff]  }
 0x6f0   :  { %2931 = vmatprep.subr.bf16.mxu1 %v8006_v40  ;;  %v8070_v40 = vld [vmem:[%s11603_s5 + $0x500] ss:$8 sps:$4 sm:$0xff]  }
 0x6f2   :  { %2661 = vmatpush2.bf16.msra.mxu0 %v8001_v47  ;;  %v8075_v47 = vld [vmem:[%s11603_s5 + $0x404] ss:$8 sps:$4 sm:$0xff]  }
 0x6f3   :  { %2932 = vmatpush2.bf16.msra.mxu1 %v8004_v48  ;;  %2662 = vmatprep.subr.bf16.mxu0 %v8009_v35  ;;  %v8073_v48 = vld [vmem:[%s11603_s5 + $0x400] ss:$8 sps:$4 sm:$0xff]   ;;  %v8078_v35 = vld [vmem:[%s11603_s5 + $0x4f4] ss:$8 sps:$4 sm:$0xff]  }
 0x6f4   :  { %2933 = vmatprep.subr.bf16.mxu1 %v8012_v51  ;;  %v8076_v51 = vld [vmem:[%s11603_s5 + $0x4f0] ss:$8 sps:$4 sm:$0xff]  }
 0x6f6   :  { %2663 = vmatpush2.bf16.msra.mxu0 %v8007_v57  ;;  %v8081_v57 = vld [vmem:[%s11603_s5 + $0x4e4] ss:$8 sps:$4 sm:$0xff]  }
 0x6f7   :  { %2934 = vmatpush2.bf16.msra.mxu1 %v8010_v58  ;;  %2664 = vmatprep.subr.bf16.mxu0 %v8015_v59  ;;  %v8079_v58 = vld [vmem:[%s11603_s5 + $0x4e0] ss:$8 sps:$4 sm:$0xff]   ;;  %v8082_v59 = vld [vmem:[%s11603_s5 + $0x4d0] ss:$8 sps:$4 sm:$0xff]  }
 0x6f8   :  { %2935 = vmatprep.subr.bf16.mxu1 %v8018_v62  ;;  %v8087_v62 = vld [vmem:[%s11603_s5 + $0x4c4] ss:$8 sps:$4 sm:$0xff]  }
 0x6fa   :  { %2665 = vmatpush2.bf16.msra.mxu0 %v8013_v14  ;;  %v8085_v14 = vld [vmem:[%s11603_s5 + $0x4c0] ss:$8 sps:$4 sm:$0xff]  }
 0x6fb   :  { %2936 = vmatpush2.bf16.msra.mxu1 %v8016_v61  ;;  %2666 = vmatprep.subr.bf16.mxu0 %v8021_v36  ;;  %v8090_v61 = vld [vmem:[%s11603_s5 + $0x4b4] ss:$8 sps:$4 sm:$0xff]   ;;  %v8093_v36 = vld [vmem:[%s11603_s5 + $0x4a4] ss:$8 sps:$4 sm:$0xff]  }
 0x6fc   :  { %2937 = vmatprep.subr.bf16.mxu1 %v8024_v19  ;;  %v8091_v19 = vld [vmem:[%s11603_s5 + $0x4a0] ss:$8 sps:$4 sm:$0xff]  }
 0x6fe   :  { %2667 = vmatpush2.bf16.msra.mxu0 %v8019_v55  ;;  %v8096_v55 = vld [vmem:[%s11603_s5 + $0x494] ss:$8 sps:$4 sm:$0xff]  }
 0x6ff   :  { %2938 = vmatpush2.bf16.msra.mxu1 %v8022_v10  ;;  %2668 = vmatprep.subr.bf16.mxu0 %v8027_v13  ;;  %v8094_v10 = vld [vmem:[%s11603_s5 + $0x490] ss:$8 sps:$4 sm:$0xff]   ;;  %v8099_v13 = vld [vmem:[%s11603_s5 + $0x484] ss:$8 sps:$4 sm:$0xff]  }
 0x700   :  { %3341 = vmatprep.subr.bf16.mxu1 %v8030_v5  ;;  %v8097_v5 = vld [vmem:[%s11603_s5 + $0x480] ss:$8 sps:$4 sm:$0xff]  }
 0x702   :  { %2669 = vmatpush2.bf16.msra.mxu0 %v8025_v60  ;;  %2940 = vmatmul.mubr.bf16.vlgmr.msra.gmra.mxu1 %v9664_v50  ;;  %v8042_v50 = vld [vmem:[%s11603_s5 + $0x554] ss:$8 sps:$4 sm:$0xff]  }
 0x703   :  { %2949 = vmatprep.mubr.bf16.mxu1 %v2710_v7  ;;  %3342 = vmatpush1.bf16.msra.mxu1 %v8028_v21  ;;  %v8100_v60 = vld [vmem:[%s11605_s6 + $0x78] sm:$0x1f]   ;;  %v8102_v21 = vld [vmem:[%s11605_s6 + $0x70] sm:$0xff]   ;;  %v3617_v7 = vpop.permute.xlu1 %3616 }
 0x704   :  { %3176 = vmatprep.subr.bf16.mxu0 %v8033_v15  ;;  %3343 = vmatprep.subr.bf16.mxu1 %v8036_v22  ;;  %v8103_v15 = vld [vmem:[%s11605_s6 + $0x30] sm:$0xff]   ;;  %v8104_v22 = vld [vmem:[%s11605_s6 + $0x68] sm:$0xff]  }
 0x705   :  { %2671 = vmatmul.mubr.bf16.vlgmr.msra.gmra.mxu0 %v9715_v28  ;;  %v8048_v28 = vld [vmem:[%s11603_s5 + $0x544] ss:$8 sps:$4 sm:$0xff]  }
 0x706   :  { %2680 = vmatprep.mubr.bf16.mxu0 %v2441_v31  ;;  %3177 = vmatpush1.bf16.msra.mxu0 %v8031_v27  ;;  %v3653_v27 = vsel %vm11644_vm5, %v3645_v25, %v3617_v7  ;;  %v3543_v31 = vpop.permute.xlu0 %3542  ;;  %vm11655_vm5 = vmmov %vm11645_vm6 }
 0x707   :  { %3344 = vmatpush1.bf16.msra.mxu1 %v8034_v33  ;;  %3178 = vmatprep.subr.bf16.mxu0 %v8039_v43  ;;  %v8107_v33 = vld [vmem:[%s11605_s6 + $0x20] sm:$0xff]   ;;  %v8108_v43 = vld [vmem:[%s11605_s6 + $0x58] sm:$0xff]  }
 0x708   :  { %3345 = vmatprep.subr.bf16.mxu1 %v8042_v50  ;;  %v8109_v50 = vld [vmem:[%s11605_s6 + $0x18] sm:$0xff]  }
 0x70a   :  { %2950 = vmatmul.mubr.bf16.gmra.mxu1 %v9735_v38  ;;  %3179 = vmatpush1.bf16.msra.mxu0 %v8037_v4  ;;  %v8054_v38 = vld [vmem:[%s11603_s5 + $0x534] ss:$8 sps:$4 sm:$0xff]   ;;  %v3601_v4 = vpop.permute.xlu1 %3600 }
 0x70b   :  { %3346 = vmatpush1.bf16.msra.mxu1 %v8040_v3  ;;  %3180 = vmatprep.subr.bf16.mxu0 %v8045_v11  ;;  %v8111_v3 = vld [vmem:[%s11605_s6 + $0x10] sm:$0xff]   ;;  %v8112_v11 = vld [vmem:[%s11605_s6 + $0x48] sm:$0xff]  }
 0x70c   :  { %3347 = vmatprep.subr.bf16.mxu1 %v8048_v28  ;;  %3373 = vmatprep.mubr.bf16.mxu1 %v8506_v26  ;;  %v3567_v28 = vpop.permute.xlu0 %3566 }
 0x70d   :  { %2681 = vmatmul.mubr.bf16.gmra.mxu0 %v9762_v49  ;;  %v8060_v49 = vld [vmem:[%s11603_s5 + $0x524] ss:$8 sps:$4 sm:$0xff]  }
 0x70e   :  { %3181 = vmatpush1.bf16.msra.mxu0 %v8043_v29  ;;  %3208 = vmatprep.mubr.bf16.mxu0 %v9769_v63  ;;  %v8055_v63 = vld [vmem:[%s11603_s5 + $0x430] ss:$8 sps:$4 sm:$0xff]   ;;  %v8113_v29 = vld [vmem:[%s11605_s6 + $0x8] sm:$0xff]  }
 0x70f   :  { %3348 = vmatpush1.bf16.msra.mxu1 %v8046_v30  ;;  %3182 = vmatprep.subr.bf16.mxu0 %v8051_v32  ;;  %v3619_v30 = vpop.permute.xlu1 %3618  ;;  %v8114_v32 = vld [vmem:[%s11605_s6 + $0x40] sm:$0xff]  }
 0x710   :  { %3349 = vmatprep.subr.bf16.mxu1 %v8054_v38  ;;  %v8115_v38 = vld [vmem:[%s11605_s6] sm:$0xff]  }
 0x712   :  { %3183 = vmatpush1.bf16.msra.mxu0 %v8049_v34  ;;  %v3545_v34 = vpop.permute.xlu0 %3544 }
 0x713   :  { %3350 = vmatpush1.bf16.msra.mxu1 %v8052_v12  ;;  %3184 = vmatprep.subr.bf16.mxu0 %v8057_v37  ;;  %v3603_v12 = vpop.permute.xlu1 %3602  ;;  %v3647_v37 = vsel %vm11646_vm9, %v3567_v28, %v3601_v4 }
 0x714   :  { %3351 = vmatprep.subr.bf16.mxu1 %v8060_v49  ;;  %v3625_v49 = vsel %vm11647_vm4, %v9569_v16, %v3543_v31 }
 0x716   :  { %3185 = vmatpush1.bf16.msra.mxu0 %v8055_v63  ;;  %v3569_v63 = vpop.permute.xlu0 %3568 }
 0x717   :  { %3352 = vmatpush1.bf16.msra.mxu1 %v8058_v41  ;;  %3186 = vmatprep.subr.bf16.mxu0 %v8063_v42  ;;  %v3655_v41 = vsel %vm11648_vm11, %v3647_v37, %v3619_v30  ;;  %v3633_v42 = vsel %vm11649_vm12, %v3625_v49, %v3565_v23  ;;  %vm11658_vm12 = vmmov %vm11655_vm5 }
 0x718   :  { %3353 = vmatprep.subr.bf16.mxu1 %v8066_v44  ;;  %v3621_v44 = vpop.permute.xlu1 %3620 }
 0x71a   :  { %3187 = vmatpush1.bf16.msra.mxu0 %v8061_v45  ;;  %v3649_v45 = vsel %vm11651_vm10, %v3569_v63, %v3603_v12  ;;  %vm11660_vm10 = vmmov %vm11654_vm2 }
 0x71b   :  { %3354 = vmatpush1.bf16.msra.mxu1 %v8064_v24  ;;  %3188 = vmatprep.subr.bf16.mxu0 %v8069_v2  ;;  %v3547_v24 = vpop.permute.xlu0 %3546  ;;  %v3627_v2 = vsel %vm11652_vm14, %v9572_v56, %v3545_v34  ;;  %v3657_v16 = vsel %vm11653_vm15, %v3649_v45, %v3621_v44  ;;  %vm6291_vm14 = vcmask 1041409   ;;  %vm3876_vm15 = vsmask.f32 1280 }
 0x71c   :  { %3355 = vmatprep.subr.bf16.mxu1 %v8072_v39  ;;  %v3605_v39 = vpop.permute.xlu1 %3604 }
 0x71e   :  { %3189 = vmatpush1.bf16.msra.mxu0 %v8067_v46  ;;  %v3636_v46 = vsel %vm11654_vm2, %v3627_v2, %v3567_v28 }
 0x71f   :  { %3356 = vmatpush1.bf16.msra.mxu1 %v8070_v40  ;;  %3190 = vmatprep.subr.bf16.mxu0 %v8075_v47  ;;  %v3571_v40 = vpop.permute.xlu0 %3570 }
 0x720   :  { %4157 = vmatprep.subr.bf16.mxu1 %v8506_v26 }
 0x722   :  { %3191 = vmatpush1.bf16.msra.mxu0 %v8073_v48  ;;  %3374 = vmatmul.mubr.bf16.vlgmr.msra.gmra.mxu1 %v9740_v20  ;;  %v8084_v20 = vld [vmem:[%s11603_s5 + $0x4d4] ss:$8 sps:$4 sm:$0xff]   ;;  %v3651_v48 = vsel %vm11646_vm9, %v3571_v40, %v3605_v39 }
 0x723   :  { %3192 = vmatprep.subr.bf16.mxu0 %v8078_v35  ;;  %3383 = vmatprep.mubr.bf16.mxu1 %v8506_v26  ;;  %v3623_v35 = vpop.permute.xlu1 %3622  ;;  %v3549_v56 = vpop.permute.xlu0 %3548 }
 0x726   :  { %3193 = vmatpush2.bf16.msra.mxu0 %v8076_v51 }
 0x727   :  { %3194 = vmatprep.subr.bf16.mxu0 %v8081_v57  ;;  %v3659_v57 = vsel %vm11648_vm11, %v3651_v48, %v3623_v35 }
 0x72a   :  { %3195 = vmatpush2.bf16.msra.mxu0 %v8079_v58  ;;  %3384 = vmatmul.mubr.bf16.gmra.mxu1 %v9781_v8  ;;  %v8088_v8 = vld [vmem:[%s11603_s5 + $0x4b0] ss:$8 sps:$4 sm:$0xff]  }
 0x72b   :  { %3196 = vmatprep.subr.bf16.mxu0 %v8084_v20 }
 0x72e   :  { %3197 = vmatpush2.bf16.msra.mxu0 %v8082_v59 }
 0x72f   :  { %3198 = vmatprep.subr.bf16.mxu0 %v8087_v62 }
 0x732   :  { %3199 = vmatpush2.bf16.msra.mxu0 %v8085_v14 }
 0x733   :  { %3200 = vmatprep.subr.bf16.mxu0 %v8090_v61 }
 0x736   :  { %3201 = vmatpush2.bf16.msra.mxu0 %v8088_v8 }
 0x737   :  { %3202 = vmatprep.subr.bf16.mxu0 %v8093_v36 }
 0x73a   :  { %3203 = vmatpush2.bf16.msra.mxu0 %v8091_v19 }
 0x73b   :  { %3204 = vmatprep.subr.bf16.mxu0 %v8096_v55 }
 0x73e   :  { %3205 = vmatpush2.bf16.msra.mxu0 %v8094_v10 }
 0x73f   :  { %3206 = vmatprep.subr.bf16.mxu0 %v8099_v13 }
 0x742   :  { %3207 = vmatpush2.bf16.msra.mxu0 %v8097_v5 }
 0x743   :  { %7751 = vmatprep.subr.msk.bf16.mxu0 %vm120_vm1, %v8100_v60 }
 0x745   :  { %3209 = vmatmul.mubr.bf16.vlgmr.msra.gmra.mxu0 %v9784_v9  ;;  %v8105_v9 = vld [vmem:[%s11605_s6 + $0x28] sm:$0xff]  }
 0x746   :  { %3218 = vmatprep.mubr.bf16.mxu0 %v9794_v6  ;;  %7638 = vmatpush3.bf16.msra.mxu0 %v8101_v54  ;;  %v8106_v6 = vld [vmem:[%s11605_s6 + $0x60] sm:$0xff]  }
 0x747   :  { %7639 = vmatprep.subr.bf16.mxu0 %v8102_v21 }
 0x74a   :  { %7640 = vmatpush3.bf16.msra.mxu0 %v8103_v15 }
 0x74b   :  { %7641 = vmatprep.subr.bf16.mxu0 %v8104_v22 }
 0x74d   :  { %3219 = vmatmul.mubr.bf16.gmra.mxu0 %v9800_v17  ;;  %v8110_v17 = vld [vmem:[%s11605_s6 + $0x50] sm:$0xff]  }
 0x74e   :  { %7642 = vmatpush3.bf16.msra.mxu0 %v8105_v9  ;;  %7250 = vmatprep.mubr.msk.bf16.mxu0 %vm11645_vm6, %v3653_v27  ;;  %vm11656_vm6 = vmmov %vm11647_vm4 }
 0x74f   :  { %7643 = vmatprep.subr.bf16.mxu0 %v8106_v6  ;;  %v3629_v47 = vsel %vm11656_vm6, %v9611_v52, %v3547_v24  ;;  %vm11657_vm4 = vmmov %vm11654_vm2  ;;  %vm11661_vm2 = vcmask 1041408  }
 0x750   :  { %v3639_v51 = vsel %vm11657_vm4, %v3629_v47, %v3569_v63 }
 0x752   :  { %7644 = vmatpush3.bf16.msra.mxu0 %v8107_v33 }
 0x753   :  { %7645 = vmatprep.subr.bf16.mxu0 %v8108_v43 }
 0x756   :  { %7646 = vmatpush3.bf16.msra.mxu0 %v8109_v50 }
 0x757   :  { %7647 = vmatprep.subr.bf16.mxu0 %v8110_v17 }
 0x75a   :  { %7648 = vmatpush3.bf16.msra.mxu0 %v8111_v3 }
 0x75b   :  { %7649 = vmatprep.subr.bf16.mxu0 %v8112_v11 }
 0x75e   :  { %7650 = vmatpush3.bf16.msra.mxu0 %v8113_v29 }
 0x75f   :  { %7651 = vmatprep.subr.bf16.mxu0 %v8114_v32 }
 0x762   :  { %7652 = vmatpush3.bf16.msra.mxu0 %v8115_v38 }
 0x763   :  { %4302 = vmatprep.subr.bf16.mxu0 %v8506_v26 }
 0x765   :  { %3831 = vmatmul.mubr.bf16.vlgmr.msra.gmra.mxu0 %v3633_v42 }
 0x766   :  { %7251 = vmatprep.mubr.msk.bf16.mxu0 %vm11650_vm13, %v3655_v41  ;;  %vm11659_vm13 = vmmov %vm11656_vm6  ;;  %vm11664_vm6 = vcmask 1045504  }
 0x767   :  { %v3631_v58 = vsel %vm11659_vm13, %v9615_v53, %v3549_v56  ;;  %v8118_v56 = vld [vmem:[%s11606_s7 + $0x30] sm:$0xff]   ;;  %vm11666_vm9 = vmmov %vm11664_vm6 }
 0x768   :  { %v3642_v20 = vsel %vm11660_vm10, %v3631_v58, %v3571_v40  ;;  %v8119_v58 = vld [vmem:[%s11606_s7 + $0x90] sm:$0xff]   ;;  %vm11667_vm4 = vmmov %vm11664_vm6 }
 0x769   :  { %vm11668_vm11 = vmmov %vm11667_vm4 }
 0x76a   :  { %vm11670_vm13 = vmmov %vm11667_vm4 }
 0x76b   :  { %vm11671_vm10 = vmmov %vm11667_vm4 }
 0x76d   :  { %3839 = vmatmul.mubr.bf16.gmra.mxu0 %v3636_v46 }
 0x76e   :  { %7252 = vmatprep.mubr.msk.bf16.mxu0 %vm11655_vm5, %v3657_v16  ;;  %vm10311_vm5 = vmand %vm11661_vm2, %vm3876_vm15 }
 0x775   :  { %3847 = vmatmul.mubr.bf16.gmra.mxu0 %v3639_v51  ;;  %v8116_v51 = vld [vmem:[%s11606_s7 + $0x38] sm:$0xff]  }
 0x776   :  { %7253 = vmatprep.mubr.msk.bf16.mxu0 %vm11658_vm12, %v3659_v57  ;;  %v8117_v57 = vld [vmem:[%s11606_s7 + $0x98] sm:$0xff]   ;;  %4303 = vmatpush1.bf16.msra.mxu0 %v8116_v51  ;;  %vm11669_vm12 = vmmov %vm11667_vm4 }
 0x777   :  { %4304 = vmatprep.subr.bf16.mxu0 %v8506_v26  ;;  %4158 = vmatpush1.bf16.msra.mxu1 %v8117_v57 }
 0x778   :  { %4159 = vmatprep.subr.bf16.mxu1 %v8506_v26 }
 0x77a   :  { %4305 = vmatpush1.bf16.msra.mxu0 %v8118_v56 }
 0x77b   :  { %4306 = vmatprep.subr.bf16.mxu0 %v8506_v26  ;;  %4160 = vmatpush1.bf16.msra.mxu1 %v8119_v58 }
 0x77c   :  { %4161 = vmatprep.subr.bf16.mxu1 %v8506_v26 }
 0x77d   :  { %3855 = vmatmul.mubr.bf16.gmra.mxu0 %v3642_v20  ;;  %v8120_v20 = vld [vmem:[%s11606_s7 + $0x28] sm:$0xff]  }
 0x77e   :  { %4307 = vmatpush1.bf16.msra.mxu0 %v8120_v20 }
 0x77f   :  { %4308 = vmatprep.subr.bf16.mxu0 %v8506_v26 }
 0x782   :  { %v2411_v59 = vpop.f32.mrf.mxu1 }
 0x784   :  { %v2413_v62 = vpop.f32.mrf.mxu1 }
 0x785   :  { %v2198_v52 = vpop.f32.mrf.mxu0 }
 0x786   :  { %v2412_v14 = vadd.f32 %v2411_v59, %v2198_v52  ;;  %v2415_v61 = vpop.f32.mrf.mxu1  ;;  %v8121_v59 = vld [vmem:[%s11606_s7 + $0x88] sm:$0xff]   ;;  %v8123_v52 = vld [vmem:[%s11606_s7 + $0x80] sm:$0xff]  }
 0x787   :  { %v2200_v8 = vpop.f32.mrf.mxu0  ;;  %4162 = vmatpush1.bf16.msra.mxu1 %v8121_v59 }
 0x788   :  { %v2414_v36 = vadd.f32 %v2413_v62, %v2200_v8  ;;  %v2417_v19 = vpop.f32.mrf.mxu1  ;;  %v8122_v62 = vld [vmem:[%s11606_s7 + $0x20] sm:$0xff]   ;;  %4163 = vmatprep.subr.bf16.mxu1 %v8506_v26  ;;  %v8126_v8 = vld [vmem:[%s11606_s7 + $0x10] sm:$0xff]  }
 0x789   :  { %v2202_v55 = vpop.f32.mrf.mxu0  ;;  %4309 = vmatpush1.bf16.msra.mxu0 %v8122_v62 }
 0x78a   :  { %v2416_v10 = vadd.f32 %v2415_v61, %v2202_v55  ;;  %v2421_v13 = vpop.f32.mrf.mxu1  ;;  %4310 = vmatprep.subr.bf16.mxu0 %v8506_v26  ;;  %v8125_v61 = vld [vmem:[%s11606_s7 + $0x78] sm:$0xff]   ;;  %v8129_v55 = vld [vmem:[%s11606_s7 + $0x68] sm:$0xff]  }
 0x78b   :  { %v2204_v5 = vpop.f32.mrf.mxu0  ;;  %4164 = vmatpush1.bf16.msra.mxu1 %v8123_v52 }
 0x78c   :  { %v2418_v60 = vadd.f32 %v2417_v19, %v2204_v5  ;;  %v2423_v54 = vpop.f32.mrf.mxu1  ;;  %4165 = vmatprep.subr.bf16.mxu1 %v8506_v26  ;;  %v8128_v19 = vld [vmem:[%s11606_s7 + $0x8] sm:$0xff]   ;;  %v8132_v5 = vld [vmem:[%s11606_s7 + $0x58] sm:$0xff]  }
 0x78d   :  { %v2208_v18 = vpop.f32.mrf.mxu0 }
 0x78e   :  { %v2422_v21 = vadd.f32 %v2421_v13, %v2208_v18  ;;  %v2425_v53 = vpop.f32.mrf.mxu1  ;;  %v8131_v13 = vld [vmem:[%s11606_s7 + $0x60] sm:$0xff]   ;;  %v8134_v18 = vld [vmem:[%s11606_s7 + $0x50] sm:$0xff]  }
 0x78f   :  { %v2210_v15 = vpop.f32.mrf.mxu0  ;;  %4166 = vmatpush1.bf16.msra.mxu1 %v8125_v61 }
 0x790   :  { %v2424_v22 = vadd.f32 %v2423_v54, %v2210_v15  ;;  %v2427_v7 = vpop.f32.mrf.mxu1  ;;  %4167 = vmatprep.subr.bf16.mxu1 %v8506_v26  ;;  %v8133_v54 = vld [vmem:[%s11606_s7 + $0xb8] sm:$0xff]  }
 0x791   :  { %v2212_v23 = vpop.f32.mrf.mxu0 }
 0x792   :  { %v2426_v25 = vadd.f32 %v2425_v53, %v2212_v23  ;;  %v8135_v53 = vld [vmem:[%s11606_s7 + $0xb0] sm:$0xff]   ;;  %v7057_v23 = vld [vmem:[%s11599_s11 + $0x5] ss:$8 sm:$0x3] }
 0x793   :  { %v2214_v9 = vpop.f32.mrf.mxu0 }
 0x794   :  { %v2428_v6 = vadd.f32 %v2427_v7, %v2214_v9 }
 0x7c2   :  { %v2941_v27 = vpop.f32.mrf.mxu1 }
 0x7c4   :  { %v2943_v33 = vpop.f32.mrf.mxu1 }
 0x7c5   :  { %v2672_v43 = vpop.f32.mrf.mxu0 }
 0x7c6   :  { %v2691_v50 = vadd.f32 %v2672_v43, %v2412_v14  ;;  %v2945_v31 = vpop.f32.mrf.mxu1  ;;  %v8124_v14 = vld [vmem:[%s11606_s7 + $0x18] sm:$0xff]   ;;  %v8138_v43 = vld [vmem:[%s11606_s7 + $0x40] sm:$0xff]  }
 0x7c7   :  { %v2674_v17 = vpop.f32.mrf.mxu0  ;;  %4311 = vmatpush1.bf16.msra.mxu0 %v8124_v14 }
 0x7c8   :  { %v2692_v4 = vadd.f32 %v2674_v17, %v2414_v36  ;;  %v2947_v3 = vpop.f32.mrf.mxu1  ;;  %v10174_v11 = vadd.f32 %v2941_v27, %v2691_v50  ;;  %4312 = vmatprep.subr.bf16.mxu0 %v8506_v26  ;;  %v8127_v36 = vld [vmem:[%s11606_s7 + $0x70] sm:$0xff]   ;;  %v3406_v27 = vrot.slane %v7057_v23, %v8648_v1 }
 0x7c9   :  { %v2676_v28 = vpop.f32.mrf.mxu0  ;;  %4168 = vmatpush1.bf16.msra.mxu1 %v8127_v36 }
 0x7ca   :  { %v2693_v29 = vadd.f32 %v2676_v28, %v2416_v10  ;;  %v2951_v30 = vpop.f32.mrf.mxu1  ;;  %v10176_v32 = vadd.f32 %v2943_v33, %v2692_v4  ;;  %4169 = vmatprep.subr.bf16.mxu1 %v8506_v26  ;;  %v8130_v10 = vld [vmem:[%s11606_s7] sm:$0xff]  }
 0x7cb   :  { %v2678_v38 = vpop.f32.mrf.mxu0  ;;  %4313 = vmatpush1.bf16.msra.mxu0 %v8126_v8 }
 0x7cc   :  { %v2694_v34 = vadd.f32 %v2678_v38, %v2418_v60  ;;  %v10178_v12 = vadd.f32 %v2945_v31, %v2693_v29  ;;  %v2953_v37 = vpop.f32.mrf.mxu1  ;;  %4314 = vmatprep.subr.bf16.mxu0 %v8506_v26 }
 0x7cd   :  { %v2682_v49 = vpop.f32.mrf.mxu0  ;;  %4170 = vmatpush1.bf16.msra.mxu1 %v8129_v55 }
 0x7ce   :  { %v2695_v63 = vadd.f32 %v2682_v49, %v2422_v21  ;;  %v10180_v41 = vadd.f32 %v2947_v3, %v2694_v34  ;;  %v2955_v24 = vpop.f32.mrf.mxu1  ;;  %4171 = vmatprep.subr.bf16.mxu1 %v8506_v26 }
 0x7cf   :  { %v2684_v42 = vpop.f32.mrf.mxu0  ;;  %4315 = vmatpush1.bf16.msra.mxu0 %v8128_v19 }
 0x7d0   :  { %v2696_v44 = vadd.f32 %v2684_v42, %v2424_v22  ;;  %v10182_v45 = vadd.f32 %v2951_v30, %v2695_v63  ;;  %v2957_v48 = vpop.f32.mrf.mxu1  ;;  %4316 = vmatprep.subr.bf16.mxu0 %v8506_v26  ;;  %v8136_v22 = vld [vmem:[%s11606_s7 + $0x48] sm:$0xff]  }
 0x7d1   :  { %v2686_v2 = vpop.f32.mrf.mxu0  ;;  %4172 = vmatpush1.bf16.msra.mxu1 %v8131_v13 }
 0x7d2   :  { %v2697_v39 = vadd.f32 %v2686_v2, %v2426_v25  ;;  %v10184_v16 = vadd.f32 %v2953_v37, %v2696_v44  ;;  %4181 = vmatprep.subr.bf16.mxu1 %v8506_v26  ;;  %v8137_v25 = vld [vmem:[%s11606_s7 + $0xa8] sm:$0xff]  }
 0x7d3   :  { %v2688_v46 = vpop.f32.mrf.mxu0  ;;  %4317 = vmatpush1.bf16.msra.mxu0 %v8130_v10 }
 0x7d4   :  { %v2698_v40 = vadd.f32 %v2688_v46, %v2428_v6  ;;  %v10186_v47 = vadd.f32 %v2955_v24, %v2697_v39  ;;  %4326 = vmatprep.subr.bf16.mxu0 %v8506_v26 }
 0x7d5   :  { %4182 = vmatpush2.bf16.msra.mxu1 %v8133_v54 }
 0x7d6   :  { %v10188_v35 = vadd.f32 %v2957_v48, %v2698_v40  ;;  %4183 = vmatprep.subr.bf16.mxu1 %v8506_v26 }
 0x7d7   :  { %4327 = vmatpush2.bf16.msra.mxu0 %v8132_v5 }
 0x7d8   :  { %4328 = vmatprep.subr.bf16.mxu0 %v8506_v26 }
 0x7d9   :  { %4184 = vmatpush2.bf16.msra.mxu1 %v8135_v53 }
 0x7da   :  { %4185 = vmatprep.subr.bf16.mxu1 %v8506_v26 }
 0x7db   :  { %4329 = vmatpush2.bf16.msra.mxu0 %v8134_v18 }
 0x7dc   :  { %4330 = vmatprep.subr.bf16.mxu0 %v8506_v26 }
 0x7dd   :  { %4186 = vmatpush2.bf16.msra.mxu1 %v8137_v25 }
 0x7de   :  { %4187 = vmatprep.subr.bf16.mxu1 %v8506_v26 }
 0x7df   :  { %4331 = vmatpush2.bf16.msra.mxu0 %v8136_v22 }
 0x7e0   :  { %4332 = vmatprep.subr.bf16.mxu0 %v8506_v26 }
 0x7e2   :  { %v3375_v60 = vpop.f32.mrf.mxu1 }
 0x7e3   :  { %4333 = vmatpush2.bf16.msra.mxu0 %v8138_v43 }
 0x7e4   :  { %v3377_v21 = vpop.f32.mrf.mxu1 }
 0x7e6   :  { %v3379_v15 = vpop.f32.mrf.mxu1 }
 0x7e8   :  { %v3381_v9 = vpop.f32.mrf.mxu1 }
 0x7ea   :  { %v3385_v4 = vpop.f32.mrf.mxu1 }
 0x805   :  { %v3210_v7 = vpop.f32.mrf.mxu0 }
 0x806   :  { %v3229_v6 = vadd.f32 %v3210_v7, %v10174_v11  ;;  %v3410_v11 = vrot.slane %v7057_v23, %v8646_v0 }
 0x807   :  { %v3212_v33 = vpop.f32.mrf.mxu0 }
 0x808   :  { %v3394_v50 = vadd.f32 %v3375_v60, %v3229_v6  ;;  %v3230_v31 = vadd.f32 %v3212_v33, %v10176_v32  ;;  %v3387_v32 = vpop.f32.mrf.mxu1 }
 0x809   :  { %v3214_v17 = vpop.f32.mrf.mxu0 }
 0x80a   :  { %v3395_v3 = vadd.f32 %v3377_v21, %v3230_v31  ;;  %v3231_v28 = vadd.f32 %v3214_v17, %v10178_v12  ;;  %v3413_v29 = vadd.f32 %v3406_v27, %v3394_v50  ;;  %v3389_v51 = vpop.f32.mrf.mxu1 }
 0x80b   :  { %v3216_v30 = vpop.f32.mrf.mxu0 }
 0x80c   :  { %v3396_v38 = vadd.f32 %v3379_v15, %v3231_v28  ;;  %v3232_v34 = vadd.f32 %v3216_v30, %v10180_v41  ;;  %v3414_v49 = vadd.f32 %v3410_v11, %v3395_v3  ;;  %v3421_v24 = vmax.f32 %v3413_v29, 0.0  ;;  %v3391_v36 = vpop.f32.mrf.mxu1 }
 0x80d   :  { %v3220_v37 = vpop.f32.mrf.mxu0 }
 0x80e   :  { %v3415_v63 = vadd.f32 %v3406_v27, %v3396_v38  ;;  %v3397_v42 = vadd.f32 %v3381_v9, %v3232_v34  ;;  %v3233_v44 = vadd.f32 %v3220_v37, %v10182_v45  ;;  %v3422_v57 = vmax.f32 %v3414_v49, 0.0 }
 0x80f   :  { %v3222_v2 = vpop.f32.mrf.mxu0 }
 0x810   :  { %v3423_v39 = vmax.f32 %v3415_v63, 0.0  ;;  %v3416_v46 = vadd.f32 %v3410_v11, %v3397_v42  ;;  %v3398_v40 = vadd.f32 %v3385_v4, %v3233_v44  ;;  %v3234_v12 = vadd.f32 %v3222_v2, %v10184_v16 }
 0x811   :  { %v3224_v48 = vpop.f32.mrf.mxu0 }
 0x812   :  { %v3429_v56 = vpack.c.bf16 %v3423_v39, %v3421_v24  ;;  %v3424_v58 = vmax.f32 %v3416_v46, 0.0  ;;  %v3399_v41 = vadd.f32 %v3387_v32, %v3234_v12  ;;  %v3235_v20 = vadd.f32 %v3224_v48, %v10186_v47  ;;  %v10297_v39 = vld [vmem:[%s11599_s11 + $0x6] ss:$0 sm:$0xff] }
 0x813   :  { %v3226_v59 = vpop.f32.mrf.mxu0  ;;  %v3417_v45 = vadd.f32 %v3406_v27, %v3398_v40 }
 0x814   :  { %v3433_v62 = vunpack.i.l.bf16 %v3429_v56  ;;  %v3434_v52 = vunpack.i.h.bf16 %v3429_v56  ;;  %v3430_v14 = vpack.c.bf16 %v3424_v58, %v3422_v57  ;;  %v3400_v61 = vadd.f32 %v3389_v51, %v3235_v20 }
 0x815   :  { %v3236_v8 = vadd.f32 %v3226_v59, %v10188_v35  ;;  %v3418_v10 = vadd.f32 %v3410_v11, %v3399_v41  ;;  %v3425_v18 = vmax.f32 %v3417_v45, 0.0 }
 0x816   :  { %v3435_v19 = vmax.f32 %v3433_v62, %v3434_v52  ;;  %v3443_v55 = vunpack.i.l.bf16 %v3430_v14  ;;  %v3444_v16 = vunpack.i.h.bf16 %v3430_v14  ;;  %v3419_v13 = vadd.f32 %v3406_v27, %v3400_v61 }
 0x817   :  { %v3401_v5 = vadd.f32 %v3391_v36, %v3236_v8  ;;  %v3426_v22 = vmax.f32 %v3418_v10, 0.0 }
 0x818   :  { %v3436_v60 = vrot.slane %v3435_v19, 4  ;;  %v3445_v54 = vmax.f32 %v3443_v55, %v3444_v16  ;;  %v3427_v21 = vmax.f32 %v3419_v13, 0.0 }
 0x819   :  { %v3420_v47 = vadd.f32 %v3410_v11, %v3401_v5 }
 0x81a   :  { %v3437_v53 = vmax.f32 %v3435_v19, %v3436_v60  ;;  %v3446_v15 = vrot.slane %v3445_v54, 4  ;;  %v3431_v23 = vpack.c.bf16 %v3427_v21, %v3425_v18 }
 0x81b   :  { %v3428_v25 = vmax.f32 %v3420_v47, 0.0 }
 0x81c   :  { %v3438_v7 = vrot.slane %v3437_v53, 2  ;;  %v3447_v9 = vmax.f32 %v3445_v54, %v3446_v15  ;;  %v3453_v35 = vunpack.i.l.bf16 %v3431_v23  ;;  %v3454_v6 = vunpack.i.h.bf16 %v3431_v23 }
 0x81d   :  { %v3432_v33 = vpack.c.bf16 %v3428_v25, %v3426_v22 }
 0x81e   :  { %v3448_v43 = vrot.slane %v3447_v9, 2  ;;  %v3439_v50 = vmax.f32 %v3437_v53, %v3438_v7  ;;  %v3455_v31 = vmax.f32 %v3453_v35, %v3454_v6 }
 0x81f   :  { %v3463_v27 = vunpack.i.l.bf16 %v3432_v33  ;;  %v3464_v17 = vunpack.i.h.bf16 %v3432_v33 }
 0x820   :  { %v3456_v4 = vrot.slane %v3455_v31, 4  ;;  %v3449_v28 = vmax.f32 %v3447_v9, %v3448_v43  ;;  %v3440_v29 = vrot.slane %v3439_v50, 1 }
 0x821   :  { %v3465_v3 = vmax.f32 %v3463_v27, %v3464_v17 }
 0x822   :  { %v3457_v11 = vmax.f32 %v3455_v31, %v3456_v4  ;;  %v3450_v32 = vrot.slane %v3449_v28, 1  ;;  %v3441_v49 = vmax.f32 %v3439_v50, %v3440_v29 }
 0x823   :  { %v3466_v30 = vrot.slane %v3465_v3, 4 }
 0x824   :  { %v3458_v38 = vrot.slane %v3457_v11, 2  ;;  %v3451_v40 = vmax.f32 %v3449_v28, %v3450_v32  ;;  %v3442_v57 = vpack.i.bf16 %v3441_v49, %v3441_v49 }
 0x825   :  { %v3467_v34 = vmax.f32 %v3465_v3, %v3466_v30  ;;  %v7653_v37 = vpop.f32.mrf.mxu0 }
 0x826   :  { %v3459_v63 = vmax.f32 %v3457_v11, %v3458_v38  ;;  %v3452_v59 = vpack.i.bf16 %v3451_v40, %v3451_v40  ;;  %v6287_v8 = vunpack.c.l.b16 %v3442_v57 }
 0x827   :  { %v7654_v42 = vpop.f32.mrf.mxu0  ;;  %v3468_v44 = vrot.slane %v3467_v34, 2 }
 0x828   :  { %v7655_v24 = vadd.f32 %v7654_v42, %v7653_v37  ;;  %v3460_v2 = vrot.slane %v3459_v63, 1  ;;  %v6288_v13 = vunpack.c.l.b16 %v3452_v59  ;;  %v8139_v42 = vld [vmem:[%s11606_s7 + $0xa0] sm:$0xff]  }
 0x829   :  { %v7656_v46 = vpop.f32.mrf.mxu0  ;;  %v3469_v12 = vmax.f32 %v3467_v34, %v3468_v44  ;;  %4188 = vmatpush2.bf16.msra.mxu1 %v8139_v42  ;;  %v8143_v42 = vld [vmem:[%s11606_s7 + $0x140] sm:$0xff]  }
 0x82a   :  { %v3461_v48 = vmax.f32 %v3459_v63, %v3460_v2  ;;  %v3833_v58 = vadd.f32 %v7655_v24, %v10297_v39  ;;  %4499 = vmatprep.subr.bf16.mxu1 %v8506_v26 }
 0x82b   :  { %v7657_v51 = vpop.f32.mrf.mxu0  ;;  %v3470_v56 = vrot.slane %v3469_v12, 1 }
 0x82c   :  { %v7658_v41 = vadd.f32 %v7657_v51, %v7656_v46  ;;  %v3462_v62 = vpack.i.bf16 %v3461_v48, %v3461_v48  ;;  %v3863_v19 = vmax.f32 %v3833_v58, 0.0 }
 0x82d   :  { %v7659_v20 = vpop.f32.mrf.mxu0  ;;  %v3471_v52 = vmax.f32 %v3469_v12, %v3470_v56 }
 0x82e   :  { %v3836_v14 = vadd.f32 %v7658_v41, %v10297_v39  ;;  %v6289_v36 = vunpack.c.l.b16 %v3462_v62 }
 0x82f   :  { %v7660_v45 = vpop.f32.mrf.mxu0  ;;  %v3472_v61 = vpack.i.bf16 %v3471_v52, %v3471_v52 }
 0x830   :  { %v3864_v55 = vmax.f32 %v3836_v14, 0.0  ;;  %v7661_v16 = vadd.f32 %v7660_v45, %v7659_v20  ;;  %v10302_v60 = vsel %vm6291_vm14, %v6289_v36, %v6287_v8  ;;  %v8141_v45 = vld [vmem:[%s11606_s7 + $0x148] sm:$0xff]  }
 0x831   :  { %v7662_v10 = vpop.f32.mrf.mxu0  ;;  %v6290_v5 = vunpack.c.l.b16 %v3472_v61  ;;  %7731 = vmatprep.subr.bf16.mxu0 %v8141_v45 }
 0x832   :  { %v3871_v54 = vpack.c.bf16 %v3864_v55, %v3863_v19  ;;  %v3841_v15 = vadd.f32 %v7661_v16, %v10297_v39 }
 0x833   :  { %v7663_v18 = vpop.f32.mrf.mxu0  ;;  %v10305_v21 = vsel %vm6291_vm14, %v6290_v5, %v6288_v13 }
 0x834   :  { %v3878_v47 = vshrl.u32 %v3871_v54, 16  ;;  %v3881_v53 = vshll.u32 %v3871_v54, 16  ;;  %v7664_v22 = vadd.f32 %v7663_v18, %v7662_v10  ;;  %v3865_v43 = vmax.f32 %v3841_v15, 0.0 }
 0x835   :  { %v7665_v23 = vpop.f32.mrf.mxu0 }
 0x836   :  { %v3880_v25 = vrot.slane %v3878_v47, 6  ;;  %v3883_v7 = vrot.slane %v3881_v53, 7  ;;  %v3844_v9 = vadd.f32 %v7664_v22, %v10297_v39 }
 0x837   :  { %v7666_v6 = vpop.f32.mrf.mxu0 }
 0x838   :  { %v3884_v33 = vor.u32 %v3883_v7, %v3880_v25  ;;  %v3866_v50 = vmax.f32 %v3844_v9, 0.0  ;;  %v7667_v31 = vadd.f32 %v7666_v6, %v7665_v23 }
 0x839   :  { %v7668_v27 = vpop.f32.mrf.mxu0 }
 0x83a   :  { %v10317_v17 = vsel %vm10311_vm5, 0, %v3884_v33  ;;  %v3872_v4 = vpack.c.bf16 %v3866_v50, %v3865_v43  ;;  %v3849_v3 = vadd.f32 %v7667_v31, %v10297_v39 }
 0x83b   :  { %v7669_v28 = vpop.f32.mrf.mxu0  ;;  %v3924_v34 = vshll.u32 %v10317_v17, 16  ;;  %v3922_v41 = vshrl.u32 %v10317_v17, 16 }
 0x83c   :  { %v3886_v29 = vshrl.u32 %v3872_v4, 16  ;;  %v3889_v11 = vshll.u32 %v3872_v4, 16  ;;  %v7670_v30 = vadd.f32 %v7669_v28, %v7668_v27  ;;  %v3867_v49 = vmax.f32 %v3849_v3, 0.0 }
 0x83d   :  { %v7671_v38 = vpop.f32.mrf.mxu0  ;;  %v3926_v12 = vrot.slane %v3924_v34, 1 }
 0x83e   :  { %v3888_v37 = vrot.slane %v3886_v29, 6  ;;  %v3891_v32 = vrot.slane %v3889_v11, 7  ;;  %v3852_v63 = vadd.f32 %v7670_v30, %v10297_v39 }
 0x83f   :  { %v7672_v44 = vpop.f32.mrf.mxu0  ;;  %v3927_v8 = vor.u32 %v3926_v12, %v3922_v41 }
 0x840   :  { %v3892_v24 = vor.u32 %v3891_v32, %v3888_v37  ;;  %v3868_v2 = vmax.f32 %v3852_v63, 0.0  ;;  %v7673_v46 = vadd.f32 %v7672_v44, %v7671_v38 }
 0x841   :  { %v7674_v40 = vpop.f32.mrf.mxu0 }
 0x842   :  { %v10328_v48 = vsel %vm10311_vm5, %v3892_v24, 0  ;;  %v3873_v51 = vpack.c.bf16 %v3868_v2, %v3867_v49  ;;  %v3857_v57 = vadd.f32 %v7673_v46, %v10297_v39  ;;  %v10332_v56 = vsel %vm3876_vm15, %v3884_v33, %v3892_v24 }
 0x843   :  { %v7675_v58 = vpop.f32.mrf.mxu0  ;;  %v3929_v20 = vshll.u32 %v10332_v56, 16  ;;  %v3937_v59 = vshll.u32 %v10328_v48, 16  ;;  %v3933_v19 = vshrl.u32 %v10332_v56, 16  ;;  %v4005_v53 = vshrl.u32 %v10328_v48, 16 }
 0x844   :  { %v3895_v62 = vshrl.u32 %v3873_v51, 16  ;;  %v3898_v52 = vshll.u32 %v3873_v51, 16  ;;  %v7676_v14 = vadd.f32 %v7675_v58, %v7674_v40  ;;  %v3869_v61 = vmax.f32 %v3857_v57, 0.0  ;;  %v8140_v58 = vld [vmem:[%s11606_s7 + $0xf8] sm:$0xff]  }
 0x845   :  { %v3931_v36 = vrot.slane %v3929_v20, 1  ;;  %v3939_v13 = vrot.slane %v3937_v59, 1  ;;  %v8145_v59 = vld [vmem:[%s11606_s7 + $0x138] sm:$0xff]  }
 0x846   :  { %v3897_v55 = vrot.slane %v3895_v62, 6  ;;  %v3900_v16 = vrot.slane %v3898_v52, 7  ;;  %v3860_v10 = vadd.f32 %v7676_v14, %v10297_v39 }
 0x847   :  { %v3932_v5 = vsel %vm458_vm0, %v3927_v8, %v3931_v36  ;;  %v3935_v54 = vor.u32 %v3933_v19, %v3931_v36  ;;  %v4007_v39 = vor.u32 %v4005_v53, %v3939_v13  ;;  %v8144_v36 = vld [vmem:[%s11606_s7 + $0xe8] sm:$0xff]  }
 0x848   :  { %v3901_v18 = vor.u32 %v3900_v16, %v3897_v55  ;;  %v3870_v47 = vmax.f32 %v3860_v10, 0.0  ;;  %3961 = vrot.lane.b32.xlu0 %v3932_v5, %s8505_s3  ;;  %v8149_v19 = vld [vmem:[%s11606_s7 + $0x128] sm:$0xff]   ;;  %v8146_v10 = vld [vmem:[%s11606_s7 + $0xe0] sm:$0xff]  }
 0x849   :  { %v3940_v15 = vsel %vm458_vm0, %v3935_v54, %v3939_v13  ;;  %v8151_v13 = vld [vmem:[%s11606_s7 + $0x120] sm:$0xff]  }
 0x84a   :  { %v10348_v22 = vsel %vm10311_vm5, 0, %v3901_v18  ;;  %v3874_v23 = vpack.c.bf16 %v3870_v47, %v3869_v61  ;;  %3963 = vrot.lane.b32.xlu1 %v3940_v15, %s8505_s3  ;;  %v8147_v61 = vld [vmem:[%s11606_s7 + $0x130] sm:$0xff]  }
 0x84b   :  { %v3944_v9 = vshll.u32 %v10348_v22, 16  ;;  %v3942_v50 = vshrl.u32 %v10348_v22, 16 }
 0x84c   :  { %v3903_v25 = vshrl.u32 %v3874_v23, 16  ;;  %v3906_v7 = vshll.u32 %v3874_v23, 16  ;;  %4011 = vrot.lane.b32.xlu0 %v4007_v39, %s8505_s3 }
 0x84d   :  { %v3946_v31 = vrot.slane %v3944_v9, 1 }
 0x84e   :  { %v3905_v6 = vrot.slane %v3903_v25, 6  ;;  %v3908_v33 = vrot.slane %v3906_v7, 7  ;;  %v8148_v25 = vld [vmem:[%s11606_s7 + $0xd8] sm:$0xff]  }
 0x84f   :  { %v3947_v11 = vor.u32 %v3946_v31, %v3942_v50  ;;  %v8150_v31 = vld [vmem:[%s11606_s7 + $0xd0] sm:$0xff]  }
 0x850   :  { %v3909_v43 = vor.u32 %v3908_v33, %v3905_v6  ;;  %v4577_v33 = vrot.slane %v10332_v56, 3 }
 0x852   :  { %v10356_v27 = vsel %vm10311_vm5, %v3909_v43, 0  ;;  %v10359_v4 = vsel %vm3876_vm15, %v3901_v18, %v3909_v43  ;;  %vm11673_vm15 = vmmov %vm11661_vm2 }
 0x853   :  { %v3949_v3 = vshll.u32 %v10359_v4, 16  ;;  %v3957_v28 = vshll.u32 %v10356_v27, 16  ;;  %v4008_v29 = vshrl.u32 %v10356_v27, 16  ;;  %v3953_v38 = vshrl.u32 %v10359_v4, 16  ;;  %vm11674_vm5 = vmmov %vm11661_vm2 }
 0x855   :  { %v3951_v30 = vrot.slane %v3949_v3, 1  ;;  %v3959_v34 = vrot.slane %v3957_v28, 1  ;;  %v4576_v3 = vrot.slane %v10317_v17, 3 }
 0x857   :  { %v3952_v37 = vsel %vm458_vm0, %v3947_v11, %v3951_v30  ;;  %v3955_v32 = vor.u32 %v3953_v38, %v3951_v30  ;;  %v4010_v35 = vor.u32 %v4008_v29, %v3959_v34  ;;  %v4578_v28 = vsel %vm120_vm1, %v4576_v3, %v4577_v33  ;;  %v8152_v11 = vld [vmem:[%s11606_s7 + $0xc8] sm:$0xff]   ;;  %v8191_v3 = vld [vmem:[%s11607_s8 + $0x10] ss:$8 sps:$4 sm:$0xff]  }
 0x858   :  { %3965 = vrot.lane.b32.xlu1 %v3952_v37, %s8505_s3 }
 0x859   :  { %v3960_v49 = vsel %vm458_vm0, %v3955_v32, %v3959_v34  ;;  %v4582_v34 = vrot.slane %v10359_v4, 3  ;;  %v8153_v32 = vld [vmem:[%s11606_s7 + $0xc0] sm:$0xff]  }
 0x85a   :  { %3967 = vrot.lane.b32.xlu0 %v3960_v49, %s8505_s3  ;;  %v8154_v49 = vld [vmem:[%s11606_s7 + $0x118] sm:$0xff]  }
 0x85c   :  { %4013 = vrot.lane.b32.xlu1 %v4010_v35, %s8505_s3  ;;  %v4581_v35 = vrot.slane %v10348_v22, 3 }
 0x8ba   :  { %v10370_v63 = vpop.permute.xlu0 %3961 }
 0x8bb   :  { %7282 = vmatprep.mubr.msk.bf16.mxu0 %vm844_vm7, %v10370_v63  ;;  %v10380_v44 = vsel %vm849_vm8, %v10317_v17, %v10370_v63  ;;  %v4028_v2 = vrot.slane %v10370_v63, 1  ;;  %v4370_v30 = vrot.slane %v10370_v63, 2  ;;  %v4579_v17 = vrot.slane %v10328_v48, 3 }
 0x8bc   :  { %v10382_v24 = vpop.permute.xlu1 %3963  ;;  %4335 = vmatmul.mubr.bf16.vlgmr.msra.gmra.mxu0 %v10380_v44  ;;  %v4025_v51 = vrot.slane %v10380_v44, 1  ;;  %v4584_v63 = vrot.slane %v10356_v27, 3 }
 0x8bd   :  { %v10389_v46 = vsel %vm849_vm8, %v10332_v56, %v10382_v24  ;;  %v4029_v40 = vrot.slane %v10382_v24, 1  ;;  %7283 = vmatprep.mubr.msk.bf16.mxu0 %vm844_vm7, %v10382_v24  ;;  %7732 = vmatpush3.bf16.msra.mxu0 %v8141_v45  ;;  %v8142_v45 = vld [vmem:[%s11606_s7 + $0xf0] sm:$0xff]   ;;  %v4371_v29 = vrot.slane %v10382_v24, 2  ;;  %v8156_v24 = vld [vmem:[%s11606_s7 + $0x108] sm:$0xff]  }
 0x8be   :  { %v4026_v12 = vrot.slane %v10389_v46, 1  ;;  %v10396_v57 = vpop.permute.xlu0 %4011  ;;  %7733 = vmatprep.subr.bf16.mxu0 %v8143_v42 }
 0x8bf   :  { %v4033_v41 = vrot.slane %v10396_v57, 1  ;;  %v4030_v20 = vsel %vm74_vm3, %v4028_v2, %v4029_v40  ;;  %v10411_v52 = vsel %vm849_vm8, %v10328_v48, %v10396_v57  ;;  %v4372_v37 = vsel %vm11664_vm6, %v4370_v30, %v4371_v29  ;;  %v8197_v30 = vld [vmem:[%s11607_s8] ss:$8 sps:$4 sm:$0xff]  }
 0x8c0   :  { %7266 = vmatprep.mubr.msk.bf16.mxu1 %vm844_vm7, %v4030_v20  ;;  %v4027_v62 = vsel %vm74_vm3, %v4025_v51, %v4026_v12  ;;  %v4031_v8 = vrot.slane %v10411_v52, 1  ;;  %v4580_v48 = vsel %vm120_vm1, %v4577_v33, %v4579_v17  ;;  %v4368_v2 = vrot.slane %v10389_v46, 2  ;;  %v8185_v33 = vld [vmem:[%s11607_s8 + $0x20] ss:$8 sps:$4 sm:$0xff]   ;;  %v8200_v17 = vld [vmem:[%s11607_s8 + $0x110] ss:$8 sps:$4 sm:$0xff]  }
 0x8c1   :  { %4190 = vmatmul.mubr.bf16.vlgmr.msra.gmra.mxu1 %v4027_v62  ;;  %v4034_v14 = vsel %vm74_vm3, %v4029_v40, %v4033_v41  ;;  %7734 = vmatpush3.bf16.msra.mxu0 %v8143_v42  ;;  %v4585_v42 = vsel %vm120_vm1, %v4582_v34, %v4584_v63  ;;  %v4375_v40 = vrot.slane %v10396_v57, 2  ;;  %v4373_v41 = vrot.slane %v10411_v52, 2  ;;  %v8214_v63 = vld [vmem:[%s11607_s8 + $0x1f4] ss:$8 sps:$4 sm:$0xff]  }
 0x8c2   :  { %4500 = vmatpush1.bf16.msra.mxu1 %v8140_v58  ;;  %7267 = vmatprep.mubr.msk.bf16.mxu1 %vm844_vm7, %v4034_v14  ;;  %v4032_v55 = vsel %vm74_vm3, %v4026_v12, %v4031_v8  ;;  %v4367_v12 = vrot.slane %v10380_v44, 2 }
 0x8c3   :  { %4501 = vmatprep.subr.bf16.mxu1 %v8506_v26  ;;  %7735 = vmatprep.subr.bf16.mxu0 %v8145_v59  ;;  %v4376_v58 = vsel %vm11666_vm9, %v4371_v29, %v4375_v40  ;;  %v8196_v29 = vld [vmem:[%s11607_s8 + $0x124] ss:$8 sps:$4 sm:$0xff]   ;;  %vm11678_vm9 = vmmov %vm11667_vm4 }
 0x8c4   :  { %4343 = vmatmul.mubr.bf16.gmra.mxu0 %v10389_v46  ;;  %v4374_v46 = vsel %vm11667_vm4, %v4368_v2, %v4373_v41  ;;  %v8223_v40 = vld [vmem:[%s11607_s8 + $0xc4] ss:$8 sps:$4 sm:$0xff]   ;;  %v8229_v41 = vld [vmem:[%s11607_s8 + $0xb4] ss:$8 sps:$4 sm:$0xff]  }
 0x8c5   :  { %7736 = vmatpush3.bf16.msra.mxu0 %v8145_v59 }
 0x8c6   :  { %4502 = vmatpush1.bf16.msra.mxu1 %v8142_v45  ;;  %7737 = vmatprep.subr.bf16.mxu0 %v8147_v61 }
 0x8c7   :  { %4503 = vmatprep.subr.bf16.mxu1 %v8506_v26 }
 0x8c9   :  { %4198 = vmatmul.mubr.bf16.gmra.mxu1 %v4032_v55  ;;  %7738 = vmatpush3.bf16.msra.mxu0 %v8147_v61  ;;  %v8161_v55 = vld [vmem:[%s11607_s8 + $0x60] ss:$8 sps:$4 sm:$0xff]  }
 0x8ca   :  { %4504 = vmatpush1.bf16.msra.mxu1 %v8144_v36  ;;  %v10432_v16 = vpop.permute.xlu1 %3965  ;;  %7739 = vmatprep.subr.bf16.mxu0 %v8149_v19  ;;  %v8158_v36 = vld [vmem:[%s11607_s8 + $0x70] ss:$8 sps:$4 sm:$0xff]  }
 0x8cb   :  { %7284 = vmatprep.mubr.msk.bf16.mxu0 %vm844_vm7, %v10432_v16  ;;  %v10445_v5 = vsel %vm849_vm8, %v10348_v22, %v10432_v16  ;;  %4505 = vmatprep.subr.bf16.mxu1 %v8506_v26  ;;  %v4038_v18 = vrot.slane %v10432_v16, 1  ;;  %v8155_v22 = vld [vmem:[%s11606_s7 + $0x110] sm:$0xff]   ;;  %v4380_v59 = vrot.slane %v10432_v16, 2  ;;  %v8163_v16 = vld [vmem:[%s11607_s8 + $0x64] ss:$8 sps:$4 sm:$0xff]  }
 0x8cc   :  { %4351 = vmatmul.mubr.bf16.gmra.mxu0 %v10445_v5  ;;  %v10449_v54 = vpop.permute.xlu0 %3967  ;;  %v4035_v15 = vrot.slane %v10445_v5, 1  ;;  %v4377_v14 = vrot.slane %v10445_v5, 2  ;;  %v8167_v5 = vld [vmem:[%s11607_s8 + $0x50] ss:$8 sps:$4 sm:$0xff]  }
 0x8cd   :  { %v10455_v47 = vsel %vm849_vm8, %v10359_v4, %v10449_v54  ;;  %v4039_v53 = vrot.slane %v10449_v54, 1  ;;  %7285 = vmatprep.mubr.msk.bf16.mxu0 %vm844_vm7, %v10449_v54  ;;  %7740 = vmatpush3.bf16.msra.mxu0 %v8149_v19  ;;  %v4583_v4 = vsel %vm120_vm1, %v4581_v35, %v4582_v34  ;;  %v4381_v20 = vrot.slane %v10449_v54, 2  ;;  %v8160_v19 = vld [vmem:[%s11607_s8 + $0x74] ss:$8 sps:$4 sm:$0xff]   ;;  %v8208_v35 = vld [vmem:[%s11607_s8 + $0x104] ss:$8 sps:$4 sm:$0xff]  }
 0x8ce   :  { %4506 = vmatpush1.bf16.msra.mxu1 %v8146_v10  ;;  %v10461_v23 = vpop.permute.xlu1 %4013  ;;  %v4036_v39 = vrot.slane %v10455_v47, 1  ;;  %7741 = vmatprep.subr.bf16.mxu0 %v8151_v13  ;;  %v4378_v44 = vrot.slane %v10455_v47, 2  ;;  %v8164_v10 = vld [vmem:[%s11607_s8 + $0x170] ss:$8 sps:$4 sm:$0xff]   ;;  %v8169_v54 = vld [vmem:[%s11607_s8 + $0x54] ss:$8 sps:$4 sm:$0xff]  }
 0x8cf   :  { %v4043_v7 = vrot.slane %v10461_v23, 1  ;;  %v4040_v9 = vsel %vm74_vm3, %v4038_v18, %v4039_v53  ;;  %4507 = vmatprep.subr.bf16.mxu1 %v8506_v26  ;;  %v10476_v43 = vsel %vm849_vm8, %v10356_v27, %v10461_v23  ;;  %v8157_v27 = vld [vmem:[%s11606_s7 + $0x100] sm:$0xff]   ;;  %v4382_v57 = vsel %vm11668_vm11, %v4380_v59, %v4381_v20  ;;  %v8205_v34 = vld [vmem:[%s11607_s8 + $0xf4] ss:$8 sps:$4 sm:$0xff]   ;;  %vm11679_vm11 = vmmov %vm11661_vm2 }
 0x8d0   :  { %7268 = vmatprep.mubr.msk.bf16.mxu1 %vm844_vm7, %v4040_v9  ;;  %v4037_v6 = vsel %vm74_vm3, %v4035_v15, %v4036_v39  ;;  %v4041_v56 = vrot.slane %v10476_v43, 1  ;;  %v4385_v62 = vrot.slane %v10461_v23, 2  ;;  %v4379_v45 = vsel %vm11669_vm12, %v4377_v14, %v4378_v44  ;;  %v8170_v18 = vld [vmem:[%s11607_s8 + $0x160] ss:$8 sps:$4 sm:$0xff]   ;;  %v8175_v15 = vld [vmem:[%s11607_s8 + $0x44] ss:$8 sps:$4 sm:$0xff]   ;;  %vm11680_vm12 = vmmov %vm11661_vm2 }
 0x8d1   :  { %4206 = vmatmul.mubr.bf16.gmra.mxu1 %v4037_v6  ;;  %v4044_v50 = vsel %vm74_vm3, %v4039_v53, %v4043_v7  ;;  %7742 = vmatpush3.bf16.msra.mxu0 %v8151_v13  ;;  %v4383_v61 = vrot.slane %v10476_v43, 2  ;;  %v8166_v13 = vld [vmem:[%s11607_s8 + $0x174] ss:$8 sps:$4 sm:$0xff]   ;;  %v8173_v53 = vld [vmem:[%s11607_s8 + $0x40] ss:$8 sps:$4 sm:$0xff]  }
 0x8d2   :  { %4508 = vmatpush1.bf16.msra.mxu1 %v8148_v25  ;;  %7269 = vmatprep.mubr.msk.bf16.mxu1 %vm844_vm7, %v4044_v50  ;;  %v4042_v38 = vsel %vm74_vm3, %v4036_v39, %v4041_v56  ;;  %v4386_v52 = vsel %vm11670_vm13, %v4381_v20, %v4385_v62  ;;  %v8176_v23 = vld [vmem:[%s11607_s8 + $0x150] ss:$8 sps:$4 sm:$0xff]   ;;  %v8178_v39 = vld [vmem:[%s11607_s8 + $0x154] ss:$8 sps:$4 sm:$0xff]   ;;  %v8182_v9 = vld [vmem:[%s11607_s8 + $0x140] ss:$8 sps:$4 sm:$0xff]  }
 0x8d3   :  { %4509 = vmatprep.subr.bf16.mxu1 %v8506_v26  ;;  %v4384_v8 = vsel %vm11671_vm10, %v4378_v44, %v4383_v61  ;;  %5298 = vmatprep.subr.bf16.mxu0 %v8160_v19  ;;  %v8179_v25 = vld [vmem:[%s11607_s8 + $0x30] ss:$8 sps:$4 sm:$0xff]   ;;  %v8181_v7 = vld [vmem:[%s11607_s8 + $0x34] ss:$8 sps:$4 sm:$0xff]   ;;  %v8184_v6 = vld [vmem:[%s11607_s8 + $0x144] ss:$8 sps:$4 sm:$0xff]  }
 0x8d4   :  { %4359 = vmatmul.mubr.bf16.gmra.mxu0 %v10455_v47  ;;  %v8172_v47 = vld [vmem:[%s11607_s8 + $0x164] ss:$8 sps:$4 sm:$0xff]   ;;  %v8188_v50 = vld [vmem:[%s11607_s8 + $0x130] ss:$8 sps:$4 sm:$0xff]   ;;  %v8193_v56 = vld [vmem:[%s11607_s8 + $0x14] ss:$8 sps:$4 sm:$0xff]  }
 0x8d5   :  { %7743 = vmatprep.mubr.msk.bf16.mxu0 %vm849_vm8, %v4578_v28  ;;  %v8187_v43 = vld [vmem:[%s11607_s8 + $0x24] ss:$8 sps:$4 sm:$0xff]   ;;  %v8194_v28 = vld [vmem:[%s11607_s8 + $0x120] ss:$8 sps:$4 sm:$0xff]   ;;  %v8236_v44 = vld [vmem:[%s11607_s8 + $0x1b0] ss:$8 sps:$4 sm:$0xff]  }
 0x8d6   :  { %4510 = vmatpush1.bf16.msra.mxu1 %v8150_v31  ;;  %v8190_v31 = vld [vmem:[%s11607_s8 + $0x134] ss:$8 sps:$4 sm:$0xff]   ;;  %v8230_v20 = vld [vmem:[%s11607_s8 + $0x1c0] ss:$8 sps:$4 sm:$0xff]   ;;  %v8232_v59 = vld [vmem:[%s11607_s8 + $0x1c4] ss:$8 sps:$4 sm:$0xff]  }
 0x8d7   :  { %4511 = vmatprep.subr.bf16.mxu1 %v8506_v26  ;;  %v8238_v62 = vld [vmem:[%s11607_s8 + $0x1b4] ss:$8 sps:$4 sm:$0xff]   ;;  %v8239_v14 = vld [vmem:[%s11607_s8 + $0x90] ss:$8 sps:$4 sm:$0xff]   ;;  %v8247_v61 = vld [vmem:[%s11607_s8 + $0x84] ss:$8 sps:$4 sm:$0xff]  }
 0x8d8   :  { %v8248_v19 = vld [vmem:[%s11607_s8 + $0x190] ss:$8 sps:$4 sm:$0xff]   ;;  %vm11681_vm13 = vmmov %vm11667_vm4  ;;  %vm11683_vm10 = vcmask 1043456  }
 0x8d9   :  { %4214 = vmatmul.mubr.bf16.gmra.mxu1 %v4042_v38  ;;  %v8202_v38 = vld [vmem:[%s11607_s8 + $0x114] ss:$8 sps:$4 sm:$0xff]  }
 0x8da   :  { %4512 = vmatpush1.bf16.msra.mxu1 %v8152_v11  ;;  %7298 = vmatprep.mubr.msk.bf16.mxu1 %vm844_vm7, %v4372_v37  ;;  %v8199_v11 = vld [vmem:[%s11607_s8 + $0x4] ss:$8 sps:$4 sm:$0xff]   ;;  %v8203_v37 = vld [vmem:[%s11607_s8 + $0xf0] ss:$8 sps:$4 sm:$0xff]  }
 0x8db   :  { %4513 = vmatprep.subr.bf16.mxu1 %v8506_v26 }
 0x8dc   :  { %7744 = vmatmul.mubr.msk.bf16.vlgmr.msra.gmra.mxu0 %vm849_vm8, %v4580_v48  ;;  %v8209_v48 = vld [vmem:[%s11607_s8 + $0xe0] ss:$8 sps:$4 sm:$0xff]  }
 0x8dd   :  { %7747 = vmatprep.mubr.msk.bf16.mxu0 %vm849_vm8, %v4583_v4  ;;  %5299 = vmatpush1.bf16.msra.mxu0 %v8158_v36  ;;  %v8211_v4 = vld [vmem:[%s11607_s8 + $0xe4] ss:$8 sps:$4 sm:$0xff]   ;;  %v8245_v36 = vld [vmem:[%s11607_s8 + $0x80] ss:$8 sps:$4 sm:$0xff]  }
 0x8de   :  { %4514 = vmatpush1.bf16.msra.mxu1 %v8153_v32  ;;  %5300 = vmatprep.subr.bf16.mxu0 %v8163_v16  ;;  %v8206_v32 = vld [vmem:[%s11607_s8 + $0x100] ss:$8 sps:$4 sm:$0xff]   ;;  %v8253_v16 = vld [vmem:[%s11607_s8 + $0x374] ss:$8 sps:$4 sm:$0xff]  }
 0x8df   :  { %4523 = vmatprep.subr.bf16.mxu1 %v8506_v26 }
 0x8e1   :  { %5301 = vmatpush1.bf16.msra.mxu0 %v8161_v55  ;;  %v8250_v55 = vld [vmem:[%s11607_s8 + $0x194] ss:$8 sps:$4 sm:$0xff]  }
 0x8e2   :  { %4524 = vmatpush2.bf16.msra.mxu1 %v8154_v49  ;;  %5302 = vmatprep.subr.bf16.mxu0 %v8169_v54  ;;  %v8212_v49 = vld [vmem:[%s11607_s8 + $0x1f0] ss:$8 sps:$4 sm:$0xff]  }
 0x8e3   :  { %4525 = vmatprep.subr.bf16.mxu1 %v8506_v26 }
 0x8e4   :  { %7748 = vmatmul.mubr.msk.bf16.gmra.mxu0 %vm849_vm8, %v4585_v42  ;;  %vm11665_vm8 = vmmov %vm11664_vm6  ;;  %v8217_v42 = vld [vmem:[%s11607_s8 + $0xd4] ss:$8 sps:$4 sm:$0xff]  }
 0x8e5   :  { %v4369_v51 = vsel %vm11665_vm8, %v4367_v12, %v4368_v2  ;;  %5303 = vmatpush1.bf16.msra.mxu0 %v8167_v5  ;;  %v8221_v2 = vld [vmem:[%s11607_s8 + $0xc0] ss:$8 sps:$4 sm:$0xff]   ;;  %v8224_v12 = vld [vmem:[%s11607_s8 + $0x1d0] ss:$8 sps:$4 sm:$0xff]   ;;  %v8262_v5 = vld [vmem:[%s11607_s8 + $0x274] ss:$8 sps:$4 sm:$0xff]  }
 0x8e6   :  { %4526 = vmatpush2.bf16.msra.mxu1 %v8155_v22  ;;  %5304 = vmatprep.subr.bf16.mxu0 %v8175_v15  ;;  %v8215_v22 = vld [vmem:[%s11607_s8 + $0xd0] ss:$8 sps:$4 sm:$0xff]   ;;  %vm10782_vm6 = vmneg %vm11674_vm5 }
 0x8e7   :  { %4527 = vmatprep.subr.bf16.mxu1 %v8506_v26  ;;  %vm11677_vm8 = vmmov %vm11661_vm2 }
 0x8e9   :  { %5305 = vmatpush1.bf16.msra.mxu0 %v8173_v53 }
 0x8ea   :  { %4528 = vmatpush2.bf16.msra.mxu1 %v8156_v24  ;;  %5306 = vmatprep.subr.bf16.mxu0 %v8181_v7  ;;  %v8218_v24 = vld [vmem:[%s11607_s8 + $0x1e0] ss:$8 sps:$4 sm:$0xff]  }
 0x8eb   :  { %4529 = vmatprep.subr.bf16.mxu1 %v8506_v26 }
 0x8ed   :  { %5307 = vmatpush1.bf16.msra.mxu0 %v8179_v25 }
 0x8ee   :  { %4530 = vmatpush2.bf16.msra.mxu1 %v8157_v27  ;;  %5308 = vmatprep.subr.bf16.mxu0 %v8187_v43  ;;  %v8220_v27 = vld [vmem:[%s11607_s8 + $0x1e4] ss:$8 sps:$4 sm:$0xff]  }
 0x8ef   :  { %5065 = vmatprep.subr.bf16.mxu1 %v8166_v13  ;;  %v8254_v13 = vld [vmem:[%s11607_s8 + $0x180] ss:$8 sps:$4 sm:$0xff]  }
 0x8f1   :  { %4532 = vmatmul.mubr.bf16.vlgmr.msra.gmra.mxu1 %v4369_v51  ;;  %5309 = vmatpush1.bf16.msra.mxu0 %v8185_v33  ;;  %v8226_v51 = vld [vmem:[%s11607_s8 + $0x1d4] ss:$8 sps:$4 sm:$0xff]  }
 0x8f2   :  { %7299 = vmatprep.mubr.msk.bf16.mxu1 %vm844_vm7, %v4376_v58  ;;  %5066 = vmatpush1.bf16.msra.mxu1 %v8164_v10  ;;  %v8227_v58 = vld [vmem:[%s11607_s8 + $0xb0] ss:$8 sps:$4 sm:$0xff]   ;;  %v8256_v10 = vld [vmem:[%s11607_s8 + $0x184] ss:$8 sps:$4 sm:$0xff]  }
 0x8f3   :  { %5067 = vmatprep.subr.bf16.mxu1 %v8172_v47  ;;  %5310 = vmatprep.subr.bf16.mxu0 %v8193_v56 }
 0x8f5   :  { %5311 = vmatpush1.bf16.msra.mxu0 %v8191_v3 }
 0x8f6   :  { %5068 = vmatpush1.bf16.msra.mxu1 %v8170_v18  ;;  %5312 = vmatprep.subr.bf16.mxu0 %v8199_v11 }
 0x8f7   :  { %5069 = vmatprep.subr.bf16.mxu1 %v8178_v39 }
 0x8f9   :  { %4540 = vmatmul.mubr.bf16.gmra.mxu1 %v4374_v46  ;;  %5313 = vmatpush1.bf16.msra.mxu0 %v8197_v30  ;;  %v8233_v46 = vld [vmem:[%s11607_s8 + $0xa0] ss:$8 sps:$4 sm:$0xff]  }
 0x8fa   :  { %7300 = vmatprep.mubr.msk.bf16.mxu1 %vm844_vm7, %v4382_v57  ;;  %5070 = vmatpush1.bf16.msra.mxu1 %v8176_v23  ;;  %v8235_v57 = vld [vmem:[%s11607_s8 + $0xa4] ss:$8 sps:$4 sm:$0xff]  }
 0x8fb   :  { %5071 = vmatprep.subr.bf16.mxu1 %v8184_v6  ;;  %5314 = vmatprep.subr.bf16.mxu0 %v8205_v34 }
 0x8fd   :  { %5315 = vmatpush2.bf16.msra.mxu0 %v8203_v37 }
 0x8fe   :  { %5072 = vmatpush1.bf16.msra.mxu1 %v8182_v9  ;;  %5316 = vmatprep.subr.bf16.mxu0 %v8211_v4 }
 0x8ff   :  { %5073 = vmatprep.subr.bf16.mxu1 %v8190_v31 }
 0x901   :  { %4548 = vmatmul.mubr.bf16.gmra.mxu1 %v4379_v45  ;;  %5317 = vmatpush2.bf16.msra.mxu0 %v8209_v48  ;;  %v8241_v45 = vld [vmem:[%s11607_s8 + $0x94] ss:$8 sps:$4 sm:$0xff]  }
 0x902   :  { %7301 = vmatprep.mubr.msk.bf16.mxu1 %vm844_vm7, %v4386_v52  ;;  %5074 = vmatpush1.bf16.msra.mxu1 %v8188_v50  ;;  %v8244_v52 = vld [vmem:[%s11607_s8 + $0x1a4] ss:$8 sps:$4 sm:$0xff]   ;;  %vm11672_vm7 = vmmov %vm11661_vm2 }
 0x903   :  { %5075 = vmatprep.subr.bf16.mxu1 %v8196_v29  ;;  %5318 = vmatprep.subr.bf16.mxu0 %v8217_v42 }
 0x905   :  { %5319 = vmatpush2.bf16.msra.mxu0 %v8215_v22 }
 0x906   :  { %5076 = vmatpush1.bf16.msra.mxu1 %v8194_v28  ;;  %5320 = vmatprep.subr.bf16.mxu0 %v8223_v40 }
 0x907   :  { %5077 = vmatprep.subr.bf16.mxu1 %v8202_v38 }
 0x909   :  { %4556 = vmatmul.mubr.bf16.gmra.mxu1 %v4384_v8  ;;  %5321 = vmatpush2.bf16.msra.mxu0 %v8221_v2  ;;  %v8242_v8 = vld [vmem:[%s11607_s8 + $0x1a0] ss:$8 sps:$4 sm:$0xff]  }
 0x90a   :  { %5078 = vmatpush1.bf16.msra.mxu1 %v8200_v17  ;;  %5322 = vmatprep.subr.bf16.mxu0 %v8229_v41 }
 0x90b   :  { %5079 = vmatprep.subr.bf16.mxu1 %v8208_v35 }
 0x90d   :  { %5323 = vmatpush2.bf16.msra.mxu0 %v8227_v58 }
 0x90e   :  { %5080 = vmatpush1.bf16.msra.mxu1 %v8206_v32  ;;  %5324 = vmatprep.subr.bf16.mxu0 %v8235_v57 }
 0x90f   :  { %5081 = vmatprep.subr.bf16.mxu1 %v8214_v63 }
 0x911   :  { %5325 = vmatpush2.bf16.msra.mxu0 %v8233_v46 }
 0x912   :  { %5082 = vmatpush2.bf16.msra.mxu1 %v8212_v49  ;;  %5326 = vmatprep.subr.bf16.mxu0 %v8241_v45 }
 0x913   :  { %5083 = vmatprep.subr.bf16.mxu1 %v8220_v27 }
 0x915   :  { %5327 = vmatpush2.bf16.msra.mxu0 %v8239_v14 }
 0x916   :  { %5084 = vmatpush2.bf16.msra.mxu1 %v8218_v24  ;;  %5328 = vmatprep.subr.bf16.mxu0 %v8247_v61 }
 0x917   :  { %5085 = vmatprep.subr.bf16.mxu1 %v8226_v51 }
 0x919   :  { %5329 = vmatpush2.bf16.msra.mxu0 %v8245_v36 }
 0x91a   :  { %5086 = vmatpush2.bf16.msra.mxu1 %v8224_v12  ;;  %5900 = vmatprep.subr.bf16.mxu0 %v8253_v16 }
 0x91b   :  { %5087 = vmatprep.subr.bf16.mxu1 %v8232_v59 }
 0x91e   :  { %5088 = vmatpush2.bf16.msra.mxu1 %v8230_v20  ;;  %v10753_v20 = vld [vmem:[%s11599_s11 + $0x7] ss:$0 sm:$0xff] }
 0x91f   :  { %5089 = vmatprep.subr.bf16.mxu1 %v8238_v62 }
 0x922   :  { %5090 = vmatpush2.bf16.msra.mxu1 %v8236_v44 }
 0x923   :  { %5091 = vmatprep.subr.bf16.mxu1 %v8244_v52 }
 0x926   :  { %5092 = vmatpush2.bf16.msra.mxu1 %v8242_v8 }
 0x927   :  { %5093 = vmatprep.subr.bf16.mxu1 %v8250_v55 }
 0x92a   :  { %5094 = vmatpush2.bf16.msra.mxu1 %v8248_v19 }
 0x92b   :  { %5095 = vmatprep.subr.bf16.mxu1 %v8256_v10 }
 0x92e   :  { %5096 = vmatpush2.bf16.msra.mxu1 %v8254_v13 }
 0x92f   :  { %5591 = vmatprep.subr.bf16.mxu1 %v8262_v5 }
 0x97c   :  { %v4336_v54 = vpop.f32.mrf.mxu0 }
 0x97e   :  { %v4338_v18 = vpop.f32.mrf.mxu0 }
 0x980   :  { %v4339_v47 = vpop.f32.mrf.mxu0 }
 0x981   :  { %v4191_v53 = vpop.f32.mrf.mxu1 }
 0x982   :  { %v4341_v15 = vpop.f32.mrf.mxu0  ;;  %v4337_v27 = vadd.f32 %v4336_v54, %v4191_v53 }
 0x983   :  { %v4193_v23 = vpop.f32.mrf.mxu1 }
 0x984   :  { %v4344_v39 = vpop.f32.mrf.mxu0 }
 0x985   :  { %v4194_v25 = vpop.f32.mrf.mxu1 }
 0x986   :  { %v4346_v7 = vpop.f32.mrf.mxu0  ;;  %v4340_v58 = vadd.f32 %v4339_v47, %v4194_v25 }
 0x987   :  { %v4196_v9 = vpop.f32.mrf.mxu1 }
 0x988   :  { %v4347_v6 = vpop.f32.mrf.mxu0 }
 0x989   :  { %v4199_v33 = vpop.f32.mrf.mxu1 }
 0x98a   :  { %v4349_v43 = vpop.f32.mrf.mxu0  ;;  %v4345_v62 = vadd.f32 %v4344_v39, %v4199_v33 }
 0x98b   :  { %v4201_v50 = vpop.f32.mrf.mxu1 }
 0x98c   :  { %v4352_v31 = vpop.f32.mrf.mxu0 }
 0x98d   :  { %v4202_v3 = vpop.f32.mrf.mxu1 }
 0x98e   :  { %v4354_v56 = vpop.f32.mrf.mxu0  ;;  %v4348_v55 = vadd.f32 %v4347_v6, %v4202_v3 }
 0x98f   :  { %v4204_v28 = vpop.f32.mrf.mxu1 }
 0x990   :  { %v4355_v29 = vpop.f32.mrf.mxu0 }
 0x991   :  { %v4207_v11 = vpop.f32.mrf.mxu1 }
 0x992   :  { %v4357_v30 = vpop.f32.mrf.mxu0  ;;  %v4353_v15 = vadd.f32 %v4352_v31, %v4207_v11 }
 0x993   :  { %v4209_v17 = vpop.f32.mrf.mxu1 }
 0x994   :  { %v4360_v38 = vpop.f32.mrf.mxu0 }
 0x995   :  { %v4210_v34 = vpop.f32.mrf.mxu1 }
 0x996   :  { %v4362_v37 = vpop.f32.mrf.mxu0  ;;  %v4356_v43 = vadd.f32 %v4355_v29, %v4210_v34 }
 0x997   :  { %v4212_v32 = vpop.f32.mrf.mxu1 }
 0x998   :  { %v10746_v35 = vpop.f32.mrf.mxu0 }
 0x999   :  { %v4215_v48 = vpop.f32.mrf.mxu1 }
 0x99a   :  { %v4365_v4 = vpop.f32.mrf.mxu0  ;;  %v4361_v32 = vadd.f32 %v4360_v38, %v4215_v48 }
 0x99b   :  { %v4217_v49 = vpop.f32.mrf.mxu1 }
 0x99c   :  { %v7745_v42 = vpop.f32.mrf.mxu0 }
 0x99d   :  { %v10748_v63 = vpop.f32.mrf.mxu1 }
 0x99e   :  { %v4680_v24 = vpop.f32.mrf.mxu0  ;;  %v4364_v38 = vadd.f32 %v10746_v35, %v10748_v63  ;;  %v8251_v35 = vld [vmem:[%s11607_s8 + $0x370] ss:$8 sps:$4 sm:$0xff]  }
 0x99f   :  { %v4220_v22 = vpop.f32.mrf.mxu1 }
 0x9a0   :  { %v7746_v12 = vpop.f32.mrf.mxu0 }
 0x9a2   :  { %v4683_v57 = vpop.f32.mrf.mxu0 }
 0x9a4   :  { %v7749_v36 = vpop.f32.mrf.mxu0 }
 0x9a6   :  { %v4696_v47 = vpop.f32.mrf.mxu0 }
 0x9a8   :  { %v7750_v50 = vpop.f32.mrf.mxu0 }
 0x9aa   :  { %v4699_v4 = vpop.f32.mrf.mxu0 }
 0x9b1   :  { %v4533_v2 = vpop.f32.mrf.mxu1 }
 0x9b2   :  { %v4564_v40 = vadd.f32 %v4533_v2, %v4337_v27 }
 0x9b3   :  { %v4535_v51 = vpop.f32.mrf.mxu1 }
 0x9b4   :  { %v4711_v41 = vadd.f32 %v4680_v24, %v4564_v40 }
 0x9b5   :  { %v4536_v59 = vpop.f32.mrf.mxu1 }
 0x9b6   :  { %v4565_v46 = vadd.f32 %v4536_v59, %v4340_v58  ;;  %v4719_v14 = vadd.f32 %v4711_v41, %v10753_v20 }
 0x9b7   :  { %v4538_v44 = vpop.f32.mrf.mxu1 }
 0x9b8   :  { %v4712_v45 = vadd.f32 %v4683_v57, %v4565_v46  ;;  %v4727_v16 = vmax.f32 %v4719_v14, 0.0 }
 0x9b9   :  { %v4541_v52 = vpop.f32.mrf.mxu1 }
 0x9ba   :  { %v4720_v61 = vadd.f32 %v4712_v45, %v10753_v20  ;;  %v4566_v8 = vadd.f32 %v4541_v52, %v4345_v62 }
 0x9bb   :  { %v4543_v19 = vpop.f32.mrf.mxu1 }
 0x9bc   :  { %v4728_v10 = vmax.f32 %v4720_v61, 0.0  ;;  %v4713_v13 = vadd.f32 %v7745_v42, %v4566_v8 }
 0x9bd   :  { %v4544_v5 = vpop.f32.mrf.mxu1 }
 0x9be   :  { %v4735_v54 = vpack.c.bf16 %v4728_v10, %v4727_v16  ;;  %v4567_v18 = vadd.f32 %v4544_v5, %v4348_v55  ;;  %v4721_v39 = vadd.f32 %v4713_v13, %v10753_v20  ;;  %v8259_v13 = vld [vmem:[%s11607_s8 + $0x364] ss:$8 sps:$4 sm:$0xff]  }
 0x9bf   :  { %v4546_v53 = vpop.f32.mrf.mxu1 }
 0x9c0   :  { %v4745_v23 = vrot.slane %v4735_v54, 6  ;;  %v4714_v25 = vadd.f32 %v7746_v12, %v4567_v18  ;;  %v4729_v56 = vmax.f32 %v4721_v39, 0.0 }
 0x9c1   :  { %v4549_v7 = vpop.f32.mrf.mxu1 }
 0x9c2   :  { %v10759_v9 = vsel %vm11672_vm7, 0, %v4745_v23  ;;  %v4722_v33 = vadd.f32 %v4714_v25, %v10753_v20  ;;  %v4568_v6 = vadd.f32 %v4549_v7, %v4353_v15  ;;  %v8257_v15 = vld [vmem:[%s11607_s8 + $0x360] ss:$8 sps:$4 sm:$0xff]   ;;  %vm11684_vm7 = vmmov %vm11683_vm10 }
 0x9c3   :  { %v4551_v3 = vpop.f32.mrf.mxu1  ;;  %v4765_v17 = vshll.u32 %v10759_v9, 16  ;;  %v4763_v29 = vshrl.u32 %v10759_v9, 16 }
 0x9c4   :  { %v4730_v28 = vmax.f32 %v4722_v33, 0.0  ;;  %v4715_v30 = vadd.f32 %v4696_v47, %v4568_v6  ;;  %v4845_v3 = vrot.slane %v10759_v9, 1 }
 0x9c5   :  { %v4552_v31 = vpop.f32.mrf.mxu1  ;;  %v4767_v27 = vrot.slane %v4765_v17, 1 }
 0x9c6   :  { %v4736_v11 = vpack.c.bf16 %v4730_v28, %v4729_v56  ;;  %v4569_v37 = vadd.f32 %v4552_v31, %v4356_v43  ;;  %v4723_v42 = vadd.f32 %v4715_v30, %v10753_v20  ;;  %v8260_v43 = vld [vmem:[%s11607_s8 + $0x270] ss:$8 sps:$4 sm:$0xff]   ;;  %v8265_v56 = vld [vmem:[%s11607_s8 + $0x354] ss:$8 sps:$4 sm:$0xff]   ;;  %v5680_v28 = vrot.slane %v10759_v9, 3 }
 0x9c7   :  { %v4554_v49 = vpop.f32.mrf.mxu1  ;;  %v4768_v44 = vor.u32 %v4767_v27, %v4763_v29  ;;  %v8271_v29 = vld [vmem:[%s11607_s8 + $0x344] ss:$8 sps:$4 sm:$0xff]  }
 0x9c8   :  { %v4746_v22 = vrot.slane %v4736_v11, 6  ;;  %v4716_v24 = vadd.f32 %v4699_v4, %v4569_v37  ;;  %v4731_v59 = vmax.f32 %v4723_v42, 0.0  ;;  %v8268_v11 = vld [vmem:[%s11607_s8 + $0x264] ss:$8 sps:$4 sm:$0xff]   ;;  %v5371_v37 = vrot.slane %v10759_v9, 2 }
 0x9c9   :  { %v4557_v2 = vpop.f32.mrf.mxu1  ;;  %v8263_v42 = vld [vmem:[%s11607_s8 + $0x350] ss:$8 sps:$4 sm:$0xff]  }
 0x9ca   :  { %v10766_v34 = vsel %vm11673_vm15, %v4745_v23, %v4746_v22  ;;  %v10769_v40 = vsel %vm11661_vm2, %v4746_v22, 0  ;;  %v4724_v12 = vadd.f32 %v4716_v24, %v10753_v20  ;;  %v4570_v51 = vadd.f32 %v4557_v2, %v4361_v32  ;;  %v8266_v24 = vld [vmem:[%s11607_s8 + $0x260] ss:$8 sps:$4 sm:$0xff]   ;;  %vm11685_vm15 = vmmov %vm11684_vm7 }
 0x9cb   :  { %v4559_v48 = vpop.f32.mrf.mxu1  ;;  %v4770_v58 = vshll.u32 %v10766_v34, 16  ;;  %v4777_v41 = vshll.u32 %v10769_v40, 16  ;;  %v4774_v45 = vshrl.u32 %v10766_v34, 16  ;;  %v4835_v61 = vshrl.u32 %v10769_v40, 16  ;;  %vm11686_vm2 = vmmov %vm11684_vm7 }
 0x9cc   :  { %v4732_v46 = vmax.f32 %v4724_v12, 0.0  ;;  %v4717_v57 = vadd.f32 %v7749_v36, %v4570_v51  ;;  %v4846_v47 = vrot.slane %v10766_v34, 1  ;;  %v5681_v25 = vrot.slane %v10766_v34, 3 }
 0x9cd   :  { %v4560_v62 = vpop.f32.mrf.mxu1  ;;  %v4772_v14 = vrot.slane %v4770_v58, 1  ;;  %v4779_v52 = vrot.slane %v4777_v41, 1  ;;  %v5372_v7 = vrot.slane %v10766_v34, 2  ;;  %v5686_v2 = vrot.slane %v10769_v40, 3  ;;  %v8274_v58 = vld [vmem:[%s11607_s8 + $0x254] ss:$8 sps:$4 sm:$0xff]  }
 0x9ce   :  { %v4737_v8 = vpack.c.bf16 %v4732_v46, %v4731_v59  ;;  %v4571_v19 = vadd.f32 %v4560_v62, %v4364_v38  ;;  %v4725_v54 = vadd.f32 %v4717_v57, %v10753_v20  ;;  %v4847_v32 = vsel %vm74_vm3, %v4845_v3, %v4846_v47  ;;  %v8269_v62 = vld [vmem:[%s11607_s8 + $0x340] ss:$8 sps:$4 sm:$0xff]  }
 0x9cf   :  { %v4562_v36 = vpop.f32.mrf.mxu1  ;;  %v10787_v55 = vsel %vm458_vm0, %v4768_v44, %v4772_v14  ;;  %v4776_v16 = vor.u32 %v4774_v45, %v4772_v14  ;;  %v10789_v10 = vor.u32 %v4835_v61, %v4779_v52  ;;  %v10834_v4 = vsel %vm120_vm1, %v5680_v28, %v5681_v25  ;;  %v8272_v14 = vld [vmem:[%s11607_s8 + $0x250] ss:$8 sps:$4 sm:$0xff]   ;;  %v8278_v3 = vld [vmem:[%s11607_s8 + $0x240] ss:$8 sps:$4 sm:$0xff]   ;;  %v8283_v28 = vld [vmem:[%s11607_s8 + $0x324] ss:$8 sps:$4 sm:$0xff]  }
 0x9d0   :  { %v10794_v5 = vrot.slane %v4737_v8, 6  ;;  %v4718_v18 = vadd.f32 %v7750_v50, %v4571_v19  ;;  %5330 = vmatprep.mubr.bf16.mxu0 %v10787_v55  ;;  %v4848_v39 = vrot.slane %v10787_v55, 1  ;;  %v4733_v30 = vmax.f32 %v4725_v54, 0.0  ;;  %v8277_v8 = vld [vmem:[%s11607_s8 + $0x334] ss:$8 sps:$4 sm:$0xff]  }
 0x9d1   :  { %7378 = vmatmul.mubr.msk.bf16.vlgmr.msra.gmra.mxu0 %vm10782_vm6, %v4745_v23  ;;  %v10802_v53 = vsel %vm458_vm0, %v4776_v16, %v4779_v52  ;;  %v4853_v50 = vrot.slane %v10789_v10, 1  ;;  %v10844_v27 = vsel %vm11678_vm9, %v5371_v37, %v5372_v7  ;;  %v4851_v12 = vrot.slane %v10769_v40, 1 }
 0x9d2   :  { %v10812_v33 = vsel %vm11677_vm8, 0, %v10794_v5  ;;  %v4726_v6 = vadd.f32 %v4718_v18, %v10753_v20  ;;  %5901 = vmatpush1.bf16.msra.mxu0 %v8251_v35  ;;  %5340 = vmatprep.mubr.bf16.mxu0 %v10802_v53  ;;  %v4849_v23 = vrot.slane %v10802_v53, 1  ;;  %v5377_v38 = vrot.slane %v10769_v40, 2  ;;  %v8280_v35 = vld [vmem:[%s11607_s8 + $0x244] ss:$8 sps:$4 sm:$0xff]  }
 0x9d3   :  { %5902 = vmatprep.subr.bf16.mxu0 %v8259_v13  ;;  %v4783_v20 = vshll.u32 %v10812_v33, 16  ;;  %v10856_v41 = vsel %vm120_vm1, %v5681_v25, %v5686_v2  ;;  %v4781_v59 = vshrl.u32 %v10812_v33, 16  ;;  %v4852_v45 = vsel %vm74_vm3, %v4846_v47, %v4851_v12  ;;  %v8275_v25 = vld [vmem:[%s11607_s8 + $0x330] ss:$8 sps:$4 sm:$0xff]  }
 0x9d4   :  { %v4734_v17 = vmax.f32 %v4726_v6, 0.0  ;;  %v4850_v31 = vsel %vm74_vm3, %v4848_v39, %v4849_v23  ;;  %v4854_v22 = vsel %vm74_vm3, %v4849_v23, %v4853_v50  ;;  %v10861_v46 = vsel %vm11667_vm4, %v5372_v7, %v5377_v38 }
 0x9d5   :  { %5097 = vmatprep.mubr.bf16.mxu1 %v4850_v31  ;;  %v4785_v51 = vrot.slane %v4783_v20, 1  ;;  %v5690_v36 = vrot.slane %v10812_v33, 3  ;;  %v5381_v13 = vrot.slane %v10812_v33, 2  ;;  %v5990_v23 = vrot.slane %v10766_v34, 4 }
 0x9d6   :  { %v4738_v49 = vpack.c.bf16 %v4734_v17, %v4733_v30  ;;  %5903 = vmatpush1.bf16.msra.mxu0 %v8257_v15  ;;  %5098 = vmatmul.mubr.bf16.vlgmr.msra.gmra.mxu1 %v4847_v32  ;;  %v4855_v30 = vrot.slane %v10812_v33, 1  ;;  %v5989_v31 = vrot.slane %v10759_v9, 4  ;;  %v8281_v9 = vld [vmem:[%s11607_s8 + $0x320] ss:$8 sps:$4 sm:$0xff]  }
 0x9d7   :  { %5592 = vmatpush1.bf16.msra.mxu1 %v8260_v43  ;;  %5107 = vmatprep.mubr.bf16.mxu1 %v4854_v22  ;;  %v4786_v52 = vor.u32 %v4785_v51, %v4781_v59  ;;  %v5992_v43 = vrot.slane %v10769_v40, 4  ;;  %v8286_v40 = vld [vmem:[%s11607_s8 + $0x234] ss:$8 sps:$4 sm:$0xff]   ;;  %v5994_v51 = vrot.slane %v10812_v33, 4 }
 0x9d8   :  { %v4749_v48 = vrot.slane %v4738_v49, 6  ;;  %5904 = vmatprep.subr.bf16.mxu0 %v8265_v56  ;;  %5593 = vmatprep.subr.bf16.mxu1 %v8268_v11 }
 0x9d9   :  { %5341 = vmatmul.mubr.bf16.gmra.mxu0 %v10766_v34  ;;  %v10950_v12 = vsel %vm11684_vm7, %v5990_v23, %v5992_v43  ;;  %v8305_v43 = vld [vmem:[%s11607_s8 + $0x3e0] ss:$8 sps:$4 sm:$0xff]  }
 0x9da   :  { %v10865_v57 = vsel %vm11679_vm11, %v10794_v5, %v4749_v48  ;;  %v10868_v44 = vsel %vm11680_vm12, %v4749_v48, 0  ;;  %5905 = vmatpush1.bf16.msra.mxu0 %v8263_v42  ;;  %v8289_v48 = vld [vmem:[%s11607_s8 + $0x314] ss:$8 sps:$4 sm:$0xff]  }
 0x9db   :  { %5594 = vmatpush1.bf16.msra.mxu1 %v8266_v24  ;;  %5906 = vmatprep.subr.bf16.mxu0 %v8271_v29  ;;  %v4788_v61 = vshll.u32 %v10865_v57, 16  ;;  %v4795_v19 = vshll.u32 %v10868_v44, 16  ;;  %v5691_v16 = vrot.slane %v10865_v57, 3  ;;  %v5382_v54 = vrot.slane %v10865_v57, 2  ;;  %v8284_v24 = vld [vmem:[%s11607_s8 + $0x230] ss:$8 sps:$4 sm:$0xff]  }
 0x9dc   :  { %5595 = vmatprep.subr.bf16.mxu1 %v8274_v58  ;;  %v4792_v47 = vshrl.u32 %v10865_v57, 16  ;;  %v4838_v39 = vshrl.u32 %v10868_v44, 16  ;;  %v5696_v6 = vrot.slane %v10868_v44, 3  ;;  %v5387_v34 = vrot.slane %v10868_v44, 2  ;;  %v8292_v58 = vld [vmem:[%s11607_s8 + $0x224] ss:$8 sps:$4 sm:$0xff]  }
 0x9dd   :  { %v4790_v18 = vrot.slane %v4788_v61, 1  ;;  %v4797_v15 = vrot.slane %v4795_v19, 1  ;;  %v10895_v7 = vsel %vm120_vm1, %v5690_v36, %v5691_v16  ;;  %v10918_v17 = vsel %vm11681_vm13, %v5381_v13, %v5382_v54  ;;  %v8290_v61 = vld [vmem:[%s11607_s8 + $0x220] ss:$8 sps:$4 sm:$0xff]   ;;  %v8295_v19 = vld [vmem:[%s11607_s8 + $0x304] ss:$8 sps:$4 sm:$0xff]  }
 0x9de   :  { %5907 = vmatpush1.bf16.msra.mxu0 %v8269_v62  ;;  %5108 = vmatmul.mubr.bf16.gmra.mxu1 %v4852_v45  ;;  %v4856_v37 = vrot.slane %v10865_v57, 1  ;;  %v5995_v32 = vrot.slane %v10865_v57, 4  ;;  %v5997_v49 = vrot.slane %v10868_v44, 4  ;;  %v10938_v42 = vsel %vm120_vm1, %v5691_v16, %v5696_v6  ;;  %v8293_v13 = vld [vmem:[%s11607_s8 + $0x300] ss:$8 sps:$4 sm:$0xff]  }
 0x9df   :  { %5596 = vmatpush1.bf16.msra.mxu1 %v8272_v14  ;;  %v10901_v50 = vsel %vm458_vm0, %v4786_v52, %v4790_v18  ;;  %5908 = vmatprep.subr.bf16.mxu0 %v8277_v8  ;;  %v4794_v56 = vor.u32 %v4792_v47, %v4790_v18  ;;  %v10906_v20 = vor.u32 %v4838_v39, %v4797_v15  ;;  %v5684_v62 = vrot.slane %v10802_v53, 3  ;;  %v8287_v52 = vld [vmem:[%s11607_s8 + $0x310] ss:$8 sps:$4 sm:$0xff]   ;;  %v8304_v47 = vld [vmem:[%s11607_s8 + $0x204] ss:$8 sps:$4 sm:$0xff]  }
 0x9e0   :  { %5350 = vmatprep.mubr.bf16.mxu0 %v10901_v50  ;;  %5597 = vmatprep.subr.bf16.mxu1 %v8280_v35  ;;  %v4858_v22 = vrot.slane %v10901_v50, 1  ;;  %v10947_v29 = vsel %vm11683_vm10, %v5989_v31, %v5990_v23  ;;  %v4857_v59 = vsel %vm74_vm3, %v4855_v30, %v4856_v37  ;;  %v10963_v14 = vsel %vm11685_vm15, %v5994_v51, %v5995_v32  ;;  %v8298_v35 = vld [vmem:[%s11607_s8 + $0x214] ss:$8 sps:$4 sm:$0xff]   ;;  %v8307_v6 = vld [vmem:[%s11607_s8 + $0x3e4] ss:$8 sps:$4 sm:$0xff]  }
 0x9e1   :  { %7380 = vmatmul.mubr.msk.bf16.gmra.mxu0 %vm10782_vm6, %v10794_v5  ;;  %v10925_v11 = vsel %vm458_vm0, %v4794_v56, %v4797_v15  ;;  %v4863_v5 = vrot.slane %v10906_v20, 1  ;;  %vm11682_vm0 = vmmov %vm11667_vm4  ;;  %v10966_v33 = vsel %vm11686_vm2, %v5995_v32, %v5997_v49  ;;  %v5683_v8 = vrot.slane %v10787_v55, 3  ;;  %v8310_v23 = vld [vmem:[%s11607_s8 + $0x2f4] ss:$8 sps:$4 sm:$0xff]   ;;  %v8319_v30 = vld [vmem:[%s11607_s8 + $0x3c4] ss:$8 sps:$4 sm:$0xff]  }
 0x9e2   :  { %5909 = vmatpush1.bf16.msra.mxu0 %v8275_v25  ;;  %5360 = vmatprep.mubr.bf16.mxu0 %v10925_v11  ;;  %v4859_v63 = vrot.slane %v10925_v11, 1  ;;  %v10944_v2 = vsel %vm11682_vm0, %v5382_v54, %v5387_v34  ;;  %v4861_v16 = vrot.slane %v10868_v44, 1  ;;  %v5375_v54 = vrot.slane %v10802_v53, 2  ;;  %v8301_v44 = vld [vmem:[%s11607_s8 + $0x3f4] ss:$8 sps:$4 sm:$0xff]   ;;  %vm11687_vm5 = vmmov %vm11682_vm0 }
 0x9e3   :  { %5598 = vmatpush1.bf16.msra.mxu1 %v8278_v3  ;;  %5910 = vmatprep.subr.bf16.mxu0 %v8283_v28  ;;  %v5685_v36 = vsel %vm120_vm1, %v5683_v8, %v5684_v62  ;;  %v5374_v18 = vrot.slane %v10787_v55, 2  ;;  %v8299_v55 = vld [vmem:[%s11607_s8 + $0x3f0] ss:$8 sps:$4 sm:$0xff]   ;;  %v8302_v25 = vld [vmem:[%s11607_s8 + $0x200] ss:$8 sps:$4 sm:$0xff]   ;;  %vm11689_vm6 = vmmov %vm11682_vm0 }
 0x9e4   :  { %v4860_v38 = vsel %vm74_vm3, %v4858_v22, %v4859_v63  ;;  %5599 = vmatprep.subr.bf16.mxu1 %v8286_v40  ;;  %v4864_v45 = vsel %vm74_vm3, %v4859_v63, %v4863_v5  ;;  %v4862_v15 = vsel %vm74_vm3, %v4856_v37, %v4861_v16  ;;  %v8308_v3 = vld [vmem:[%s11607_s8 + $0x2f0] ss:$8 sps:$4 sm:$0xff]   ;;  %v8313_v56 = vld [vmem:[%s11607_s8 + $0x3d4] ss:$8 sps:$4 sm:$0xff]   ;;  %v8316_v28 = vld [vmem:[%s11607_s8 + $0x2e4] ss:$8 sps:$4 sm:$0xff]  }
 0x9e5   :  { %5117 = vmatprep.mubr.bf16.mxu1 %v4860_v38  ;;  %v5376_v39 = vsel %vm11687_vm5, %v5374_v18, %v5375_v54  ;;  %v8311_v34 = vld [vmem:[%s11607_s8 + $0x3d0] ss:$8 sps:$4 sm:$0xff]   ;;  %v8314_v40 = vld [vmem:[%s11607_s8 + $0x2e0] ss:$8 sps:$4 sm:$0xff]   ;;  %v8322_v31 = vld [vmem:[%s11607_s8 + $0x2d4] ss:$8 sps:$4 sm:$0xff]  }
 0x9e6   :  { %5911 = vmatpush1.bf16.msra.mxu0 %v8281_v9  ;;  %5118 = vmatmul.mubr.bf16.gmra.mxu1 %v4857_v59  ;;  %v8317_v37 = vld [vmem:[%s11607_s8 + $0x3c0] ss:$8 sps:$4 sm:$0xff]   ;;  %v8320_v32 = vld [vmem:[%s11607_s8 + $0x2d0] ss:$8 sps:$4 sm:$0xff]   ;;  %v8325_v49 = vld [vmem:[%s11607_s8 + $0x3b4] ss:$8 sps:$4 sm:$0xff]  }
 0x9e7   :  { %5600 = vmatpush1.bf16.msra.mxu1 %v8284_v24  ;;  %5127 = vmatprep.mubr.bf16.mxu1 %v4864_v45  ;;  %v8328_v9 = vld [vmem:[%s11607_s8 + $0x2c4] ss:$8 sps:$4 sm:$0xff]   ;;  %v8323_v22 = vld [vmem:[%s11607_s8 + $0x3b0] ss:$8 sps:$4 sm:$0xff]   ;;  %v8326_v63 = vld [vmem:[%s11607_s8 + $0x2c0] ss:$8 sps:$4 sm:$0xff]  }
 0x9e8   :  { %5912 = vmatprep.subr.bf16.mxu0 %v8289_v48  ;;  %5601 = vmatprep.subr.bf16.mxu1 %v8292_v58  ;;  %v8331_v5 = vld [vmem:[%s11607_s8 + $0x3a4] ss:$8 sps:$4 sm:$0xff]   ;;  %v8334_v24 = vld [vmem:[%s11607_s8 + $0x2b4] ss:$8 sps:$4 sm:$0xff]   ;;  %v8329_v51 = vld [vmem:[%s11607_s8 + $0x3a0] ss:$8 sps:$4 sm:$0xff]  }
 0x9e9   :  { %5361 = vmatmul.mubr.bf16.gmra.mxu0 %v10865_v57  ;;  %v8296_v57 = vld [vmem:[%s11607_s8 + $0x210] ss:$8 sps:$4 sm:$0xff]   ;;  %v8337_v48 = vld [vmem:[%s11607_s8 + $0x394] ss:$8 sps:$4 sm:$0xff]   ;;  %v8340_v58 = vld [vmem:[%s11607_s8 + $0x2a4] ss:$8 sps:$4 sm:$0xff]  }
 0x9ea   :  { %5913 = vmatpush1.bf16.msra.mxu0 %v8287_v52  ;;  %5932 = vmatprep.mubr.bf16.mxu0 %v5685_v36  ;;  %v8332_v38 = vld [vmem:[%s11607_s8 + $0x2b0] ss:$8 sps:$4 sm:$0xff]   ;;  %v8338_v45 = vld [vmem:[%s11607_s8 + $0x2a0] ss:$8 sps:$4 sm:$0xff]   ;;  %v8343_v52 = vld [vmem:[%s11607_s8 + $0x384] ss:$8 sps:$4 sm:$0xff]  }
 0x9eb   :  { %5602 = vmatpush1.bf16.msra.mxu1 %v8290_v61  ;;  %5914 = vmatprep.subr.bf16.mxu0 %v8295_v19  ;;  %v8335_v59 = vld [vmem:[%s11607_s8 + $0x390] ss:$8 sps:$4 sm:$0xff]   ;;  %v8346_v61 = vld [vmem:[%s11607_s8 + $0x294] ss:$8 sps:$4 sm:$0xff]   ;;  %v8341_v8 = vld [vmem:[%s11607_s8 + $0x380] ss:$8 sps:$4 sm:$0xff]  }
 0x9ec   :  { %5603 = vmatprep.subr.bf16.mxu1 %v8298_v35  ;;  %v8344_v19 = vld [vmem:[%s11607_s8 + $0x290] ss:$8 sps:$4 sm:$0xff]   ;;  %v8349_v35 = vld [vmem:[%s11608_s9 + $0x74] ss:$8 sps:$4 sm:$0xff]   ;;  %v8352_v36 = vld [vmem:[%s11607_s8 + $0x284] ss:$8 sps:$4 sm:$0xff]  }
 0x9ed   :  { %v5688_v16 = vrot.slane %v10789_v10, 3  ;;  %v8355_v18 = vld [vmem:[%s11608_s9 + $0x64] ss:$8 sps:$4 sm:$0xff]   ;;  %vm11688_vm3 = vmmov %vm11682_vm0  ;;  %v8370_v53 = vld [vmem:[%s11607_s8 + $0x454] ss:$8 sps:$4 sm:$0xff]  }
 0x9ee   :  { %5915 = vmatpush1.bf16.msra.mxu0 %v8293_v13  ;;  %5128 = vmatmul.mubr.bf16.gmra.mxu1 %v4862_v15  ;;  %v8347_v13 = vld [vmem:[%s11608_s9 + $0x70] ss:$8 sps:$4 sm:$0xff]   ;;  %v8353_v15 = vld [vmem:[%s11608_s9 + $0x60] ss:$8 sps:$4 sm:$0xff]  }
 0x9ef   :  { %5604 = vmatpush1.bf16.msra.mxu1 %v8296_v57  ;;  %5623 = vmatprep.mubr.bf16.mxu1 %v5376_v39  ;;  %v8350_v57 = vld [vmem:[%s11607_s8 + $0x280] ss:$8 sps:$4 sm:$0xff]   ;;  %v5379_v39 = vrot.slane %v10789_v10, 2 }
 0x9f0   :  { %5916 = vmatprep.subr.bf16.mxu0 %v8301_v44  ;;  %5605 = vmatprep.subr.bf16.mxu1 %v8304_v47  ;;  %v8358_v44 = vld [vmem:[%s11607_s8 + $0x474] ss:$8 sps:$4 sm:$0xff]   ;;  %v5689_v47 = vsel %vm120_vm1, %v5684_v62, %v5688_v16  ;;  %v8364_v62 = vld [vmem:[%s11607_s8 + $0x464] ss:$8 sps:$4 sm:$0xff]  }
 0x9f1   :  { %v5380_v10 = vsel %vm11688_vm3, %v5375_v54, %v5379_v39  ;;  %v8415_v16 = vld [vmem:[%s11608_s9 + $0xa4] ss:$8 sps:$4 sm:$0xff]   ;;  %v8428_v39 = vld [vmem:[%s11608_s9 + $0x150] ss:$8 sps:$4 sm:$0xff]  }
 0x9f2   :  { %5917 = vmatpush2.bf16.msra.mxu0 %v8299_v55  ;;  %v8356_v55 = vld [vmem:[%s11607_s8 + $0x470] ss:$8 sps:$4 sm:$0xff]  }
 0x9f3   :  { %5606 = vmatpush1.bf16.msra.mxu1 %v8302_v25  ;;  %5918 = vmatprep.subr.bf16.mxu0 %v8307_v6  ;;  %v5694_v25 = vrot.slane %v10925_v11, 3  ;;  %v8359_v6 = vld [vmem:[%s11608_s9 + $0x50] ss:$8 sps:$4 sm:$0xff]  }
 0x9f4   :  { %5607 = vmatprep.subr.bf16.mxu1 %v8310_v23  ;;  %v5693_v23 = vrot.slane %v10901_v50, 3 }
 0x9f6   :  { %5919 = vmatpush2.bf16.msra.mxu0 %v8305_v43  ;;  %v8362_v43 = vld [vmem:[%s11607_s8 + $0x460] ss:$8 sps:$4 sm:$0xff]   ;;  %v5695_v54 = vsel %vm120_vm1, %v5693_v23, %v5694_v25  ;;  %v8434_v23 = vld [vmem:[%s11608_s9 + $0x130] ss:$8 sps:$4 sm:$0xff]  }
 0x9f7   :  { %5608 = vmatpush2.bf16.msra.mxu1 %v8308_v3  ;;  %5920 = vmatprep.subr.bf16.mxu0 %v8313_v56  ;;  %v8365_v3 = vld [vmem:[%s11608_s9 + $0x40] ss:$8 sps:$4 sm:$0xff]   ;;  %v5385_v56 = vrot.slane %v10925_v11, 2 }
 0x9f8   :  { %5609 = vmatprep.subr.bf16.mxu1 %v8316_v28  ;;  %v8368_v28 = vld [vmem:[%s11607_s8 + $0x450] ss:$8 sps:$4 sm:$0xff]  }
 0x9fa   :  { %5921 = vmatpush2.bf16.msra.mxu0 %v8311_v34  ;;  %v5384_v34 = vrot.slane %v10901_v50, 2  ;;  %v8374_v50 = vld [vmem:[%s11607_s8 + $0x440] ss:$8 sps:$4 sm:$0xff]  }
 0x9fb   :  { %5610 = vmatpush2.bf16.msra.mxu1 %v8314_v40  ;;  %5922 = vmatprep.subr.bf16.mxu0 %v8319_v30  ;;  %v8376_v40 = vld [vmem:[%s11607_s8 + $0x444] ss:$8 sps:$4 sm:$0xff]   ;;  %v5698_v30 = vrot.slane %v10906_v20, 3 }
 0x9fc   :  { %5611 = vmatprep.subr.bf16.mxu1 %v8322_v31  ;;  %v5386_v11 = vsel %vm11689_vm6, %v5384_v34, %v5385_v56  ;;  %v8371_v31 = vld [vmem:[%s11608_s9 + $0x30] ss:$8 sps:$4 sm:$0xff]  }
 0x9fd   :  { %v8440_v34 = vld [vmem:[%s11608_s9 + $0x110] ss:$8 sps:$4 sm:$0xff]  }
 0x9fe   :  { %5923 = vmatpush2.bf16.msra.mxu0 %v8317_v37  ;;  %v8379_v37 = vld [vmem:[%s11608_s9 + $0x24] ss:$8 sps:$4 sm:$0xff]  }
 0x9ff   :  { %5612 = vmatpush2.bf16.msra.mxu1 %v8320_v32  ;;  %5924 = vmatprep.subr.bf16.mxu0 %v8325_v49  ;;  %v5699_v32 = vsel %vm120_vm1, %v5694_v25, %v5698_v30  ;;  %v8377_v49 = vld [vmem:[%s11608_s9 + $0x20] ss:$8 sps:$4 sm:$0xff]   ;;  %vm11690_vm1 = vmmov %vm11682_vm0  ;;  %v8445_v30 = vld [vmem:[%s11608_s9 + $0x104] ss:$8 sps:$4 sm:$0xff]  }
 0xa00   :  { %5613 = vmatprep.subr.bf16.mxu1 %v8328_v9  ;;  %v5389_v9 = vrot.slane %v10906_v20, 2 }
 0xa02   :  { %5925 = vmatpush2.bf16.msra.mxu0 %v8323_v22  ;;  %v8380_v22 = vld [vmem:[%s11607_s8 + $0x430] ss:$8 sps:$4 sm:$0xff]   ;;  %v5390_v20 = vsel %vm11690_vm1, %v5385_v56, %v5389_v9  ;;  %v8451_v9 = vld [vmem:[%s11608_s9 + $0x1e4] ss:$8 sps:$4 sm:$0xff]  }
 0xa03   :  { %5614 = vmatpush2.bf16.msra.mxu1 %v8326_v63  ;;  %5926 = vmatprep.subr.bf16.mxu0 %v8331_v5  ;;  %v8388_v63 = vld [vmem:[%s11607_s8 + $0x424] ss:$8 sps:$4 sm:$0xff]   ;;  %v8383_v5 = vld [vmem:[%s11608_s9 + $0x10] ss:$8 sps:$4 sm:$0xff]  }
 0xa04   :  { %5615 = vmatprep.subr.bf16.mxu1 %v8334_v24  ;;  %v8386_v24 = vld [vmem:[%s11607_s8 + $0x420] ss:$8 sps:$4 sm:$0xff]  }
 0xa06   :  { %5927 = vmatpush2.bf16.msra.mxu0 %v8329_v51  ;;  %v8391_v51 = vld [vmem:[%s11608_s9 + $0x4] ss:$8 sps:$4 sm:$0xff]  }
 0xa07   :  { %5616 = vmatpush2.bf16.msra.mxu1 %v8332_v38  ;;  %5928 = vmatprep.subr.bf16.mxu0 %v8337_v48  ;;  %v8394_v38 = vld [vmem:[%s11607_s8 + $0x414] ss:$8 sps:$4 sm:$0xff]   ;;  %v8389_v48 = vld [vmem:[%s11608_s9] ss:$8 sps:$4 sm:$0xff]  }
 0xa08   :  { %5617 = vmatprep.subr.bf16.mxu1 %v8340_v58  ;;  %v8392_v58 = vld [vmem:[%s11607_s8 + $0x410] ss:$8 sps:$4 sm:$0xff]  }
 0xa0a   :  { %5929 = vmatpush2.bf16.msra.mxu0 %v8335_v59  ;;  %v8395_v59 = vld [vmem:[%s11608_s9 + $0xf0] ss:$8 sps:$4 sm:$0xff]  }
 0xa0b   :  { %5618 = vmatpush2.bf16.msra.mxu1 %v8338_v45  ;;  %5930 = vmatprep.subr.bf16.mxu0 %v8343_v52  ;;  %v8398_v45 = vld [vmem:[%s11607_s8 + $0x400] ss:$8 sps:$4 sm:$0xff]   ;;  %v8403_v52 = vld [vmem:[%s11608_s9 + $0xe4] ss:$8 sps:$4 sm:$0xff]  }
 0xa0c   :  { %5619 = vmatprep.subr.bf16.mxu1 %v8346_v61  ;;  %v8406_v61 = vld [vmem:[%s11608_s9 + $0xd4] ss:$8 sps:$4 sm:$0xff]  }
 0xa0e   :  { %5931 = vmatpush2.bf16.msra.mxu0 %v8341_v8  ;;  %v8404_v8 = vld [vmem:[%s11608_s9 + $0xd0] ss:$8 sps:$4 sm:$0xff]  }
 0xa0f   :  { %5620 = vmatpush2.bf16.msra.mxu1 %v8344_v19  ;;  %6709 = vmatprep.subr.bf16.mxu0 %v8349_v35  ;;  %v8409_v19 = vld [vmem:[%s11608_s9 + $0xc4] ss:$8 sps:$4 sm:$0xff]   ;;  %v8407_v35 = vld [vmem:[%s11608_s9 + $0xc0] ss:$8 sps:$4 sm:$0xff]  }
 0xa10   :  { %5621 = vmatprep.subr.bf16.mxu1 %v8352_v36  ;;  %v8410_v36 = vld [vmem:[%s11608_s9 + $0xb0] ss:$8 sps:$4 sm:$0xff]  }
 0xa11   :  { %5933 = vmatmul.mubr.bf16.vlgmr.msra.gmra.mxu0 %v10834_v4  ;;  %v8361_v4 = vld [vmem:[%s11608_s9 + $0x54] ss:$8 sps:$4 sm:$0xff]  }
 0xa12   :  { %5942 = vmatprep.mubr.bf16.mxu0 %v5689_v47  ;;  %6710 = vmatpush1.bf16.msra.mxu0 %v8347_v13  ;;  %v8413_v13 = vld [vmem:[%s11608_s9 + $0xa0] ss:$8 sps:$4 sm:$0xff]   ;;  %v8424_v47 = vld [vmem:[%s11608_s9 + $0x174] ss:$8 sps:$4 sm:$0xff]  }
 0xa13   :  { %5622 = vmatpush2.bf16.msra.mxu1 %v8350_v57  ;;  %6711 = vmatprep.subr.bf16.mxu0 %v8355_v18  ;;  %v8416_v57 = vld [vmem:[%s11608_s9 + $0x90] ss:$8 sps:$4 sm:$0xff]   ;;  %v8421_v18 = vld [vmem:[%s11608_s9 + $0x84] ss:$8 sps:$4 sm:$0xff]  }
 0xa14   :  { %6099 = vmatprep.subr.bf16.mxu1 %v8358_v44  ;;  %v8419_v44 = vld [vmem:[%s11608_s9 + $0x80] ss:$8 sps:$4 sm:$0xff]  }
 0xa16   :  { %5624 = vmatmul.mubr.bf16.vlgmr.msra.gmra.mxu1 %v10844_v27  ;;  %6712 = vmatpush1.bf16.msra.mxu0 %v8353_v15  ;;  %v8367_v27 = vld [vmem:[%s11608_s9 + $0x44] ss:$8 sps:$4 sm:$0xff]   ;;  %v8425_v15 = vld [vmem:[%s11608_s9 + $0x160] ss:$8 sps:$4 sm:$0xff]  }
 0xa17   :  { %5633 = vmatprep.mubr.bf16.mxu1 %v5380_v10  ;;  %6100 = vmatpush1.bf16.msra.mxu1 %v8356_v55 }
 0xa18   :  { %6713 = vmatprep.subr.bf16.mxu0 %v8361_v4  ;;  %6101 = vmatprep.subr.bf16.mxu1 %v8364_v62  ;;  %v8433_v4 = vld [vmem:[%s11608_s9 + $0x144] ss:$8 sps:$4 sm:$0xff]   ;;  %v8431_v62 = vld [vmem:[%s11608_s9 + $0x140] ss:$8 sps:$4 sm:$0xff]  }
 0xa19   :  { %5943 = vmatmul.mubr.bf16.gmra.mxu0 %v10856_v41  ;;  %v8373_v41 = vld [vmem:[%s11608_s9 + $0x34] ss:$8 sps:$4 sm:$0xff]  }
 0xa1a   :  { %5952 = vmatprep.mubr.bf16.mxu0 %v5695_v54  ;;  %6714 = vmatpush1.bf16.msra.mxu0 %v8359_v6  ;;  %v8436_v6 = vld [vmem:[%s11608_s9 + $0x134] ss:$8 sps:$4 sm:$0xff]   ;;  %v8437_v54 = vld [vmem:[%s11608_s9 + $0x120] ss:$8 sps:$4 sm:$0xff]  }
 0xa1b   :  { %6102 = vmatpush1.bf16.msra.mxu1 %v8362_v43  ;;  %6715 = vmatprep.subr.bf16.mxu0 %v8367_v27 }
 0xa1c   :  { %6103 = vmatprep.subr.bf16.mxu1 %v8370_v53  ;;  %v8439_v53 = vld [vmem:[%s11608_s9 + $0x124] ss:$8 sps:$4 sm:$0xff]  }
 0xa1e   :  { %5634 = vmatmul.mubr.bf16.gmra.mxu1 %v10861_v46  ;;  %6716 = vmatpush1.bf16.msra.mxu0 %v8365_v3  ;;  %v8382_v46 = vld [vmem:[%s11607_s8 + $0x434] ss:$8 sps:$4 sm:$0xff]  }
 0xa1f   :  { %5643 = vmatprep.mubr.bf16.mxu1 %v5386_v11  ;;  %6104 = vmatpush1.bf16.msra.mxu1 %v8368_v28  ;;  %v8442_v3 = vld [vmem:[%s11608_s9 + $0x114] ss:$8 sps:$4 sm:$0xff]   ;;  %v8443_v11 = vld [vmem:[%s11608_s9 + $0x100] ss:$8 sps:$4 sm:$0xff]  }
 0xa20   :  { %6717 = vmatprep.subr.bf16.mxu0 %v8373_v41  ;;  %6105 = vmatprep.subr.bf16.mxu1 %v8376_v40 }
 0xa21   :  { %5953 = vmatmul.mubr.bf16.gmra.mxu0 %v10895_v7  ;;  %v8385_v7 = vld [vmem:[%s11608_s9 + $0x14] ss:$8 sps:$4 sm:$0xff]  }
 0xa22   :  { %5962 = vmatprep.mubr.bf16.mxu0 %v5699_v32  ;;  %6718 = vmatpush1.bf16.msra.mxu0 %v8371_v31 }
 0xa23   :  { %6106 = vmatpush1.bf16.msra.mxu1 %v8374_v50  ;;  %6719 = vmatprep.subr.bf16.mxu0 %v8379_v37  ;;  %v8448_v37 = vld [vmem:[%s11608_s9 + $0x1f4] ss:$8 sps:$4 sm:$0xff]  }
 0xa24   :  { %6107 = vmatprep.subr.bf16.mxu1 %v8382_v46  ;;  %v8446_v46 = vld [vmem:[%s11608_s9 + $0x1f0] ss:$8 sps:$4 sm:$0xff]  }
 0xa26   :  { %5644 = vmatmul.mubr.bf16.gmra.mxu1 %v10918_v17  ;;  %6720 = vmatpush1.bf16.msra.mxu0 %v8377_v49  ;;  %v6295_v17 = vpack.c.b16 %v10305_v21, %v10305_v21  ;;  %v8397_v21 = vld [vmem:[%s11608_s9 + $0xf4] ss:$8 sps:$4 sm:$0xff]  }
 0xa27   :  { %5653 = vmatprep.mubr.bf16.mxu1 %v5390_v20  ;;  %6108 = vmatpush1.bf16.msra.mxu1 %v8380_v22  ;;  %v8449_v22 = vld [vmem:[%s11608_s9 + $0x1e0] ss:$8 sps:$4 sm:$0xff]  }
 0xa28   :  { %6721 = vmatprep.subr.bf16.mxu0 %v8385_v7  ;;  %6109 = vmatprep.subr.bf16.mxu1 %v8388_v63  ;;  %v8454_v63 = vld [vmem:[%s11608_s9 + $0x1d4] ss:$8 sps:$4 sm:$0xff]  }
 0xa29   :  { %5963 = vmatmul.mubr.bf16.gmra.mxu0 %v10938_v42  ;;  %v8400_v42 = vld [vmem:[%s11607_s8 + $0x404] ss:$8 sps:$4 sm:$0xff]  }
 0xa2a   :  { %6722 = vmatpush1.bf16.msra.mxu0 %v8383_v5  ;;  %6741 = vmatprep.mubr.bf16.mxu0 %v6295_v17  ;;  %v8452_v5 = vld [vmem:[%s11608_s9 + $0x1d0] ss:$8 sps:$4 sm:$0xff]  }
 0xa2b   :  { %6110 = vmatpush1.bf16.msra.mxu1 %v8386_v24  ;;  %6723 = vmatprep.subr.bf16.mxu0 %v8391_v51  ;;  %v8457_v24 = vld [vmem:[%s11608_s9 + $0x1c4] ss:$8 sps:$4 sm:$0xff]  }
 0xa2c   :  { %6111 = vmatprep.subr.bf16.mxu1 %v8394_v38  ;;  %v8455_v38 = vld [vmem:[%s11608_s9 + $0x1c0] ss:$8 sps:$4 sm:$0xff]  }
 0xa2e   :  { %5654 = vmatmul.mubr.bf16.gmra.mxu1 %v10944_v2  ;;  %6724 = vmatpush1.bf16.msra.mxu0 %v8389_v48  ;;  %v8401_v2 = vld [vmem:[%s11608_s9 + $0xe0] ss:$8 sps:$4 sm:$0xff]   ;;  %v8460_v48 = vld [vmem:[%s11608_s9 + $0x1b4] ss:$8 sps:$4 sm:$0xff]  }
 0xa2f   :  { %6112 = vmatpush1.bf16.msra.mxu1 %v8392_v58  ;;  %6725 = vmatprep.subr.bf16.mxu0 %v8397_v21  ;;  %v8458_v58 = vld [vmem:[%s11608_s9 + $0x1b0] ss:$8 sps:$4 sm:$0xff]  }
 0xa30   :  { %6113 = vmatprep.subr.bf16.mxu1 %v8400_v42  ;;  %6131 = vmatprep.mubr.bf16.mxu1 %v8506_v26  ;;  %v8463_v42 = vld [vmem:[%s11608_s9 + $0x1a4] ss:$8 sps:$4 sm:$0xff]  }
 0xa32   :  { %6726 = vmatpush2.bf16.msra.mxu0 %v8395_v59  ;;  %v8470_v59 = vld [vmem:[%s11609_s10 + $0x78] sm:$0xff]  }
 0xa33   :  { %6114 = vmatpush1.bf16.msra.mxu1 %v8398_v45  ;;  %6727 = vmatprep.subr.bf16.mxu0 %v8403_v52  ;;  %v8471_v52 = vld [vmem:[%s11609_s10 + $0x38] sm:$0xff]  }
 0xa34   :  { %6750 = vmatprep.subr.bf16.mxu1 %v8424_v47  ;;  %v8478_v47 = vld [vmem:[%s11609_s10 + $0x58] sm:$0xff]  }
 0xa36   :  { %6132 = vmatmul.mubr.bf16.vlgmr.msra.gmra.mxu1 %v10947_v29  ;;  %6728 = vmatpush2.bf16.msra.mxu0 %v8401_v2  ;;  %v8412_v29 = vld [vmem:[%s11608_s9 + $0xb4] ss:$8 sps:$4 sm:$0xff]  }
 0xa37   :  { %6729 = vmatprep.subr.bf16.mxu0 %v8406_v61  ;;  %6141 = vmatprep.mubr.bf16.mxu1 %v8506_v26  ;;  %v8472_v2 = vld [vmem:[%s11609_s10 + $0x70] sm:$0xff]  }
 0xa38   :  { %v8473_v61 = vld [vmem:[%s11609_s10 + $0x30] sm:$0xff]  }
 0xa3a   :  { %6730 = vmatpush2.bf16.msra.mxu0 %v8404_v8 }
 0xa3b   :  { %6731 = vmatprep.subr.bf16.mxu0 %v8409_v19  ;;  %v8474_v19 = vld [vmem:[%s11609_s10 + $0x68] sm:$0xff]  }
 0xa3e   :  { %6142 = vmatmul.mubr.bf16.gmra.mxu1 %v10950_v12  ;;  %6732 = vmatpush2.bf16.msra.mxu0 %v8407_v35  ;;  %v8418_v12 = vld [vmem:[%s11608_s9 + $0x94] ss:$8 sps:$4 sm:$0xff]  }
 0xa3f   :  { %6733 = vmatprep.subr.bf16.mxu0 %v8412_v29  ;;  %6151 = vmatprep.mubr.bf16.mxu1 %v8506_v26  ;;  %v8461_v29 = vld [vmem:[%s11608_s9 + $0x1a0] ss:$8 sps:$4 sm:$0xff]  }
 0xa42   :  { %6734 = vmatpush2.bf16.msra.mxu0 %v8410_v36  ;;  %v8466_v36 = vld [vmem:[%s11608_s9 + $0x194] ss:$8 sps:$4 sm:$0xff]  }
 0xa43   :  { %6735 = vmatprep.subr.bf16.mxu0 %v8415_v16  ;;  %v8464_v16 = vld [vmem:[%s11608_s9 + $0x190] ss:$8 sps:$4 sm:$0xff]  }
 0xa46   :  { %6152 = vmatmul.mubr.bf16.gmra.mxu1 %v10963_v14  ;;  %6736 = vmatpush2.bf16.msra.mxu0 %v8413_v13  ;;  %v6294_v14 = vpack.c.b16 %v10302_v60, %v10302_v60  ;;  %v8430_v60 = vld [vmem:[%s11608_s9 + $0x154] ss:$8 sps:$4 sm:$0xff]   ;;  %v8475_v13 = vld [vmem:[%s11609_s10 + $0x28] sm:$0xff]  }
 0xa47   :  { %6737 = vmatprep.subr.bf16.mxu0 %v8418_v12  ;;  %6161 = vmatprep.mubr.bf16.mxu1 %v8506_v26  ;;  %v8422_v26 = vld [vmem:[%s11608_s9 + $0x170] ss:$8 sps:$4 sm:$0xff]  }
 0xa48   :  { %6751 = vmatpush1.bf16.msra.mxu1 %v8422_v26  ;;  %v8467_v26 = vld [vmem:[%s11608_s9 + $0x180] ss:$8 sps:$4 sm:$0xff]  }
 0xa4a   :  { %6738 = vmatpush2.bf16.msra.mxu0 %v8416_v57  ;;  %v8476_v57 = vld [vmem:[%s11609_s10 + $0x60] sm:$0xff]  }
 0xa4b   :  { %6739 = vmatprep.subr.bf16.mxu0 %v8421_v18 }
 0xa4e   :  { %6162 = vmatmul.mubr.bf16.gmra.mxu1 %v10966_v33  ;;  %6740 = vmatpush2.bf16.msra.mxu0 %v8419_v44  ;;  %v8427_v33 = vld [vmem:[%s11608_s9 + $0x164] ss:$8 sps:$4 sm:$0xff]  }
 0xa4f   :  { %6752 = vmatprep.subr.bf16.mxu1 %v8427_v33  ;;  %7687 = vmatprep.subr.bf16.mxu0 %v8470_v59  ;;  %v8469_v44 = vld [vmem:[%s11608_s9 + $0x184] ss:$8 sps:$4 sm:$0xff]  }
 0xa50   :  { %6753 = vmatpush1.bf16.msra.mxu1 %v8425_v15 }
 0xa51   :  { %6742 = vmatmul.mubr.bf16.vlgmr.msra.gmra.mxu0 %v6294_v14  ;;  %6754 = vmatprep.subr.bf16.mxu1 %v8430_v60  ;;  %v8477_v14 = vld [vmem:[%s11609_s10 + $0x20] sm:$0xff]   ;;  %v8479_v60 = vld [vmem:[%s11609_s10 + $0x18] sm:$0xff]  }
 0xa52   :  { %7688 = vmatpush3.bf16.msra.mxu0 %v8471_v52 }
 0xa53   :  { %7689 = vmatprep.subr.bf16.mxu0 %v8472_v2 }
 0xa54   :  { %6755 = vmatpush1.bf16.msra.mxu1 %v8428_v39 }
 0xa55   :  { %6756 = vmatprep.subr.bf16.mxu1 %v8433_v4  ;;  %v8480_v4 = vld [vmem:[%s11609_s10 + $0x50] sm:$0xff]  }
 0xa56   :  { %7690 = vmatpush3.bf16.msra.mxu0 %v8473_v61 }
 0xa57   :  { %7691 = vmatprep.subr.bf16.mxu0 %v8474_v19 }
 0xa58   :  { %6757 = vmatpush1.bf16.msra.mxu1 %v8431_v62 }
 0xa59   :  { %6758 = vmatprep.subr.bf16.mxu1 %v8436_v6  ;;  %v8481_v6 = vld [vmem:[%s11609_s10 + $0x10] sm:$0xff]  }
 0xa5a   :  { %7692 = vmatpush3.bf16.msra.mxu0 %v8475_v13 }
 0xa5b   :  { %7693 = vmatprep.subr.bf16.mxu0 %v8476_v57 }
 0xa5c   :  { %6759 = vmatpush1.bf16.msra.mxu1 %v8434_v23 }
 0xa5d   :  { %6760 = vmatprep.subr.bf16.mxu1 %v8439_v53 }
 0xa5e   :  { %7694 = vmatpush3.bf16.msra.mxu0 %v8477_v14 }
 0xa5f   :  { %7695 = vmatprep.subr.bf16.mxu0 %v8478_v47  ;;  %v7312_v47 = vld [vmem:[%s11599_s11 + $0x10] ss:$8 sm:$0x3] }
 0xa60   :  { %6761 = vmatpush1.bf16.msra.mxu1 %v8437_v54 }
 0xa61   :  { %6762 = vmatprep.subr.bf16.mxu1 %v8442_v3 }
 0xa62   :  { %7696 = vmatpush3.bf16.msra.mxu0 %v8479_v60 }
 0xa63   :  { %7697 = vmatprep.subr.bf16.mxu0 %v8480_v4 }
 0xa64   :  { %6763 = vmatpush1.bf16.msra.mxu1 %v8440_v34 }
 0xa65   :  { %6764 = vmatprep.subr.bf16.mxu1 %v8445_v30 }
 0xa66   :  { %7698 = vmatpush3.bf16.msra.mxu0 %v8481_v6 }
 0xa68   :  { %6765 = vmatpush1.bf16.msra.mxu1 %v8443_v11 }
 0xa69   :  { %6766 = vmatprep.subr.bf16.mxu1 %v8448_v37 }
 0xa6c   :  { %6767 = vmatpush2.bf16.msra.mxu1 %v8446_v46 }
 0xa6d   :  { %6768 = vmatprep.subr.bf16.mxu1 %v8451_v9 }
 0xa70   :  { %6769 = vmatpush2.bf16.msra.mxu1 %v8449_v22 }
 0xa71   :  { %6770 = vmatprep.subr.bf16.mxu1 %v8454_v63 }
 0xa74   :  { %6771 = vmatpush2.bf16.msra.mxu1 %v8452_v5 }
 0xa75   :  { %6772 = vmatprep.subr.bf16.mxu1 %v8457_v24 }
 0xa78   :  { %6773 = vmatpush2.bf16.msra.mxu1 %v8455_v38 }
 0xa79   :  { %6774 = vmatprep.subr.bf16.mxu1 %v8460_v48 }
 0xa7c   :  { %6775 = vmatpush2.bf16.msra.mxu1 %v8458_v58 }
 0xa7d   :  { %6776 = vmatprep.subr.bf16.mxu1 %v8463_v42 }
 0xa80   :  { %6777 = vmatpush2.bf16.msra.mxu1 %v8461_v29 }
 0xa81   :  { %6778 = vmatprep.subr.bf16.mxu1 %v8466_v36 }
 0xa84   :  { %6779 = vmatpush2.bf16.msra.mxu1 %v8464_v16 }
 0xa85   :  { %6780 = vmatprep.subr.bf16.mxu1 %v8469_v44 }
 0xa88   :  { %6781 = vmatpush2.bf16.msra.mxu1 %v8467_v26 }
 0xa91   :  { %v11301_v55 = vpop.f32.mrf.mxu0 }
 0xa93   :  { %v11311_v10 = vpop.f32.mrf.mxu0 }
 0xa95   :  { %v11321_v27 = vpop.f32.mrf.mxu0 }
 0xa96   :  { %v11309_v25 = vpop.f32.mrf.mxu1 }
 0xa97   :  { %v11334_v28 = vpop.f32.mrf.mxu0  ;;  %v5333_v16 = vadd.f32 %v11301_v55, %v11309_v25 }
 0xa98   :  { %v11319_v43 = vpop.f32.mrf.mxu1 }
 0xa99   :  { %v11341_v40 = vpop.f32.mrf.mxu0  ;;  %v5335_v44 = vadd.f32 %v11311_v10, %v11319_v43  ;;  %v11505_v10 = vrot.slane %v7312_v47, %v8648_v1 }
 0xa9a   :  { %v11332_v56 = vpop.f32.mrf.mxu1 }
 0xa9b   :  { %v11351_v50 = vpop.f32.mrf.mxu0  ;;  %v5337_v60 = vadd.f32 %v11321_v27, %v11332_v56 }
 0xa9c   :  { %v11339_v41 = vpop.f32.mrf.mxu1 }
 0xa9d   :  { %v11361_v49 = vpop.f32.mrf.mxu0  ;;  %v5339_v55 = vadd.f32 %v11334_v28, %v11339_v41  ;;  %v11514_v28 = vrot.slane %v7312_v47, %v8646_v0 }
 0xa9e   :  { %v11349_v31 = vpop.f32.mrf.mxu1 }
 0xa9f   :  { %v11374_v20 = vpop.f32.mrf.mxu0 }
 0xaa0   :  { %v11359_v32 = vpop.f32.mrf.mxu1 }
 0xaa1   :  { %v11384_v17 = vpop.f32.mrf.mxu0 }
 0xaa2   :  { %v11369_v7 = vpop.f32.mrf.mxu1 }
 0xaa3   :  { %v11403_v45 = vpop.f32.mrf.mxu0 }
 0xaa4   :  { %v11382_v51 = vpop.f32.mrf.mxu1 }
 0xaa5   :  { %v11419_v35 = vpop.f32.mrf.mxu0 }
 0xaa6   :  { %v11395_v21 = vpop.f32.mrf.mxu1 }
 0xaa7   :  { %v11438_v18 = vpop.f32.mrf.mxu0 }
 0xaa8   :  { %v11414_v8 = vpop.f32.mrf.mxu1 }
 0xaa9   :  { %v11454_v33 = vpop.f32.mrf.mxu0 }
 0xaaa   :  { %v11433_v12 = vpop.f32.mrf.mxu1 }
 0xaab   :  { %v11464_v62 = vpop.f32.mrf.mxu0 }
 0xaac   :  { %v11452_v15 = vpop.f32.mrf.mxu1 }
 0xaad   :  { %v11471_v53 = vpop.f32.mrf.mxu0 }
 0xaae   :  { %v11459_v39 = vpop.f32.mrf.mxu1 }
 0xaaf   :  { %v11475_v3 = vpop.f32.mrf.mxu0 }
 0xab0   :  { %v11469_v23 = vpop.f32.mrf.mxu1  ;;  %11691 = vst [vmem:[#allocation2_spill] sm:$0xff] %v11475_v3 }
 0xab2   :  { %v11473_v54 = vpop.f32.mrf.mxu1 }
 0xab4   :  { %v11477_v30 = vpop.f32.mrf.mxu1 }
 0xab5   :  { %11692 = vst [vmem:[#allocation3_spill] sm:$0xff] %v11477_v30 }
 0xad1   :  { %v5934_v34 = vpop.f32.mrf.mxu0 }
 0xad3   :  { %v5936_v37 = vpop.f32.mrf.mxu0 }
 0xad5   :  { %v5938_v22 = vpop.f32.mrf.mxu0 }
 0xad6   :  { %v5625_v11 = vpop.f32.mrf.mxu1 }
 0xad7   :  { %v5940_v24 = vpop.f32.mrf.mxu0  ;;  %v5664_v14 = vadd.f32 %v5625_v11, %v5333_v16  ;;  %v5343_v11 = vadd.f32 %v11341_v40, %v11349_v31 }
 0xad8   :  { %v5627_v46 = vpop.f32.mrf.mxu1 }
 0xad9   :  { %v5944_v58 = vpop.f32.mrf.mxu0  ;;  %v5665_v4 = vadd.f32 %v5627_v46, %v5335_v44  ;;  %v5973_v30 = vadd.f32 %v5934_v34, %v5664_v14  ;;  %v5345_v46 = vadd.f32 %v11351_v50, %v11359_v32  ;;  %v5347_v14 = vadd.f32 %v11361_v49, %v11369_v7 }
 0xada   :  { %v5629_v9 = vpop.f32.mrf.mxu1  ;;  %v5349_v50 = vadd.f32 %v11374_v20, %v11382_v51  ;;  %v5353_v49 = vadd.f32 %v11384_v17, %v11395_v21 }
 0xadb   :  { %v5946_v52 = vpop.f32.mrf.mxu0  ;;  %v5666_v25 = vadd.f32 %v5629_v9, %v5337_v60  ;;  %v5974_v56 = vadd.f32 %v5936_v37, %v5665_v4 }
 0xadc   :  { %v5631_v63 = vpop.f32.mrf.mxu1 }
 0xadd   :  { %v5948_v19 = vpop.f32.mrf.mxu0  ;;  %v5667_v16 = vadd.f32 %v5631_v63, %v5339_v55  ;;  %v5975_v9 = vadd.f32 %v5938_v22, %v5666_v25 }
 0xade   :  { %v5635_v5 = vpop.f32.mrf.mxu1 }
 0xadf   :  { %v5950_v13 = vpop.f32.mrf.mxu0  ;;  %v5668_v41 = vadd.f32 %v5635_v5, %v5343_v11  ;;  %v5976_v37 = vadd.f32 %v5940_v24, %v5667_v16 }
 0xae0   :  { %v5637_v38 = vpop.f32.mrf.mxu1 }
 0xae1   :  { %v5954_v6 = vpop.f32.mrf.mxu0  ;;  %v5669_v60 = vadd.f32 %v5637_v38, %v5345_v46  ;;  %v5977_v55 = vadd.f32 %v5944_v58, %v5668_v41  ;;  %v5355_v58 = vadd.f32 %v11403_v45, %v11414_v8  ;;  %v5359_v45 = vadd.f32 %v11438_v18, %v11452_v15 }
 0xae2   :  { %v5639_v48 = vpop.f32.mrf.mxu1  ;;  %v5363_v8 = vadd.f32 %v11454_v33, %v11459_v39 }
 0xae3   :  { %v5670_v32 = vadd.f32 %v5639_v48, %v5347_v14  ;;  %v5978_v25 = vadd.f32 %v5946_v52, %v5669_v60  ;;  %v5357_v14 = vadd.f32 %v11419_v35, %v11433_v12 }
 0xae4   :  { %v5641_v42 = vpop.f32.mrf.mxu1 }
 0xae5   :  { %v5671_v7 = vadd.f32 %v5641_v42, %v5349_v50 }
 0xae6   :  { %v5645_v59 = vpop.f32.mrf.mxu1 }
 0xae7   :  { %v5672_v51 = vadd.f32 %v5645_v59, %v5353_v49 }
 0xae8   :  { %v11479_v2 = vpop.f32.mrf.mxu1 }
 0xae9   :  { %v5673_v59 = vadd.f32 %v11479_v2, %v5355_v58 }
 0xaea   :  { %v11481_v61 = vpop.f32.mrf.mxu1 }
 0xaec   :  { %v11483_v29 = vpop.f32.mrf.mxu1 }
 0xaee   :  { %v11485_v36 = vpop.f32.mrf.mxu1 }
 0xaf0   :  { %v11489_v57 = vpop.f32.mrf.mxu1 }
 0xaf2   :  { %v11493_v26 = vpop.f32.mrf.mxu1 }
 0xaf3   :  { %11693 = vst [vmem:[#allocation4_spill] sm:$0xff] %v11493_v26  ;;  %v11509_v26 = vpop.f32.mrf.mxu0 }
 0xaf4   :  { %v11500_v3 = vpop.f32.mrf.mxu1  ;;  %v5982_v18 = vadd.f32 %v11509_v26, %v5673_v59 }
 0xaf5   :  { %v5958_v31 = vpop.f32.mrf.mxu0 }
 0xaf6   :  { %v6133_v43 = vpop.f32.mrf.mxu1 }
 0xaf7   :  { %v6172_v27 = vadd.f32 %v6133_v43, %v5973_v30  ;;  %v5960_v43 = vpop.f32.mrf.mxu0 }
 0xaf8   :  { %v6135_v44 = vpop.f32.mrf.mxu1 }
 0xaf9   :  { %v6173_v34 = vadd.f32 %v6135_v44, %v5974_v56  ;;  %v6199_v63 = vadd.f32 %v11505_v10, %v6172_v27  ;;  %v5979_v27 = vadd.f32 %v5948_v19, %v5670_v32  ;;  %v5964_v21 = vpop.f32.mrf.mxu0 }
 0xafa   :  { %v6137_v40 = vpop.f32.mrf.mxu1 }
 0xafb   :  { %v6174_v30 = vadd.f32 %v6137_v40, %v5975_v9  ;;  %v6200_v47 = vadd.f32 %v11514_v28, %v6173_v34  ;;  %v6215_v11 = vmax.f32 %v6199_v63, 0.0  ;;  %v5980_v9 = vadd.f32 %v5950_v13, %v5671_v7  ;;  %v5966_v50 = vpop.f32.mrf.mxu0 }
 0xafc   :  { %v6139_v4 = vpop.f32.mrf.mxu1  ;;  %v5674_v13 = vadd.f32 %v11481_v61, %v5357_v14  ;;  %v5367_v7 = vadd.f32 %v11471_v53, %v11473_v54 }
 0xafd   :  { %v6201_v5 = vadd.f32 %v11505_v10, %v6174_v30  ;;  %v6175_v22 = vadd.f32 %v6139_v4, %v5976_v37  ;;  %v6216_v56 = vmax.f32 %v6200_v47, 0.0  ;;  %v5981_v30 = vadd.f32 %v5954_v6, %v5672_v51  ;;  %v11696_v51 = vld [vmem:[#allocation4_spill] sm:$0xff] }
 0xafe   :  { %v6143_v38 = vpop.f32.mrf.mxu1  ;;  %v5365_v4 = vadd.f32 %v11464_v62, %v11469_v23  ;;  %v5675_v6 = vadd.f32 %v11483_v29, %v5359_v45  ;;  %v5676_v47 = vadd.f32 %v11485_v36, %v5363_v8  ;;  %v11694_v36 = vld [vmem:[#allocation3_spill] sm:$0xff] }
 0xaff   :  { %v6217_v24 = vmax.f32 %v6201_v5, 0.0  ;;  %v6202_v16 = vadd.f32 %v11514_v28, %v6175_v22  ;;  %v6176_v20 = vadd.f32 %v6143_v38, %v5977_v55  ;;  %v5983_v55 = vadd.f32 %v5958_v31, %v5674_v13  ;;  %v5968_v38 = vpop.f32.mrf.mxu0 }
 0xb00   :  { %v6145_v48 = vpop.f32.mrf.mxu1  ;;  %v5677_v5 = vadd.f32 %v11489_v57, %v5365_v4  ;;  %v5678_v57 = vadd.f32 %v11696_v51, %v5367_v7 }
 0xb01   :  { %v6231_v46 = vpack.c.bf16 %v6217_v24, %v6215_v11  ;;  %v6218_v44 = vmax.f32 %v6202_v16, 0.0  ;;  %v6177_v34 = vadd.f32 %v6145_v48, %v5978_v25  ;;  %v6203_v52 = vadd.f32 %v11505_v10, %v6176_v20  ;;  %v11695_v25 = vld [vmem:[#allocation2_spill] sm:$0xff] }
 0xb02   :  { %v6147_v17 = vpop.f32.mrf.mxu1  ;;  %v5369_v26 = vadd.f32 %v11695_v25, %v11694_v36  ;;  %v5984_v24 = vadd.f32 %v5960_v43, %v5675_v6  ;;  %v5985_v20 = vadd.f32 %v5964_v21, %v5676_v47  ;;  %v5987_v45 = vadd.f32 %v5968_v38, %v5678_v57 }
 0xb03   :  { %v6232_v42 = vpack.c.bf16 %v6218_v44, %v6216_v56  ;;  %v6178_v41 = vadd.f32 %v6147_v17, %v5979_v27  ;;  %v6204_v60 = vadd.f32 %v11514_v28, %v6177_v34  ;;  %v6219_v35 = vmax.f32 %v6203_v52, 0.0  ;;  %v5970_v34 = vpop.f32.mrf.mxu0 }
 0xb04   :  { %v6149_v19 = vpop.f32.mrf.mxu1  ;;  %v5986_v44 = vadd.f32 %v5966_v50, %v5677_v5  ;;  %v5679_v58 = vadd.f32 %v11500_v3, %v5369_v26 }
 0xb05   :  { %v6205_v40 = vadd.f32 %v11505_v10, %v6178_v41  ;;  %v6179_v63 = vadd.f32 %v6149_v19, %v5980_v9  ;;  %v6220_v33 = vmax.f32 %v6204_v60, 0.0 }
 0xb06   :  { %v6153_v37 = vpop.f32.mrf.mxu1  ;;  %v5988_v3 = vadd.f32 %v5970_v34, %v5679_v58 }
 0xb07   :  { %v6221_v12 = vmax.f32 %v6205_v40, 0.0  ;;  %v6206_v2 = vadd.f32 %v11514_v28, %v6179_v63  ;;  %v6180_v32 = vadd.f32 %v6153_v37, %v5981_v30 }
 0xb08   :  { %v6155_v15 = vpop.f32.mrf.mxu1 }
 0xb09   :  { %v6233_v39 = vpack.c.bf16 %v6221_v12, %v6219_v35  ;;  %v6222_v61 = vmax.f32 %v6206_v2, 0.0  ;;  %v6181_v22 = vadd.f32 %v6155_v15, %v5982_v18  ;;  %v6207_v29 = vadd.f32 %v11505_v10, %v6180_v32 }
 0xb0a   :  { %v6157_v49 = vpop.f32.mrf.mxu1 }
 0xb0b   :  { %v6239_v62 = vmax.bf16 %v6233_v39, %v6231_v46  ;;  %v6234_v23 = vpack.c.bf16 %v6222_v61, %v6220_v33  ;;  %v6182_v11 = vadd.f32 %v6157_v49, %v5983_v55  ;;  %v6208_v56 = vadd.f32 %v11514_v28, %v6181_v22 }
 0xb0c   :  { %v6159_v16 = vpop.f32.mrf.mxu1  ;;  %v6223_v43 = vmax.f32 %v6207_v29, 0.0 }
 0xb0d   :  { %v6240_v48 = vunpack.i.l.bf16 %v6239_v62  ;;  %v6241_v31 = vunpack.i.h.bf16 %v6239_v62  ;;  %v6250_v27 = vmax.bf16 %v6234_v23, %v6232_v42  ;;  %v6209_v53 = vadd.f32 %v11505_v10, %v6182_v11 }
 0xb0e   :  { %v6183_v54 = vadd.f32 %v6159_v16, %v5984_v24  ;;  %v6163_v46 = vpop.f32.mrf.mxu1  ;;  %v6224_v40 = vmax.f32 %v6208_v56, 0.0 }
 0xb0f   :  { %v6251_v17 = vunpack.i.l.bf16 %v6250_v27  ;;  %v6252_v52 = vunpack.i.h.bf16 %v6250_v27  ;;  %v6242_v41 = vmax.f32 %v6240_v48, %v6241_v31  ;;  %v6225_v21 = vmax.f32 %v6209_v53, 0.0 }
 0xb10   :  { %v6210_v9 = vadd.f32 %v11514_v28, %v6183_v54  ;;  %v6184_v14 = vadd.f32 %v6163_v46, %v5985_v20  ;;  %v6165_v59 = vpop.f32.mrf.mxu1 }
 0xb11   :  { %v6253_v42 = vmax.f32 %v6251_v17, %v6252_v52  ;;  %v6185_v19 = vadd.f32 %v6165_v59, %v5986_v44  ;;  %v11556_v60 = vpop.f32.mrf.mxu0  ;;  %v6235_v63 = vpack.c.bf16 %v6225_v21, %v6223_v43  ;;  %v6243_v37 = vrot.slane %v6242_v41, 4 }
 0xb12   :  { %v6226_v30 = vmax.f32 %v6210_v9, 0.0  ;;  %v6167_v8 = vpop.f32.mrf.mxu1  ;;  %v6211_v35 = vadd.f32 %v11505_v10, %v6184_v14 }
 0xb13   :  { %v11558_v13 = vpop.f32.mrf.mxu0  ;;  %v6186_v12 = vadd.f32 %v6167_v8, %v5987_v45  ;;  %v6254_v32 = vrot.slane %v6253_v42, 4  ;;  %v6212_v4 = vadd.f32 %v11514_v28, %v6185_v19  ;;  %v6244_v39 = vmax.f32 %v6242_v41, %v6243_v37  ;;  %v8482_v37 = vld [vmem:[%s11609_s10 + $0x48] sm:$0xff]  }
 0xb14   :  { %v6236_v50 = vpack.c.bf16 %v6226_v30, %v6224_v40  ;;  %v6169_v2 = vpop.f32.mrf.mxu1  ;;  %v6227_v61 = vmax.f32 %v6211_v35, 0.0  ;;  %v8484_v35 = vld [vmem:[%s11609_s10 + $0x40] sm:$0xff]   ;;  %7699 = vmatprep.subr.bf16.mxu0 %v8482_v37 }
 0xb15   :  { %v6187_v6 = vadd.f32 %v6169_v2, %v5988_v3  ;;  %v6747_v47 = vpop.f32.mrf.mxu0  ;;  %v6213_v18 = vadd.f32 %v11505_v10, %v6186_v12  ;;  %v6255_v22 = vmax.f32 %v6253_v42, %v6254_v32  ;;  %v6228_v55 = vmax.f32 %v6212_v4, 0.0  ;;  %v8485_v12 = vld [vmem:[%s11609_s10] sm:$0xff]   ;;  %v7461_v2 = vld [vmem:[%s11599_s11 + $0x11] ss:$8 sm:$0x3] }
 0xb16   :  { %v6245_v62 = vrot.slane %v6244_v39, 2  ;;  %v6382_v32 = vrot.slane %v7461_v2, %v8648_v1  ;;  %v6386_v4 = vrot.slane %v7461_v2, %v8646_v0  ;;  %v6827_v0 = vld [vmem:[%s11599_s11 + $0x12] ss:$0 sm:$0xff] }
 0xb17   :  { %v6214_v15 = vadd.f32 %v11514_v28, %v6187_v6  ;;  %v6748_v33 = vpop.f32.mrf.mxu0  ;;  %v6229_v5 = vmax.f32 %v6213_v18, 0.0  ;;  %v6256_v36 = vrot.slane %v6255_v22, 2 }
 0xb18   :  { %v6246_v10 = vmax.f32 %v6244_v39, %v6245_v62  ;;  %v6744_v6 = vadd.f32 %v11556_v60, %v6382_v32  ;;  %v6746_v18 = vadd.f32 %v11558_v13, %v6386_v4 }
 0xb19   :  { %v6230_v49 = vmax.f32 %v6214_v15, 0.0  ;;  %v6237_v7 = vpack.c.bf16 %v6229_v5, %v6227_v61  ;;  %v6257_v20 = vmax.f32 %v6255_v22, %v6256_v36 }
 0xb1a   :  { %v6247_v48 = vrot.slane %v6246_v10, 1 }
 0xb1b   :  { %v6238_v38 = vpack.c.bf16 %v6230_v49, %v6228_v55  ;;  %v6261_v23 = vmax.bf16 %v6237_v7, %v6235_v63  ;;  %v6258_v56 = vrot.slane %v6257_v20, 1 }
 0xb1c   :  { %v6248_v46 = vmax.f32 %v6246_v10, %v6247_v48 }
 0xb1d   :  { %v6272_v29 = vmax.bf16 %v6238_v38, %v6236_v50  ;;  %v6262_v25 = vunpack.i.l.bf16 %v6261_v23  ;;  %v6263_v26 = vunpack.i.h.bf16 %v6261_v23  ;;  %v6259_v34 = vmax.f32 %v6257_v20, %v6258_v56  ;;  %v8483_v50 = vld [vmem:[%s11609_s10 + $0x8] sm:$0xff]  }
 0xb1e   :  { %v6249_v43 = vpack.i.bf16 %v6248_v46, %v6248_v46  ;;  %7700 = vmatpush3.bf16.msra.mxu0 %v8483_v50 }
 0xb1f   :  { %v6273_v11 = vunpack.i.l.bf16 %v6272_v29  ;;  %v6274_v24 = vunpack.i.h.bf16 %v6272_v29  ;;  %v6264_v16 = vmax.f32 %v6262_v25, %v6263_v26  ;;  %v6260_v21 = vpack.i.bf16 %v6259_v34, %v6259_v34  ;;  %7701 = vmatprep.subr.bf16.mxu0 %v8484_v35  ;;  %v6965_v29 = vld [vmem:[%s11599_s11 + $0x16] ss:$0 sm:$0xff] }
 0xb20   :  { %v6302_v42 = vunpack.c.l.b16 %v6249_v43 }
 0xb21   :  { %v6275_v28 = vmax.f32 %v6273_v11, %v6274_v24  ;;  %v6265_v51 = vrot.slane %v6264_v16, 4  ;;  %v6303_v40 = vunpack.c.l.b16 %v6260_v21  ;;  %v6970_v11 = vld [vmem:[%s11599_s11 + $0x13] ss:$0 sm:$0xff] }
 0xb22   :  { %7702 = vmatpush3.bf16.msra.mxu0 %v8485_v12 }
 0xb23   :  { %v6276_v57 = vrot.slane %v6275_v28, 4  ;;  %v6266_v31 = vmax.f32 %v6264_v16, %v6265_v51 }
 0xb25   :  { %v6277_v27 = vmax.f32 %v6275_v28, %v6276_v57  ;;  %v6267_v53 = vrot.slane %v6266_v31, 2 }
 0xb27   :  { %v6278_v54 = vrot.slane %v6277_v27, 2  ;;  %v6268_v44 = vmax.f32 %v6266_v31, %v6267_v53 }
 0xb29   :  { %v6279_v58 = vmax.f32 %v6277_v27, %v6278_v54  ;;  %v6269_v17 = vrot.slane %v6268_v44, 1 }
 0xb2b   :  { %v6280_v52 = vrot.slane %v6279_v58, 1  ;;  %v6270_v41 = vmax.f32 %v6268_v44, %v6269_v17 }
 0xb2d   :  { %v6281_v9 = vmax.f32 %v6279_v58, %v6280_v52  ;;  %v6271_v14 = vpack.i.bf16 %v6270_v41, %v6270_v41 }
 0xb2f   :  { %v6282_v59 = vpack.i.bf16 %v6281_v9, %v6281_v9  ;;  %v6304_v19 = vunpack.c.l.b16 %v6271_v14 }
 0xb31   :  { %v6305_v63 = vunpack.c.l.b16 %v6282_v59  ;;  %v6306_v30 = vsel %vm6291_vm14, %v6304_v19, %v6302_v42 }
 0xb32   :  { %v6308_v3 = vpack.c.b16 %v6306_v30, %v6306_v30 }
 0xb33   :  { %v6307_v45 = vsel %vm6291_vm14, %v6305_v63, %v6303_v40  ;;  %vm11697_vm14 = vmmov %vm11677_vm8  ;;  %vm6977_vm8 = vcmask 1024  }
 0xb34   :  { %v6309_v8 = vpack.c.b16 %v6307_v45, %v6307_v45 }
 0xb36   :  { %6782 = vmatprep.mubr.bf16.mxu1 %v6309_v8 }
 0xb37   :  { %6783 = vmatmul.mubr.bf16.vlgmr.msra.gmra.mxu1 %v6308_v3 }
 0xbf7   :  { %v6784_v47 = vpop.f32.mrf.mxu1 }
 0xbf8   :  { %v6785_v15 = vadd.f32 %v6784_v47, %v6744_v6 }
 0xbf9   :  { %v6786_v33 = vpop.f32.mrf.mxu1 }
 0xbfa   :  { %v6787_v39 = vadd.f32 %v6786_v33, %v6746_v18  ;;  %v6791_v61 = vmax.f32 %v6785_v15, 0.0 }
 0xbfb   :  { %v6788_v5 = vpop.f32.mrf.mxu1 }
 0xbfc   :  { %v6792_v22 = vmax.f32 %v6787_v39, 0.0  ;;  %v6793_v7 = vpack.c.bf16 %v6791_v61, %v6791_v61 }
 0xbfd   :  { %v6789_v55 = vpop.f32.mrf.mxu1 }
 0xbfe   :  { %v6794_v49 = vpack.c.bf16 %v6792_v22, %v6792_v22 }
 0xc00   :  { %6956 = vmatprep.mubr.bf16.mxu0 %v6794_v49 }
 0xc01   :  { %6957 = vmatmul.mubr.bf16.vlgmr.msra.gmra.mxu0 %v6793_v7 }
 0xcc1   :  { %v7703_v38 = vpop.f32.mrf.mxu0 }
 0xcc3   :  { %v7704_v1 = vpop.f32.mrf.mxu0 }
 0xcc4   :  { %v7705_v60 = vadd.f32 %v7704_v1, %v7703_v38 }
 0xcc5   :  { %v7706_v62 = vpop.f32.mrf.mxu0 }
 0xcc6   :  { %v6959_v13 = vadd.f32 %v7705_v60, %v6827_v0 }
 0xcc7   :  { %v7707_v23 = vpop.f32.mrf.mxu0 }
 0xcc8   :  { %v6964_v36 = vmax.f32 %v6959_v13, 0.0 }
 0xcca   :  { %v6966_v25 = vmul.f32 %v6965_v29, %v6964_v36 }
 0xccc   :  { %v6967_v26 = vsel %vm11697_vm14, %v6966_v25, 0.0 }
 0xccd   :  { %6968 = vadd.xlane.f32.xlu0 %v6967_v26 }
 0xd56   :  { %v6969_v24 = vpop.xlane.xlu0 %6968 }
 0xd57   :  { %v6971_v10 = vadd.f32 %v6970_v11, %v6969_v24 }
 0xd59   :  { %v6972_v16 = vsub.f32 0.0, %v6971_v10 }
 0xd5b   :  { %v6973_v28 = vmul.f32 1.442695, %v6972_v16 }
 0xd5d   :  { %8486 = vpow2.f32 %v6973_v28 }
 0xd6a   :  { %v8487_v20 = vpop.eup %8486 }
 0xd6b   :  { %v6975_v51 = vadd.f32 1.0, %v8487_v20 }
 0xd6d   :  { %8488 = vrcp.f32 %v6975_v51 }
 0xd7a   :  { %v8489_v57 = vpop.eup %8488 }
 0xd7b   :  { %6978 = vst.msk [vmem:[%s11610_s12] sm:$0x3] %vm6977_vm8, %v8489_v57 }

</bundles_post_ra>
